<compile_context>
chip_gen: v5e
topology: v5e:2x2
jax: 0.10.0
libtpu: 0.0.40
codegen_flags: <defaults>
</compile_context>

<pallas_src>
import math

import jax
import jax.numpy as jnp
from jax.experimental import pallas as pl
from jax.experimental.pallas import tpu as pltpu

EPS = 1e-5                       # nn.BatchNorm2d default eps
VMEM_LIMIT = 32 * 1024 * 1024    # safe on v5e/v6e (128 MiB) and v7x (64 MiB) VMEM


# -----------------------------------------------------------------------------
# Pass 1: convolution + per-image BN partial statistics
# -----------------------------------------------------------------------------
def _make_conv_stats_kernel(L, Wp, kh, kw):
    """Conv as kh*kw accumulated tap-matmuls on a row-flattened padded image."""
    offs = [dy * Wp + dx for dy in range(kh) for dx in range(kw)]

    def kernel(x_ref, w_ref, mask_ref, conv_ref, stats_ref):
        # x_ref   : (Lp, Cin)  bf16  flattened padded image of one batch element
        # w_ref   : (T, Cin, Cout) bf16
        # mask_ref: (L, 1)     f32   1.0 for valid rows, 0.0 for wrap-junk rows
        # conv_ref: (L, Cout)  f32   conv output (doubles as the VMEM accumulator)
        # stats_ref: (2, Cout) f32   per-image [sum, sum_of_squares] over valid rows
        conv_ref[...] = jnp.dot(x_ref[offs[0]:offs[0] + L, :], w_ref[0],
                                preferred_element_type=jnp.float32)
        for t in range(1, len(offs)):
            o = offs[t]
            conv_ref[...] += jnp.dot(x_ref[o:o + L, :], w_ref[t],
                                     preferred_element_type=jnp.float32)

        am = conv_ref[...] * mask_ref[...]          # mask broadcast over channels
        stats_ref[0:1, :] = jnp.sum(am, axis=0, keepdims=True)
        stats_ref[1:2, :] = jnp.sum(am * am, axis=0, keepdims=True)

    return kernel


def _conv_with_stats(xflat, w_taps, mask, L, Wp, kh, kw):
    """xflat: (N, Lp, Cin) bf16; w_taps: (T, Cin, Cout) bf16; mask: (L, 1) f32."""
    N, Lp, Cin = xflat.shape
    T, _, Cout = w_taps.shape
    kernel = _make_conv_stats_kernel(L, Wp, kh, kw)
    return pl.pallas_call(
        kernel,
        out_shape=(jax.ShapeDtypeStruct((N, L, Cout), jnp.float32),
                   jax.ShapeDtypeStruct((N, 2, Cout), jnp.float32)),
        grid=(N,),
        in_specs=[
            pl.BlockSpec((None, Lp, Cin), lambda n: (n, 0, 0)),
            pl.BlockSpec((T, Cin, Cout), lambda n: (0, 0, 0)),
            pl.BlockSpec((L, 1), lambda n: (0, 0)),
        ],
        out_specs=[
            pl.BlockSpec((None, L, Cout), lambda n: (n, 0, 0)),
            pl.BlockSpec((None, 2, Cout), lambda n: (n, 0, 0)),
        ],
        compiler_params=pltpu.CompilerParams(
            dimension_semantics=("parallel",),     # images independent -> megacore
            vmem_limit_bytes=VMEM_LIMIT),
    )(xflat, w_taps, mask)


# -----------------------------------------------------------------------------
# Pass 2: y = x * scale + shift (+ residual), ReLU   (row-tiled, fully parallel)
# -----------------------------------------------------------------------------
def _bn_act_kernel(x_ref, scale_ref, shift_ref, o_ref):
    y = x_ref[...] * scale_ref[...] + shift_ref[...]
    o_ref[...] = jnp.maximum(y, 0.0).astype(o_ref.dtype)


def _bn_act_res_kernel(x_ref, scale_ref, shift_ref, res_ref, o_ref):
    y = x_ref[...] * scale_ref[...] + shift_ref[...] + res_ref[...]
    o_ref[...] = jnp.maximum(y, 0.0).astype(o_ref.dtype)


def _pick_tile_rows(rows):
    """Largest divisor of `rows` that is a multiple of 8 and <= min(1024, rows//2)."""
    target = min(1024, max(8, rows // 2))
    for tp in range(target, 7, -1):
        if rows % tp == 0 and tp % 8 == 0:
            return tp
    return rows


def _bn_act(x2d, scale, shift, residual=None, out_dtype=jnp.float32):
    R, C = x2d.shape
    TP = _pick_tile_rows(R)
    kernel = _bn_act_kernel if residual is None else _bn_act_res_kernel
    in_specs = [
        pl.BlockSpec((TP, C), lambda i: (i, 0)),
        pl.BlockSpec((1, C), lambda i: (0, 0)),
        pl.BlockSpec((1, C), lambda i: (0, 0)),
    ]
    args = [x2d, scale, shift]
    if residual is not None:
        in_specs.append(pl.BlockSpec((TP, C), lambda i: (i, 0)))
        args.append(residual)
    return pl.pallas_call(
        kernel,
        out_shape=jax.ShapeDtypeStruct((R, C), out_dtype),
        grid=(R // TP,),
        in_specs=in_specs,
        out_specs=pl.BlockSpec((TP, C), lambda i: (i, 0)),
        compiler_params=pltpu.CompilerParams(
            dimension_semantics=("parallel",),
            vmem_limit_bytes=VMEM_LIMIT),
    )(*args)


# -----------------------------------------------------------------------------
# Wrapper glue
# -----------------------------------------------------------------------------
def _bn_scale_shift(stats, gamma, beta, count):
    """Per-channel scale/shift from the kernel's partial sums (training-mode BN)."""
    total = jnp.sum(stats, axis=0)                           # (2, C)
    mean = total[0] / count
    var = jnp.maximum(total[1] / count - mean * mean, 0.0)   # biased variance
    scale = gamma * jax.lax.rsqrt(var + EPS)
    shift = beta - mean * scale
    return scale.reshape(1, -1), shift.reshape(1, -1)


def _flatten_padded(x_nhwc, kh, kw, dtype):
    """Zero-pad (pad=1) and row-flatten to (N, Hp*Wp + extra, C)."""
    N, H, W, C = x_nhwc.shape
    Hp, Wp = H + 2, W + 2
    Ho, Wo = Hp - kh + 1, Wp - kw + 1
    L = Ho * Wp
    xp = jnp.pad(x_nhwc, ((0, 0), (1, 1), (1, 1), (0, 0)))
    xf = xp.reshape(N, Hp * Wp, C)
    extra = max((kh - 1) * Wp + (kw - 1) + L - Hp * Wp, 0)
    if extra:
        xf = jnp.pad(xf, ((0, 0), (0, extra), (0, 0)))
    return xf.astype(dtype), (Ho, Wo, Wp, L)


def _forward(x_nchw, w1, w2, g1, be1, g2, be2):
    x = jnp.transpose(x_nchw, (0, 2, 3, 1)).astype(jnp.float32)    # NCHW -> NHWC
    N, H, W, C = x.shape
    kh, kw, _, Cout = w1.shape

    # ------------------ stage 1: conv1 -> BN1 -> ReLU ------------------
    xf, (Ho, Wo, Wp, L) = _flatten_padded(x, kh, kw, jnp.bfloat16)
    mask = (jnp.arange(L) % Wp < Wo).astype(jnp.float32).reshape(L, 1)
    w1_t = w1.reshape(kh * kw, C, Cout).astype(jnp.bfloat16)
    conv1, stats1 = _conv_with_stats(xf, w1_t, mask, L, Wp, kh, kw)
    P = N * Ho * Wo
    scale1, shift1 = _bn_scale_shift(stats1, g1, be1, P)
    y1 = _bn_act(conv1.reshape(N * L, Cout), scale1, shift1,
                 out_dtype=jnp.bfloat16)                 # bf16: feeds conv2's matmul
    y1 = y1.reshape(N, Ho, Wp, Cout)[:, :, :Wo, :]       # drop wrap-junk columns

    # ------------------ stage 2: conv2 -> BN2 -> (+x) -> ReLU ------------------
    # TODO(synk): stage 2 could consume conv1's raw output + (scale1, shift1) inside
    # the conv kernel to skip this re-pad/flatten round trip through HBM.
    yf, _ = _flatten_padded(y1, kh, kw, jnp.bfloat16)
    w2_t = w2.reshape(kh * kw, Cout, Cout).astype(jnp.bfloat16)
    conv2, stats2 = _conv_with_stats(yf, w2_t, mask, L, Wp, kh, kw)
    scale2, shift2 = _bn_scale_shift(stats2, g2, be2, P)
    # residual (original f32 x) in the same wrap-junk row layout as conv2's output
    res = jnp.pad(x, ((0, 0), (0, 0), (0, Wp - Wo), (0, 0))).reshape(N * L, Cout)
    out = _bn_act(conv2.reshape(N * L, Cout), scale2, shift2,
                  residual=res, out_dtype=jnp.float32)
    out = out.reshape(N, Ho, Wp, Cout)[:, :, :Wo, :]
    return jnp.transpose(out, (0, 3, 1, 2))                        # NHWC -> NCHW


_forward_jit = jax.jit(_forward)


class ResNetBlockPallas:
    """JAX/Pallas port of ResNetBlock(in_channel, out_channel, kernel_size)."""

    def __init__(self, in_channel, out_channel, kernel_size, key):
        # The residual add (x + x1) requires matching shapes, exactly as in the
        # PyTorch module: out_channel == in_channel and kernel_size == 3 (pad=1).
        assert in_channel == out_channel and kernel_size == 3
        k0, k1, k2, k3 = jax.random.split(key, 4)

        fan1 = in_channel * kernel_size * kernel_size
        bnd1 = 1.0 / math.sqrt(fan1)
        self.w1 = jax.random.uniform(
            k0, (kernel_size, kernel_size, in_channel, out_channel),
            jnp.float32, -bnd1, bnd1)
        self.b1 = jax.random.uniform(k1, (out_channel,), jnp.float32, -bnd1, bnd1)

        fan2 = out_channel * kernel_size * kernel_size
        bnd2 = 1.0 / math.sqrt(fan2)
        self.w2 = jax.random.uniform(
            k2, (kernel_size, kernel_size, out_channel, out_channel),
            jnp.float32, -bnd2, bnd2)
        self.b2 = jax.random.uniform(k3, (out_channel,), jnp.float32, -bnd2, bnd2)

        # Conv biases are kept for parameter parity with nn.Conv2d but are NOT fed
        # to the kernels: a per-channel bias is exactly cancelled by the following
        # training-mode BatchNorm's mean subtraction (perf-review item).

        # BatchNorm2d default init: weight = 1, bias = 0.
        self.g1 = jnp.ones((out_channel,), jnp.float32)
        self.beta1 = jnp.zeros((out_channel,), jnp.float32)
        self.g2 = jnp.ones((out_channel,), jnp.float32)
        self.beta2 = jnp.zeros((out_channel,), jnp.float32)

        # TODO(synk): BatchNorm2d running_mean/running_var tracking (training-time
        # state update with unbiased variance) is not implemented; the forward uses
        # batch statistics only, matching the module's training-mode forward.

    def __call__(self, x_nchw):
        return _forward_jit(x_nchw, self.w1, self.w2,
                            self.g1, self.beta1, self.g2, self.beta2)


# -----------------------------------------------------------------------------
# Pure-JAX reference of the PyTorch module (training-mode BN) for validation.
# -----------------------------------------------------------------------------
def _reference_forward(x_nchw, blk):
    def conv(x, w, b):
        y = jax.lax.conv_general_dilated(
            x, w, (1, 1), ((1, 1), (1, 1)),
            dimension_numbers=("NCHW", "HWIO", "NCHW"),
            precision=jax.lax.Precision.HIGHEST)
        return y + b.reshape(1, -1, 1, 1)

    def bn(x, g, b):
        mean = jnp.mean(x, axis=(0, 2, 3), keepdims=True)
        var = jnp.mean((x - mean) ** 2, axis=(0, 2, 3), keepdims=True)
        return ((x - mean) * jax.lax.rsqrt(var + EPS) * g.reshape(1, -1, 1, 1)
                + b.reshape(1, -1, 1, 1))

    x1 = conv(x_nchw, blk.w1, blk.b1)
    x1 = jnp.maximum(bn(x1, blk.g1, blk.beta1), 0.0)
    x1 = conv(x1, blk.w2, blk.b2)
    x1 = bn(x1, blk.g2, blk.beta2)
    return jnp.maximum(x_nchw + x1, 0.0)


if __name__ == "__main__":
    key = jax.random.PRNGKey(0)
    k_x, k_p = jax.random.split(key)

    # Small shapes; the residual add requires in_channel == out_channel.
    N, C, H, W = 2, 8, 16, 16
    x = jax.random.normal(k_x, (N, C, H, W), jnp.float32)

    block = ResNetBlockPallas(in_channel=C, out_channel=C, kernel_size=3, key=k_p)
    out = jax.block_until_ready(block(x))

    assert out.shape == (N, C, H, W), out.shape
    assert bool(jnp.all(out >= 0.0))                         # post-ReLU
    ref = jax.block_until_ready(_reference_forward(x, block))
    err = float(jnp.max(jnp.abs(out - ref)))
    assert err < 0.2, f"max abs err vs reference: {err}"     # bf16-matmul tolerance
    print("KERNEL_OK")
</pallas_src>

<mosaic_0001>
module attributes {stable_mosaic.version = 11 : i64} {
  func.func @kernel(%arg0: i32, %arg1: memref<1x326x8xbf16, #tpu.memory_space<vmem>>, %arg2: memref<9x8x8xbf16, #tpu.memory_space<vmem>>, %arg3: memref<288x1xf32, #tpu.memory_space<vmem>>, %arg4: memref<1x288x8xf32, #tpu.memory_space<vmem>>, %arg5: memref<1x2x8xf32, #tpu.memory_space<vmem>>) attributes {dimension_semantics = [#tpu.dimension_semantics<parallel>], iteration_bounds = array<i64: 2>, scalar_prefetch = 0 : i64, scratch_operands = 0 : i64, tpu.core_type = #tpu.core_type<tc>, window_params = [{transform_indices = @transform_0, window_bounds = array<i64: 1, 326, 8>}, {pipeline_mode = #tpu.pipeline_mode<synchronous>, transform_indices = @transform_1, window_bounds = array<i64: 9, 8, 8>}, {pipeline_mode = #tpu.pipeline_mode<synchronous>, transform_indices = @transform_2, window_bounds = array<i64: 288, 1>}, {transform_indices = @transform_3, window_bounds = array<i64: 1, 288, 8>}, {transform_indices = @transform_4, window_bounds = array<i64: 1, 2, 8>}]} {
    %c0 = arith.constant 0 : index
    %c0_0 = arith.constant 0 : index
    %c0_1 = arith.constant 0 : index
    %0 = vector.load %arg1[%c0, %c0_0, %c0_1] : memref<1x326x8xbf16, #tpu.memory_space<vmem>>, vector<1x288x8xbf16>
    %1 = vector.shape_cast %0 : vector<1x288x8xbf16> to vector<288x8xbf16>
    %c0_2 = arith.constant 0 : index
    %c0_3 = arith.constant 0 : index
    %c0_4 = arith.constant 0 : index
    %2 = vector.load %arg2[%c0_2, %c0_3, %c0_4] : memref<9x8x8xbf16, #tpu.memory_space<vmem>>, vector<1x8x8xbf16>
    %3 = vector.shape_cast %2 : vector<1x8x8xbf16> to vector<8x8xbf16>
    %cst = arith.constant dense<0.000000e+00> : vector<288x8xf32>
    %4 = tpu.matmul %1, %3, %cst {dimension_numbers = #tpu.dot_dimension_numbers<[1], [0], [0], [1], [0, 0, 1, 1], [], []>} : vector<288x8xbf16>, vector<8x8xbf16>, vector<288x8xf32> -> vector<288x8xf32>
    %c0_5 = arith.constant 0 : index
    %c0_6 = arith.constant 0 : index
    %c0_7 = arith.constant 0 : index
    %5 = vector.load %arg4[%c0_5, %c0_6, %c0_7] : memref<1x288x8xf32, #tpu.memory_space<vmem>>, vector<1x288x8xf32>
    %6 = vector.shape_cast %5 : vector<1x288x8xf32> to vector<288x8xf32>
    %7 = vector.shape_cast %4 : vector<288x8xf32> to vector<1x288x8xf32>
    tpu.vector_store %arg4[%c0_5, %c0_6, %c0_7], %7 {strides = array<i32>} : memref<1x288x8xf32, #tpu.memory_space<vmem>>, vector<1x288x8xf32>,
    %c0_8 = arith.constant 0 : index
    %c0_9 = arith.constant 0 : index
    %c0_10 = arith.constant 0 : index
    %8 = vector.load %arg4[%c0_8, %c0_9, %c0_10] : memref<1x288x8xf32, #tpu.memory_space<vmem>>, vector<1x288x8xf32>
    %9 = vector.shape_cast %8 : vector<1x288x8xf32> to vector<288x8xf32>
    %c0_11 = arith.constant 0 : index
    %c1 = arith.constant 1 : index
    %c0_12 = arith.constant 0 : index
    %10 = vector.load %arg1[%c0_11, %c1, %c0_12] : memref<1x326x8xbf16, #tpu.memory_space<vmem>>, vector<1x288x8xbf16>
    %11 = vector.shape_cast %10 : vector<1x288x8xbf16> to vector<288x8xbf16>
    %c1_13 = arith.constant 1 : index
    %c0_14 = arith.constant 0 : index
    %c0_15 = arith.constant 0 : index
    %12 = vector.load %arg2[%c1_13, %c0_14, %c0_15] : memref<9x8x8xbf16, #tpu.memory_space<vmem>>, vector<1x8x8xbf16>
    %13 = vector.shape_cast %12 : vector<1x8x8xbf16> to vector<8x8xbf16>
    %cst_16 = arith.constant dense<0.000000e+00> : vector<288x8xf32>
    %14 = tpu.matmul %11, %13, %cst_16 {dimension_numbers = #tpu.dot_dimension_numbers<[1], [0], [0], [1], [0, 0, 1, 1], [], []>} : vector<288x8xbf16>, vector<8x8xbf16>, vector<288x8xf32> -> vector<288x8xf32>
    %15 = arith.addf %9, %14 : vector<288x8xf32>
    %c0_17 = arith.constant 0 : index
    %c0_18 = arith.constant 0 : index
    %c0_19 = arith.constant 0 : index
    %16 = vector.load %arg4[%c0_17, %c0_18, %c0_19] : memref<1x288x8xf32, #tpu.memory_space<vmem>>, vector<1x288x8xf32>
    %17 = vector.shape_cast %16 : vector<1x288x8xf32> to vector<288x8xf32>
    %18 = vector.shape_cast %15 : vector<288x8xf32> to vector<1x288x8xf32>
    tpu.vector_store %arg4[%c0_17, %c0_18, %c0_19], %18 {strides = array<i32>} : memref<1x288x8xf32, #tpu.memory_space<vmem>>, vector<1x288x8xf32>,
    %c0_20 = arith.constant 0 : index
    %c0_21 = arith.constant 0 : index
    %c0_22 = arith.constant 0 : index
    %19 = vector.load %arg4[%c0_20, %c0_21, %c0_22] : memref<1x288x8xf32, #tpu.memory_space<vmem>>, vector<1x288x8xf32>
    %20 = vector.shape_cast %19 : vector<1x288x8xf32> to vector<288x8xf32>
    %c0_23 = arith.constant 0 : index
    %c2 = arith.constant 2 : index
    %c0_24 = arith.constant 0 : index
    %21 = vector.load %arg1[%c0_23, %c2, %c0_24] : memref<1x326x8xbf16, #tpu.memory_space<vmem>>, vector<1x288x8xbf16>
    %22 = vector.shape_cast %21 : vector<1x288x8xbf16> to vector<288x8xbf16>
    %c2_25 = arith.constant 2 : index
    %c0_26 = arith.constant 0 : index
    %c0_27 = arith.constant 0 : index
    %23 = vector.load %arg2[%c2_25, %c0_26, %c0_27] : memref<9x8x8xbf16, #tpu.memory_space<vmem>>, vector<1x8x8xbf16>
    %24 = vector.shape_cast %23 : vector<1x8x8xbf16> to vector<8x8xbf16>
    %cst_28 = arith.constant dense<0.000000e+00> : vector<288x8xf32>
    %25 = tpu.matmul %22, %24, %cst_28 {dimension_numbers = #tpu.dot_dimension_numbers<[1], [0], [0], [1], [0, 0, 1, 1], [], []>} : vector<288x8xbf16>, vector<8x8xbf16>, vector<288x8xf32> -> vector<288x8xf32>
    %26 = arith.addf %20, %25 : vector<288x8xf32>
    %c0_29 = arith.constant 0 : index
    %c0_30 = arith.constant 0 : index
    %c0_31 = arith.constant 0 : index
    %27 = vector.load %arg4[%c0_29, %c0_30, %c0_31] : memref<1x288x8xf32, #tpu.memory_space<vmem>>, vector<1x288x8xf32>
    %28 = vector.shape_cast %27 : vector<1x288x8xf32> to vector<288x8xf32>
    %29 = vector.shape_cast %26 : vector<288x8xf32> to vector<1x288x8xf32>
    tpu.vector_store %arg4[%c0_29, %c0_30, %c0_31], %29 {strides = array<i32>} : memref<1x288x8xf32, #tpu.memory_space<vmem>>, vector<1x288x8xf32>,
    %c0_32 = arith.constant 0 : index
    %c0_33 = arith.constant 0 : index
    %c0_34 = arith.constant 0 : index
    %30 = vector.load %arg4[%c0_32, %c0_33, %c0_34] : memref<1x288x8xf32, #tpu.memory_space<vmem>>, vector<1x288x8xf32>
    %31 = vector.shape_cast %30 : vector<1x288x8xf32> to vector<288x8xf32>
    %c0_35 = arith.constant 0 : index
    %c18 = arith.constant 18 : index
    %c0_36 = arith.constant 0 : index
    %32 = vector.load %arg1[%c0_35, %c18, %c0_36] : memref<1x326x8xbf16, #tpu.memory_space<vmem>>, vector<1x288x8xbf16>
    %33 = vector.shape_cast %32 : vector<1x288x8xbf16> to vector<288x8xbf16>
    %c3 = arith.constant 3 : index
    %c0_37 = arith.constant 0 : index
    %c0_38 = arith.constant 0 : index
    %34 = vector.load %arg2[%c3, %c0_37, %c0_38] : memref<9x8x8xbf16, #tpu.memory_space<vmem>>, vector<1x8x8xbf16>
    %35 = vector.shape_cast %34 : vector<1x8x8xbf16> to vector<8x8xbf16>
    %cst_39 = arith.constant dense<0.000000e+00> : vector<288x8xf32>
    %36 = tpu.matmul %33, %35, %cst_39 {dimension_numbers = #tpu.dot_dimension_numbers<[1], [0], [0], [1], [0, 0, 1, 1], [], []>} : vector<288x8xbf16>, vector<8x8xbf16>, vector<288x8xf32> -> vector<288x8xf32>
    %37 = arith.addf %31, %36 : vector<288x8xf32>
    %c0_40 = arith.constant 0 : index
    %c0_41 = arith.constant 0 : index
    %c0_42 = arith.constant 0 : index
    %38 = vector.load %arg4[%c0_40, %c0_41, %c0_42] : memref<1x288x8xf32, #tpu.memory_space<vmem>>, vector<1x288x8xf32>
    %39 = vector.shape_cast %38 : vector<1x288x8xf32> to vector<288x8xf32>
    %40 = vector.shape_cast %37 : vector<288x8xf32> to vector<1x288x8xf32>
    tpu.vector_store %arg4[%c0_40, %c0_41, %c0_42], %40 {strides = array<i32>} : memref<1x288x8xf32, #tpu.memory_space<vmem>>, vector<1x288x8xf32>,
    %c0_43 = arith.constant 0 : index
    %c0_44 = arith.constant 0 : index
    %c0_45 = arith.constant 0 : index
    %41 = vector.load %arg4[%c0_43, %c0_44, %c0_45] : memref<1x288x8xf32, #tpu.memory_space<vmem>>, vector<1x288x8xf32>
    %42 = vector.shape_cast %41 : vector<1x288x8xf32> to vector<288x8xf32>
    %c0_46 = arith.constant 0 : index
    %c19 = arith.constant 19 : index
    %c0_47 = arith.constant 0 : index
    %43 = vector.load %arg1[%c0_46, %c19, %c0_47] : memref<1x326x8xbf16, #tpu.memory_space<vmem>>, vector<1x288x8xbf16>
    %44 = vector.shape_cast %43 : vector<1x288x8xbf16> to vector<288x8xbf16>
    %c4 = arith.constant 4 : index
    %c0_48 = arith.constant 0 : index
    %c0_49 = arith.constant 0 : index
    %45 = vector.load %arg2[%c4, %c0_48, %c0_49] : memref<9x8x8xbf16, #tpu.memory_space<vmem>>, vector<1x8x8xbf16>
    %46 = vector.shape_cast %45 : vector<1x8x8xbf16> to vector<8x8xbf16>
    %cst_50 = arith.constant dense<0.000000e+00> : vector<288x8xf32>
    %47 = tpu.matmul %44, %46, %cst_50 {dimension_numbers = #tpu.dot_dimension_numbers<[1], [0], [0], [1], [0, 0, 1, 1], [], []>} : vector<288x8xbf16>, vector<8x8xbf16>, vector<288x8xf32> -> vector<288x8xf32>
    %48 = arith.addf %42, %47 : vector<288x8xf32>
    %c0_51 = arith.constant 0 : index
    %c0_52 = arith.constant 0 : index
    %c0_53 = arith.constant 0 : index
    %49 = vector.load %arg4[%c0_51, %c0_52, %c0_53] : memref<1x288x8xf32, #tpu.memory_space<vmem>>, vector<1x288x8xf32>
    %50 = vector.shape_cast %49 : vector<1x288x8xf32> to vector<288x8xf32>
    %51 = vector.shape_cast %48 : vector<288x8xf32> to vector<1x288x8xf32>
    tpu.vector_store %arg4[%c0_51, %c0_52, %c0_53], %51 {strides = array<i32>} : memref<1x288x8xf32, #tpu.memory_space<vmem>>, vector<1x288x8xf32>,
    %c0_54 = arith.constant 0 : index
    %c0_55 = arith.constant 0 : index
    %c0_56 = arith.constant 0 : index
    %52 = vector.load %arg4[%c0_54, %c0_55, %c0_56] : memref<1x288x8xf32, #tpu.memory_space<vmem>>, vector<1x288x8xf32>
    %53 = vector.shape_cast %52 : vector<1x288x8xf32> to vector<288x8xf32>
    %c0_57 = arith.constant 0 : index
    %c20 = arith.constant 20 : index
    %c0_58 = arith.constant 0 : index
    %54 = vector.load %arg1[%c0_57, %c20, %c0_58] : memref<1x326x8xbf16, #tpu.memory_space<vmem>>, vector<1x288x8xbf16>
    %55 = vector.shape_cast %54 : vector<1x288x8xbf16> to vector<288x8xbf16>
    %c5 = arith.constant 5 : index
    %c0_59 = arith.constant 0 : index
    %c0_60 = arith.constant 0 : index
    %56 = vector.load %arg2[%c5, %c0_59, %c0_60] : memref<9x8x8xbf16, #tpu.memory_space<vmem>>, vector<1x8x8xbf16>
    %57 = vector.shape_cast %56 : vector<1x8x8xbf16> to vector<8x8xbf16>
    %cst_61 = arith.constant dense<0.000000e+00> : vector<288x8xf32>
    %58 = tpu.matmul %55, %57, %cst_61 {dimension_numbers = #tpu.dot_dimension_numbers<[1], [0], [0], [1], [0, 0, 1, 1], [], []>} : vector<288x8xbf16>, vector<8x8xbf16>, vector<288x8xf32> -> vector<288x8xf32>
    %59 = arith.addf %53, %58 : vector<288x8xf32>
    %c0_62 = arith.constant 0 : index
    %c0_63 = arith.constant 0 : index
    %c0_64 = arith.constant 0 : index
    %60 = vector.load %arg4[%c0_62, %c0_63, %c0_64] : memref<1x288x8xf32, #tpu.memory_space<vmem>>, vector<1x288x8xf32>
    %61 = vector.shape_cast %60 : vector<1x288x8xf32> to vector<288x8xf32>
    %62 = vector.shape_cast %59 : vector<288x8xf32> to vector<1x288x8xf32>
    tpu.vector_store %arg4[%c0_62, %c0_63, %c0_64], %62 {strides = array<i32>} : memref<1x288x8xf32, #tpu.memory_space<vmem>>, vector<1x288x8xf32>,
    %c0_65 = arith.constant 0 : index
    %c0_66 = arith.constant 0 : index
    %c0_67 = arith.constant 0 : index
    %63 = vector.load %arg4[%c0_65, %c0_66, %c0_67] : memref<1x288x8xf32, #tpu.memory_space<vmem>>, vector<1x288x8xf32>
    %64 = vector.shape_cast %63 : vector<1x288x8xf32> to vector<288x8xf32>
    %c0_68 = arith.constant 0 : index
    %c36 = arith.constant 36 : index
    %c0_69 = arith.constant 0 : index
    %65 = vector.load %arg1[%c0_68, %c36, %c0_69] : memref<1x326x8xbf16, #tpu.memory_space<vmem>>, vector<1x288x8xbf16>
    %66 = vector.shape_cast %65 : vector<1x288x8xbf16> to vector<288x8xbf16>
    %c6 = arith.constant 6 : index
    %c0_70 = arith.constant 0 : index
    %c0_71 = arith.constant 0 : index
    %67 = vector.load %arg2[%c6, %c0_70, %c0_71] : memref<9x8x8xbf16, #tpu.memory_space<vmem>>, vector<1x8x8xbf16>
    %68 = vector.shape_cast %67 : vector<1x8x8xbf16> to vector<8x8xbf16>
    %cst_72 = arith.constant dense<0.000000e+00> : vector<288x8xf32>
    %69 = tpu.matmul %66, %68, %cst_72 {dimension_numbers = #tpu.dot_dimension_numbers<[1], [0], [0], [1], [0, 0, 1, 1], [], []>} : vector<288x8xbf16>, vector<8x8xbf16>, vector<288x8xf32> -> vector<288x8xf32>
    %70 = arith.addf %64, %69 : vector<288x8xf32>
    %c0_73 = arith.constant 0 : index
    %c0_74 = arith.constant 0 : index
    %c0_75 = arith.constant 0 : index
    %71 = vector.load %arg4[%c0_73, %c0_74, %c0_75] : memref<1x288x8xf32, #tpu.memory_space<vmem>>, vector<1x288x8xf32>
    %72 = vector.shape_cast %71 : vector<1x288x8xf32> to vector<288x8xf32>
    %73 = vector.shape_cast %70 : vector<288x8xf32> to vector<1x288x8xf32>
    tpu.vector_store %arg4[%c0_73, %c0_74, %c0_75], %73 {strides = array<i32>} : memref<1x288x8xf32, #tpu.memory_space<vmem>>, vector<1x288x8xf32>,
    %c0_76 = arith.constant 0 : index
    %c0_77 = arith.constant 0 : index
    %c0_78 = arith.constant 0 : index
    %74 = vector.load %arg4[%c0_76, %c0_77, %c0_78] : memref<1x288x8xf32, #tpu.memory_space<vmem>>, vector<1x288x8xf32>
    %75 = vector.shape_cast %74 : vector<1x288x8xf32> to vector<288x8xf32>
    %c0_79 = arith.constant 0 : index
    %c37 = arith.constant 37 : index
    %c0_80 = arith.constant 0 : index
    %76 = vector.load %arg1[%c0_79, %c37, %c0_80] : memref<1x326x8xbf16, #tpu.memory_space<vmem>>, vector<1x288x8xbf16>
    %77 = vector.shape_cast %76 : vector<1x288x8xbf16> to vector<288x8xbf16>
    %c7 = arith.constant 7 : index
    %c0_81 = arith.constant 0 : index
    %c0_82 = arith.constant 0 : index
    %78 = vector.load %arg2[%c7, %c0_81, %c0_82] : memref<9x8x8xbf16, #tpu.memory_space<vmem>>, vector<1x8x8xbf16>
    %79 = vector.shape_cast %78 : vector<1x8x8xbf16> to vector<8x8xbf16>
    %cst_83 = arith.constant dense<0.000000e+00> : vector<288x8xf32>
    %80 = tpu.matmul %77, %79, %cst_83 {dimension_numbers = #tpu.dot_dimension_numbers<[1], [0], [0], [1], [0, 0, 1, 1], [], []>} : vector<288x8xbf16>, vector<8x8xbf16>, vector<288x8xf32> -> vector<288x8xf32>
    %81 = arith.addf %75, %80 : vector<288x8xf32>
    %c0_84 = arith.constant 0 : index
    %c0_85 = arith.constant 0 : index
    %c0_86 = arith.constant 0 : index
    %82 = vector.load %arg4[%c0_84, %c0_85, %c0_86] : memref<1x288x8xf32, #tpu.memory_space<vmem>>, vector<1x288x8xf32>
    %83 = vector.shape_cast %82 : vector<1x288x8xf32> to vector<288x8xf32>
    %84 = vector.shape_cast %81 : vector<288x8xf32> to vector<1x288x8xf32>
    tpu.vector_store %arg4[%c0_84, %c0_85, %c0_86], %84 {strides = array<i32>} : memref<1x288x8xf32, #tpu.memory_space<vmem>>, vector<1x288x8xf32>,
    %c0_87 = arith.constant 0 : index
    %c0_88 = arith.constant 0 : index
    %c0_89 = arith.constant 0 : index
    %85 = vector.load %arg4[%c0_87, %c0_88, %c0_89] : memref<1x288x8xf32, #tpu.memory_space<vmem>>, vector<1x288x8xf32>
    %86 = vector.shape_cast %85 : vector<1x288x8xf32> to vector<288x8xf32>
    %c0_90 = arith.constant 0 : index
    %c38 = arith.constant 38 : index
    %c0_91 = arith.constant 0 : index
    %87 = vector.load %arg1[%c0_90, %c38, %c0_91] : memref<1x326x8xbf16, #tpu.memory_space<vmem>>, vector<1x288x8xbf16>
    %88 = vector.shape_cast %87 : vector<1x288x8xbf16> to vector<288x8xbf16>
    %c8 = arith.constant 8 : index
    %c0_92 = arith.constant 0 : index
    %c0_93 = arith.constant 0 : index
    %89 = vector.load %arg2[%c8, %c0_92, %c0_93] : memref<9x8x8xbf16, #tpu.memory_space<vmem>>, vector<1x8x8xbf16>
    %90 = vector.shape_cast %89 : vector<1x8x8xbf16> to vector<8x8xbf16>
    %cst_94 = arith.constant dense<0.000000e+00> : vector<288x8xf32>
    %91 = tpu.matmul %88, %90, %cst_94 {dimension_numbers = #tpu.dot_dimension_numbers<[1], [0], [0], [1], [0, 0, 1, 1], [], []>} : vector<288x8xbf16>, vector<8x8xbf16>, vector<288x8xf32> -> vector<288x8xf32>
    %92 = arith.addf %86, %91 : vector<288x8xf32>
    %c0_95 = arith.constant 0 : index
    %c0_96 = arith.constant 0 : index
    %c0_97 = arith.constant 0 : index
    %93 = vector.load %arg4[%c0_95, %c0_96, %c0_97] : memref<1x288x8xf32, #tpu.memory_space<vmem>>, vector<1x288x8xf32>
    %94 = vector.shape_cast %93 : vector<1x288x8xf32> to vector<288x8xf32>
    %95 = vector.shape_cast %92 : vector<288x8xf32> to vector<1x288x8xf32>
    tpu.vector_store %arg4[%c0_95, %c0_96, %c0_97], %95 {strides = array<i32>} : memref<1x288x8xf32, #tpu.memory_space<vmem>>, vector<1x288x8xf32>,
    %c0_98 = arith.constant 0 : index
    %c0_99 = arith.constant 0 : index
    %c0_100 = arith.constant 0 : index
    %96 = vector.load %arg4[%c0_98, %c0_99, %c0_100] : memref<1x288x8xf32, #tpu.memory_space<vmem>>, vector<1x288x8xf32>
    %97 = vector.shape_cast %96 : vector<1x288x8xf32> to vector<288x8xf32>
    %c0_101 = arith.constant 0 : index
    %c0_102 = arith.constant 0 : index
    %98 = vector.load %arg3[%c0_101, %c0_102] : memref<288x1xf32, #tpu.memory_space<vmem>>, vector<288x1xf32>
    %99 = vector.broadcast %98 : vector<288x1xf32> to vector<288x8xf32>
    %100 = arith.mulf %97, %99 : vector<288x8xf32>
    %cst_103 = arith.constant dense<0.000000e+00> : vector<8xf32>
    %101 = vector.multi_reduction <add>, %100, %cst_103 [0] : vector<288x8xf32> to vector<8xf32>
    %102 = vector.shape_cast %101 : vector<8xf32> to vector<1x8xf32>
    %c0_104 = arith.constant 0 : index
    %c0_105 = arith.constant 0 : index
    %c0_106 = arith.constant 0 : index
    %103 = vector.load %arg5[%c0_104, %c0_105, %c0_106] : memref<1x2x8xf32, #tpu.memory_space<vmem>>, vector<1x1x8xf32>
    %104 = vector.shape_cast %103 : vector<1x1x8xf32> to vector<1x8xf32>
    %105 = vector.shape_cast %102 : vector<1x8xf32> to vector<1x1x8xf32>
    tpu.vector_store %arg5[%c0_104, %c0_105, %c0_106], %105 {strides = array<i32>} : memref<1x2x8xf32, #tpu.memory_space<vmem>>, vector<1x1x8xf32>,
    %106 = arith.mulf %100, %100 : vector<288x8xf32>
    %cst_107 = arith.constant dense<0.000000e+00> : vector<8xf32>
    %107 = vector.multi_reduction <add>, %106, %cst_107 [0] : vector<288x8xf32> to vector<8xf32>
    %108 = vector.shape_cast %107 : vector<8xf32> to vector<1x8xf32>
    %c0_108 = arith.constant 0 : index
    %c1_109 = arith.constant 1 : index
    %c0_110 = arith.constant 0 : index
    %109 = vector.load %arg5[%c0_108, %c1_109, %c0_110] : memref<1x2x8xf32, #tpu.memory_space<vmem>>, vector<1x1x8xf32>
    %110 = vector.shape_cast %109 : vector<1x1x8xf32> to vector<1x8xf32>
    %111 = vector.shape_cast %108 : vector<1x8xf32> to vector<1x1x8xf32>
    tpu.vector_store %arg5[%c0_108, %c1_109, %c0_110], %111 {strides = array<i32>} : memref<1x2x8xf32, #tpu.memory_space<vmem>>, vector<1x1x8xf32>,
    return
  }
  func.func @transform_0(%arg0: i32) -> (i32, i32, i32) {
    %c0_i32 = arith.constant 0 : i32
    %c0_i32_0 = arith.constant 0 : i32
    %c0_i32_1 = arith.constant 0 : i32
    return %arg0, %c0_i32, %c0_i32_0 : i32, i32, i32
  }
  func.func @transform_1(%arg0: i32) -> (i32, i32, i32) {
    %c0_i32 = arith.constant 0 : i32
    %c0_i32_0 = arith.constant 0 : i32
    %c0_i32_1 = arith.constant 0 : i32
    %c0_i32_2 = arith.constant 0 : i32
    return %c0_i32, %c0_i32_0, %c0_i32_1 : i32, i32, i32
  }
  func.func @transform_2(%arg0: i32) -> (i32, i32) {
    %c0_i32 = arith.constant 0 : i32
    %c0_i32_0 = arith.constant 0 : i32
    %c0_i32_1 = arith.constant 0 : i32
    return %c0_i32, %c0_i32_0 : i32, i32
  }
  func.func @transform_3(%arg0: i32) -> (i32, i32, i32) {
    %c0_i32 = arith.constant 0 : i32
    %c0_i32_0 = arith.constant 0 : i32
    %c0_i32_1 = arith.constant 0 : i32
    return %arg0, %c0_i32, %c0_i32_0 : i32, i32, i32
  }
  func.func @transform_4(%arg0: i32) -> (i32, i32, i32) {
    %c0_i32 = arith.constant 0 : i32
    %c0_i32_0 = arith.constant 0 : i32
    %c0_i32_1 = arith.constant 0 : i32
    return %arg0, %c0_i32, %c0_i32_0 : i32, i32, i32
  }
}

module attributes {stable_mosaic.version = 11 : i64} {
  func.func @_bn_act_kernel(%arg0: i32, %arg1: memref<288x8xf32, #tpu.memory_space<vmem>>, %arg2: memref<1x8xf32, #tpu.memory_space<vmem>>, %arg3: memref<1x8xf32, #tpu.memory_space<vmem>>, %arg4: memref<288x8xbf16, #tpu.memory_space<vmem>>) attributes {dimension_semantics = [#tpu.dimension_semantics<parallel>], iteration_bounds = array<i64: 2>, scalar_prefetch = 0 : i64, scratch_operands = 0 : i64, tpu.core_type = #tpu.core_type<tc>, window_params = [{transform_indices = @transform_0, window_bounds = array<i64: 288, 8>}, {pipeline_mode = #tpu.pipeline_mode<synchronous>, transform_indices = @transform_1, window_bounds = array<i64: 1, 8>}, {pipeline_mode = #tpu.pipeline_mode<synchronous>, transform_indices = @transform_2, window_bounds = array<i64: 1, 8>}, {transform_indices = @transform_3, window_bounds = array<i64: 288, 8>}]} {
    %c0 = arith.constant 0 : index
    %c0_0 = arith.constant 0 : index
    %0 = vector.load %arg1[%c0, %c0_0] : memref<288x8xf32, #tpu.memory_space<vmem>>, vector<288x8xf32>
    %c0_1 = arith.constant 0 : index
    %c0_2 = arith.constant 0 : index
    %1 = vector.load %arg2[%c0_1, %c0_2] : memref<1x8xf32, #tpu.memory_space<vmem>>, vector<1x8xf32>
    %2 = vector.broadcast %1 : vector<1x8xf32> to vector<288x8xf32>
    %3 = arith.mulf %0, %2 : vector<288x8xf32>
    %c0_3 = arith.constant 0 : index
    %c0_4 = arith.constant 0 : index
    %4 = vector.load %arg3[%c0_3, %c0_4] : memref<1x8xf32, #tpu.memory_space<vmem>>, vector<1x8xf32>
    %5 = vector.broadcast %4 : vector<1x8xf32> to vector<288x8xf32>
    %6 = arith.addf %3, %5 : vector<288x8xf32>
    %cst = arith.constant 0.000000e+00 : f32
    %7 = vector.broadcast %cst : f32 to vector<288x8xf32>
    %8 = arith.maximumf %6, %7 : vector<288x8xf32>
    %9 = arith.truncf %8 : vector<288x8xf32> to vector<288x8xbf16>
    %c0_5 = arith.constant 0 : index
    %c0_6 = arith.constant 0 : index
    %10 = vector.load %arg4[%c0_5, %c0_6] : memref<288x8xbf16, #tpu.memory_space<vmem>>, vector<288x8xbf16>
    tpu.vector_store %arg4[%c0_5, %c0_6], %9 {strides = array<i32>} : memref<288x8xbf16, #tpu.memory_space<vmem>>, vector<288x8xbf16>,
    return
  }
  func.func @transform_0(%arg0: i32) -> (i32, i32) {
    %c0_i32 = arith.constant 0 : i32
    %c0_i32_0 = arith.constant 0 : i32
    return %arg0, %c0_i32 : i32, i32
  }
  func.func @transform_1(%arg0: i32) -> (i32, i32) {
    %c0_i32 = arith.constant 0 : i32
    %c0_i32_0 = arith.constant 0 : i32
    %c0_i32_1 = arith.constant 0 : i32
    return %c0_i32, %c0_i32_0 : i32, i32
  }
  func.func @transform_2(%arg0: i32) -> (i32, i32) {
    %c0_i32 = arith.constant 0 : i32
    %c0_i32_0 = arith.constant 0 : i32
    %c0_i32_1 = arith.constant 0 : i32
    return %c0_i32, %c0_i32_0 : i32, i32
  }
  func.func @transform_3(%arg0: i32) -> (i32, i32) {
    %c0_i32 = arith.constant 0 : i32
    %c0_i32_0 = arith.constant 0 : i32
    return %arg0, %c0_i32 : i32, i32
  }
}

module attributes {stable_mosaic.version = 11 : i64} {
  func.func @_bn_act_res_kernel(%arg0: i32, %arg1: memref<288x8xf32, #tpu.memory_space<vmem>>, %arg2: memref<1x8xf32, #tpu.memory_space<vmem>>, %arg3: memref<1x8xf32, #tpu.memory_space<vmem>>, %arg4: memref<288x8xf32, #tpu.memory_space<vmem>>, %arg5: memref<288x8xf32, #tpu.memory_space<vmem>>) attributes {dimension_semantics = [#tpu.dimension_semantics<parallel>], iteration_bounds = array<i64: 2>, scalar_prefetch = 0 : i64, scratch_operands = 0 : i64, tpu.core_type = #tpu.core_type<tc>, window_params = [{transform_indices = @transform_0, window_bounds = array<i64: 288, 8>}, {pipeline_mode = #tpu.pipeline_mode<synchronous>, transform_indices = @transform_1, window_bounds = array<i64: 1, 8>}, {pipeline_mode = #tpu.pipeline_mode<synchronous>, transform_indices = @transform_2, window_bounds = array<i64: 1, 8>}, {transform_indices = @transform_3, window_bounds = array<i64: 288, 8>}, {transform_indices = @transform_4, window_bounds = array<i64: 288, 8>}]} {
    %c0 = arith.constant 0 : index
    %c0_0 = arith.constant 0 : index
    %0 = vector.load %arg1[%c0, %c0_0] : memref<288x8xf32, #tpu.memory_space<vmem>>, vector<288x8xf32>
    %c0_1 = arith.constant 0 : index
    %c0_2 = arith.constant 0 : index
    %1 = vector.load %arg2[%c0_1, %c0_2] : memref<1x8xf32, #tpu.memory_space<vmem>>, vector<1x8xf32>
    %2 = vector.broadcast %1 : vector<1x8xf32> to vector<288x8xf32>
    %3 = arith.mulf %0, %2 : vector<288x8xf32>
    %c0_3 = arith.constant 0 : index
    %c0_4 = arith.constant 0 : index
    %4 = vector.load %arg3[%c0_3, %c0_4] : memref<1x8xf32, #tpu.memory_space<vmem>>, vector<1x8xf32>
    %5 = vector.broadcast %4 : vector<1x8xf32> to vector<288x8xf32>
    %6 = arith.addf %3, %5 : vector<288x8xf32>
    %c0_5 = arith.constant 0 : index
    %c0_6 = arith.constant 0 : index
    %7 = vector.load %arg4[%c0_5, %c0_6] : memref<288x8xf32, #tpu.memory_space<vmem>>, vector<288x8xf32>
    %8 = arith.addf %6, %7 : vector<288x8xf32>
    %cst = arith.constant 0.000000e+00 : f32
    %9 = vector.broadcast %cst : f32 to vector<288x8xf32>
    %10 = arith.maximumf %8, %9 : vector<288x8xf32>
    %c0_7 = arith.constant 0 : index
    %c0_8 = arith.constant 0 : index
    %11 = vector.load %arg5[%c0_7, %c0_8] : memref<288x8xf32, #tpu.memory_space<vmem>>, vector<288x8xf32>
    tpu.vector_store %arg5[%c0_7, %c0_8], %10 {strides = array<i32>} : memref<288x8xf32, #tpu.memory_space<vmem>>, vector<288x8xf32>,
    return
  }
  func.func @transform_0(%arg0: i32) -> (i32, i32) {
    %c0_i32 = arith.constant 0 : i32
    %c0_i32_0 = arith.constant 0 : i32
    return %arg0, %c0_i32 : i32, i32
  }
  func.func @transform_1(%arg0: i32) -> (i32, i32) {
    %c0_i32 = arith.constant 0 : i32
    %c0_i32_0 = arith.constant 0 : i32
    %c0_i32_1 = arith.constant 0 : i32
    return %c0_i32, %c0_i32_0 : i32, i32
  }
  func.func @transform_2(%arg0: i32) -> (i32, i32) {
    %c0_i32 = arith.constant 0 : i32
    %c0_i32_0 = arith.constant 0 : i32
    %c0_i32_1 = arith.constant 0 : i32
    return %c0_i32, %c0_i32_0 : i32, i32
  }
  func.func @transform_3(%arg0: i32) -> (i32, i32) {
    %c0_i32 = arith.constant 0 : i32
    %c0_i32_0 = arith.constant 0 : i32
    return %arg0, %c0_i32 : i32, i32
  }
  func.func @transform_4(%arg0: i32) -> (i32, i32) {
    %c0_i32 = arith.constant 0 : i32
    %c0_i32_0 = arith.constant 0 : i32
    return %arg0, %c0_i32 : i32, i32
  }
}

</mosaic_0001>

<bundles_post_ra>
// kernel: _forward.5
= control target key start
LH: loop header
LB: loop body
LE: loop exit
PB: predicated region body
PF: predicated region fallthrough
CT: control target
= control target key end

     0   :  { %s502_s12 = smov 0   ;;  %s717_s0 = inlined_call_operand.vmem [shape: f32[576,8], index: 0, kind: input, shape index: {}]   ;;  %s718_s1 = inlined_call_operand.vmem [shape: f32[1,8], index: 1, kind: input, shape index: {}]   ;;  %s719_s2 = inlined_call_operand.vmem [shape: f32[1,8], index: 2, kind: input, shape index: {}]   ;;  %s720_s3 = inlined_call_operand.vmem [shape: bf16[576,8], index: 3, kind: output, shape index: {}]  }
   0x1 LB: > { %s455_s13 = sadd.s32 4294967295, %s480_s12   ;;  %p459_p0 = scmp.ge.s32.totalorder %s480_s12, 1  ;;  %s480_s12 = sphi %s502_s12, %s13_s12  }
   0x2   : > { %p138_p1 = scmp.lt.s32.totalorder %s480_s12, 3 }
   0x4   : > { %p139_p2 = pnand %p459_p0, %p138_p1 }
   0x5   : > { %s162_s14 = smul.u32 (!%p139_p2), 36, %s455_s13 }
   0x6   : > { %142 = sbr.rel (%p139_p2) target bundleno = 59 (0x3b), region = 32 }
   0x7   : > { %p163_p3 = scmp.lt.s32.totalorder (!%p139_p2), %s162_s14, 71 }
   0xb   : > { %s722_s14 = smov (!%p163_p3, %s162_s14), 71  ;;  %v515_v0 = vld [vmem:[%s718_s1] ss:$0 sm:$0xff]  ;;  %vm362_vm0 = vcmask 60416  }
   0xc   : > { %s460_s17 = sshll.u32 %s722_s14, 3  ;;  %v526_v1 = vld [vmem:[%s719_s2] ss:$0 sm:$0xff]  ;;  %s461_s23 = sshll.u32 %s722_s14, 2 }
   0xd   : > { %s521_s20 = scalar_lea.vmem %s717_s0, %s460_s17  ;;  %s555_s26 = scalar_lea.vmem %s720_s3, %s461_s23 }
   0xe   : > { %v174_v2 = vld [vmem:[%s521_s20] sm:$0xff]  ;;  %v175_v3 = vld [vmem:[%s521_s20 + $0x8] sm:$0xff]  ;;  %v176_v4 = vld [vmem:[%s521_s20 + $0x10] sm:$0xff] }
   0xf   : > { %v214_v5 = vmul.f32 %v515_v0, %v174_v2  ;;  %v215_v6 = vmul.f32 %v515_v0, %v175_v3  ;;  %v216_v7 = vmul.f32 %v515_v0, %v176_v4  ;;  %v177_v8 = vld [vmem:[%s521_s20 + $0x18] sm:$0xff]  ;;  %v178_v9 = vld [vmem:[%s521_s20 + $0x20] sm:$0xff]  ;;  %v179_v10 = vld [vmem:[%s521_s20 + $0x28] sm:$0xff] }
  0x10   : > { %v217_v11 = vmul.f32 %v515_v0, %v177_v8  ;;  %v218_v12 = vmul.f32 %v515_v0, %v178_v9  ;;  %v219_v13 = vmul.f32 %v515_v0, %v179_v10  ;;  %v180_v14 = vld [vmem:[%s521_s20 + $0x30] sm:$0xff]  ;;  %v181_v15 = vld [vmem:[%s521_s20 + $0x38] sm:$0xff]  ;;  %v182_v32 = vld [vmem:[%s521_s20 + $0x40] sm:$0xff] }
  0x11   : > { %v254_v16 = vadd.f32 %v526_v1, %v214_v5  ;;  %v255_v17 = vadd.f32 %v526_v1, %v215_v6  ;;  %v256_v18 = vadd.f32 %v526_v1, %v216_v7  ;;  %v220_v19 = vmul.f32 %v515_v0, %v180_v14  ;;  %v183_v33 = vld [vmem:[%s521_s20 + $0x48] sm:$0xff]  ;;  %v184_v34 = vld [vmem:[%s521_s20 + $0x50] sm:$0xff]  ;;  %v185_v39 = vld [vmem:[%s521_s20 + $0x58] sm:$0xff] }
  0x12   : > { %v257_v20 = vadd.f32 %v526_v1, %v217_v11  ;;  %v258_v21 = vadd.f32 %v526_v1, %v218_v12  ;;  %v259_v22 = vadd.f32 %v526_v1, %v219_v13  ;;  %v221_v23 = vmul.f32 %v515_v0, %v181_v15  ;;  %v186_v40 = vld [vmem:[%s521_s20 + $0x60] sm:$0xff]  ;;  %v187_v41 = vld [vmem:[%s521_s20 + $0x68] sm:$0xff]  ;;  %v188_v46 = vld [vmem:[%s521_s20 + $0x70] sm:$0xff] }
  0x13   : > { %v290_v24 = vmax.f32 %v254_v16, 0.0  ;;  %v291_v25 = vmax.f32 %v255_v17, 0.0  ;;  %v292_v26 = vmax.f32 %v256_v18, 0.0  ;;  %v260_v27 = vadd.f32 %v526_v1, %v220_v19  ;;  %v189_v51 = vld [vmem:[%s521_s20 + $0x78] sm:$0xff]  ;;  %v190_v2 = vld [vmem:[%s521_s20 + $0x80] sm:$0xff]  ;;  %v191_v7 = vld [vmem:[%s521_s20 + $0x88] sm:$0xff] }
  0x14   : > { %v293_v28 = vmax.f32 %v257_v20, 0.0  ;;  %v294_v29 = vmax.f32 %v258_v21, 0.0  ;;  %v295_v30 = vmax.f32 %v259_v22, 0.0  ;;  %v261_v31 = vadd.f32 %v526_v1, %v221_v23  ;;  %v192_v12 = vld [vmem:[%s521_s20 + $0x90] sm:$0xff]  ;;  %v193_v17 = vld [vmem:[%s521_s20 + $0x98] sm:$0xff]  ;;  %v194_v18 = vld [vmem:[%s521_s20 + $0xa0] sm:$0xff] }
  0x15   : > { %v326_v35 = vpack.c.bf16 %v290_v24, %v290_v24  ;;  %v327_v36 = vpack.c.bf16 %v291_v25, %v291_v25  ;;  %v328_v37 = vpack.c.bf16 %v292_v26, %v292_v26  ;;  %v296_v38 = vmax.f32 %v260_v27, 0.0  ;;  %v195_v19 = vld [vmem:[%s521_s20 + $0xa8] sm:$0xff]  ;;  %v196_v24 = vld [vmem:[%s521_s20 + $0xb0] sm:$0xff] }
  0x16   : > { %v329_v42 = vpack.c.bf16 %v293_v28, %v293_v28  ;;  %v330_v43 = vpack.c.bf16 %v294_v29, %v294_v29  ;;  %v331_v44 = vpack.c.bf16 %v295_v30, %v295_v30  ;;  %v297_v45 = vmax.f32 %v261_v31, 0.0  ;;  %v197_v29 = vld [vmem:[%s521_s20 + $0xb8] sm:$0xff] }
  0x17   : > { %363 = vst.msk [vmem:[%s555_s26] sm:$0xf] %vm362_vm0, %v326_v35  ;;  %v332_v47 = vpack.c.bf16 %v296_v38, %v296_v38  ;;  %v222_v48 = vmul.f32 %v515_v0, %v182_v32  ;;  %v223_v49 = vmul.f32 %v515_v0, %v183_v33  ;;  %v224_v50 = vmul.f32 %v515_v0, %v184_v34 }
  0x18   : > { %364 = vst.msk [vmem:[%s555_s26 + $0x4] sm:$0xf] %vm362_vm0, %v327_v36  ;;  %v333_v52 = vpack.c.bf16 %v297_v45, %v297_v45  ;;  %v225_v53 = vmul.f32 %v515_v0, %v185_v39  ;;  %v226_v54 = vmul.f32 %v515_v0, %v186_v40  ;;  %v227_v55 = vmul.f32 %v515_v0, %v187_v41 }
  0x19   : > { %365 = vst.msk [vmem:[%s555_s26 + $0x8] sm:$0xf] %vm362_vm0, %v328_v37  ;;  %v262_v56 = vadd.f32 %v526_v1, %v222_v48  ;;  %v263_v57 = vadd.f32 %v526_v1, %v223_v49  ;;  %v264_v58 = vadd.f32 %v526_v1, %v224_v50  ;;  %v228_v59 = vmul.f32 %v515_v0, %v188_v46 }
  0x1a   : > { %366 = vst.msk [vmem:[%s555_s26 + $0xc] sm:$0xf] %vm362_vm0, %v329_v42  ;;  %v265_v60 = vadd.f32 %v526_v1, %v225_v53  ;;  %v266_v61 = vadd.f32 %v526_v1, %v226_v54  ;;  %v267_v62 = vadd.f32 %v526_v1, %v227_v55  ;;  %v229_v63 = vmul.f32 %v515_v0, %v189_v51  ;;  %v198_v42 = vld [vmem:[%s521_s20 + $0xc0] sm:$0xff] }
  0x1b   : > { %367 = vst.msk [vmem:[%s555_s26 + $0x10] sm:$0xf] %vm362_vm0, %v330_v43  ;;  %v298_v3 = vmax.f32 %v262_v56, 0.0  ;;  %v299_v4 = vmax.f32 %v263_v57, 0.0  ;;  %v300_v5 = vmax.f32 %v264_v58, 0.0  ;;  %v268_v6 = vadd.f32 %v526_v1, %v228_v59  ;;  %v201_v57 = vld [vmem:[%s521_s20 + $0xd8] sm:$0xff] }
  0x1c   : > { %368 = vst.msk [vmem:[%s555_s26 + $0x14] sm:$0xf] %vm362_vm0, %v331_v44  ;;  %v301_v8 = vmax.f32 %v265_v60, 0.0  ;;  %v302_v9 = vmax.f32 %v266_v61, 0.0  ;;  %v303_v10 = vmax.f32 %v267_v62, 0.0  ;;  %v269_v11 = vadd.f32 %v526_v1, %v229_v63  ;;  %v202_v58 = vld [vmem:[%s521_s20 + $0xe0] sm:$0xff] }
  0x1d   : > { %369 = vst.msk [vmem:[%s555_s26 + $0x18] sm:$0xf] %vm362_vm0, %v332_v47  ;;  %v334_v13 = vpack.c.bf16 %v298_v3, %v298_v3  ;;  %v335_v14 = vpack.c.bf16 %v299_v4, %v299_v4  ;;  %v336_v15 = vpack.c.bf16 %v300_v5, %v300_v5  ;;  %v304_v16 = vmax.f32 %v268_v6, 0.0  ;;  %v199_v47 = vld [vmem:[%s521_s20 + $0xc8] sm:$0xff] }
  0x1e   : > { %370 = vst.msk [vmem:[%s555_s26 + $0x1c] sm:$0xf] %vm362_vm0, %v333_v52  ;;  %v337_v20 = vpack.c.bf16 %v301_v8, %v301_v8  ;;  %v338_v21 = vpack.c.bf16 %v302_v9, %v302_v9  ;;  %v339_v22 = vpack.c.bf16 %v303_v10, %v303_v10  ;;  %v305_v23 = vmax.f32 %v269_v11, 0.0  ;;  %v200_v52 = vld [vmem:[%s521_s20 + $0xd0] sm:$0xff]  ;;  %v203_v59 = vld [vmem:[%s521_s20 + $0xe8] sm:$0xff] }
  0x1f   : > { %371 = vst.msk [vmem:[%s555_s26 + $0x20] sm:$0xf] %vm362_vm0, %v334_v13  ;;  %v340_v25 = vpack.c.bf16 %v304_v16, %v304_v16  ;;  %v230_v26 = vmul.f32 %v515_v0, %v190_v2  ;;  %v231_v27 = vmul.f32 %v515_v0, %v191_v7  ;;  %v232_v28 = vmul.f32 %v515_v0, %v192_v12  ;;  %v204_v2 = vld [vmem:[%s521_s20 + $0xf0] sm:$0xff]  ;;  %v205_v7 = vld [vmem:[%s521_s20 + $0xf8] sm:$0xff] }
  0x20   : > { %372 = vst.msk [vmem:[%s555_s26 + $0x24] sm:$0xf] %vm362_vm0, %v335_v14  ;;  %v341_v30 = vpack.c.bf16 %v305_v23, %v305_v23  ;;  %v233_v31 = vmul.f32 %v515_v0, %v193_v17  ;;  %v234_v32 = vmul.f32 %v515_v0, %v194_v18  ;;  %v235_v33 = vmul.f32 %v515_v0, %v195_v19 }
  0x21   : > { %373 = vst.msk [vmem:[%s555_s26 + $0x28] sm:$0xf] %vm362_vm0, %v336_v15  ;;  %v270_v34 = vadd.f32 %v526_v1, %v230_v26  ;;  %v271_v35 = vadd.f32 %v526_v1, %v231_v27  ;;  %v272_v36 = vadd.f32 %v526_v1, %v232_v28  ;;  %v236_v37 = vmul.f32 %v515_v0, %v196_v24 }
  0x22   : > { %374 = vst.msk [vmem:[%s555_s26 + $0x2c] sm:$0xf] %vm362_vm0, %v337_v20  ;;  %v273_v38 = vadd.f32 %v526_v1, %v233_v31  ;;  %v274_v39 = vadd.f32 %v526_v1, %v234_v32  ;;  %v275_v40 = vadd.f32 %v526_v1, %v235_v33  ;;  %v237_v41 = vmul.f32 %v515_v0, %v197_v29  ;;  %v206_v20 = vld [vmem:[%s521_s20 + $0x100] sm:$0xff] }
  0x23   : > { %375 = vst.msk [vmem:[%s555_s26 + $0x30] sm:$0xf] %vm362_vm0, %v338_v21  ;;  %v306_v43 = vmax.f32 %v270_v34, 0.0  ;;  %v307_v44 = vmax.f32 %v271_v35, 0.0  ;;  %v308_v45 = vmax.f32 %v272_v36, 0.0  ;;  %v276_v46 = vadd.f32 %v526_v1, %v236_v37  ;;  %v209_v35 = vld [vmem:[%s521_s20 + $0x118] sm:$0xff] }
  0x24   : > { %376 = vst.msk [vmem:[%s555_s26 + $0x34] sm:$0xf] %vm362_vm0, %v339_v22  ;;  %v309_v48 = vmax.f32 %v273_v38, 0.0  ;;  %v310_v49 = vmax.f32 %v274_v39, 0.0  ;;  %v311_v50 = vmax.f32 %v275_v40, 0.0  ;;  %v277_v51 = vadd.f32 %v526_v1, %v237_v41 }
  0x25   : > { %377 = vst.msk [vmem:[%s555_s26 + $0x38] sm:$0xf] %vm362_vm0, %v340_v25  ;;  %v342_v53 = vpack.c.bf16 %v306_v43, %v306_v43  ;;  %v343_v54 = vpack.c.bf16 %v307_v44, %v307_v44  ;;  %v344_v55 = vpack.c.bf16 %v308_v45, %v308_v45  ;;  %v312_v56 = vmax.f32 %v276_v46, 0.0  ;;  %v207_v25 = vld [vmem:[%s521_s20 + $0x108] sm:$0xff] }
  0x26   : > { %378 = vst.msk [vmem:[%s555_s26 + $0x3c] sm:$0xf] %vm362_vm0, %v341_v30  ;;  %v345_v60 = vpack.c.bf16 %v309_v48, %v309_v48  ;;  %v346_v61 = vpack.c.bf16 %v310_v49, %v310_v49  ;;  %v347_v62 = vpack.c.bf16 %v311_v50, %v311_v50  ;;  %v313_v63 = vmax.f32 %v277_v51, 0.0  ;;  %v208_v30 = vld [vmem:[%s521_s20 + $0x110] sm:$0xff] }
  0x27   : > { %379 = vst.msk [vmem:[%s555_s26 + $0x40] sm:$0xf] %vm362_vm0, %v342_v53  ;;  %v348_v3 = vpack.c.bf16 %v312_v56, %v312_v56  ;;  %v238_v4 = vmul.f32 %v515_v0, %v198_v42  ;;  %v239_v5 = vmul.f32 %v515_v0, %v199_v47  ;;  %v240_v6 = vmul.f32 %v515_v0, %v200_v52 }
  0x28   : > { %380 = vst.msk [vmem:[%s555_s26 + $0x44] sm:$0xf] %vm362_vm0, %v343_v54  ;;  %v349_v8 = vpack.c.bf16 %v313_v63, %v313_v63  ;;  %v241_v9 = vmul.f32 %v515_v0, %v201_v57  ;;  %v242_v10 = vmul.f32 %v515_v0, %v202_v58  ;;  %v243_v11 = vmul.f32 %v515_v0, %v203_v59 }
  0x29   : > { %381 = vst.msk [vmem:[%s555_s26 + $0x48] sm:$0xf] %vm362_vm0, %v344_v55  ;;  %v278_v12 = vadd.f32 %v526_v1, %v238_v4  ;;  %v279_v13 = vadd.f32 %v526_v1, %v239_v5  ;;  %v280_v14 = vadd.f32 %v526_v1, %v240_v6  ;;  %v244_v15 = vmul.f32 %v515_v0, %v204_v2 }
  0x2a   : > { %382 = vst.msk [vmem:[%s555_s26 + $0x4c] sm:$0xf] %vm362_vm0, %v345_v60  ;;  %v281_v16 = vadd.f32 %v526_v1, %v241_v9  ;;  %v282_v17 = vadd.f32 %v526_v1, %v242_v10  ;;  %v283_v18 = vadd.f32 %v526_v1, %v243_v11  ;;  %v245_v19 = vmul.f32 %v515_v0, %v205_v7 }
  0x2b   : > { %383 = vst.msk [vmem:[%s555_s26 + $0x50] sm:$0xf] %vm362_vm0, %v346_v61  ;;  %v314_v21 = vmax.f32 %v278_v12, 0.0  ;;  %v315_v22 = vmax.f32 %v279_v13, 0.0  ;;  %v316_v23 = vmax.f32 %v280_v14, 0.0  ;;  %v284_v24 = vadd.f32 %v526_v1, %v244_v15 }
  0x2c   : > { %384 = vst.msk [vmem:[%s555_s26 + $0x54] sm:$0xf] %vm362_vm0, %v347_v62  ;;  %v317_v26 = vmax.f32 %v281_v16, 0.0  ;;  %v318_v27 = vmax.f32 %v282_v17, 0.0  ;;  %v319_v28 = vmax.f32 %v283_v18, 0.0  ;;  %v285_v29 = vadd.f32 %v526_v1, %v245_v19 }
  0x2d   : > { %385 = vst.msk [vmem:[%s555_s26 + $0x58] sm:$0xf] %vm362_vm0, %v348_v3  ;;  %v350_v31 = vpack.c.bf16 %v314_v21, %v314_v21  ;;  %v351_v32 = vpack.c.bf16 %v315_v22, %v315_v22  ;;  %v352_v33 = vpack.c.bf16 %v316_v23, %v316_v23  ;;  %v320_v34 = vmax.f32 %v284_v24, 0.0 }
  0x2e   : > { %386 = vst.msk [vmem:[%s555_s26 + $0x5c] sm:$0xf] %vm362_vm0, %v349_v8  ;;  %v353_v36 = vpack.c.bf16 %v317_v26, %v317_v26  ;;  %v321_v37 = vmax.f32 %v285_v29, 0.0  ;;  %v354_v38 = vpack.c.bf16 %v318_v27, %v318_v27  ;;  %v246_v39 = vmul.f32 %v515_v0, %v206_v20 }
  0x2f   : > { %387 = vst.msk [vmem:[%s555_s26 + $0x60] sm:$0xf] %vm362_vm0, %v350_v31  ;;  %v247_v40 = vmul.f32 %v515_v0, %v207_v25  ;;  %v248_v41 = vmul.f32 %v515_v0, %v208_v30  ;;  %v355_v42 = vpack.c.bf16 %v319_v28, %v319_v28  ;;  %v249_v43 = vmul.f32 %v515_v0, %v209_v35 }
  0x30   : > { %388 = vst.msk [vmem:[%s555_s26 + $0x64] sm:$0xf] %vm362_vm0, %v351_v32  ;;  %v356_v44 = vpack.c.bf16 %v320_v34, %v320_v34  ;;  %v286_v45 = vadd.f32 %v526_v1, %v246_v39  ;;  %v357_v48 = vpack.c.bf16 %v321_v37, %v321_v37 }
  0x31   : > { %389 = vst.msk [vmem:[%s555_s26 + $0x68] sm:$0xf] %vm362_vm0, %v352_v33  ;;  %v287_v46 = vadd.f32 %v526_v1, %v247_v40  ;;  %v288_v47 = vadd.f32 %v526_v1, %v248_v41  ;;  %v289_v49 = vadd.f32 %v526_v1, %v249_v43 }
  0x32   : > { %390 = vst.msk [vmem:[%s555_s26 + $0x6c] sm:$0xf] %vm362_vm0, %v353_v36  ;;  %v322_v0 = vmax.f32 %v286_v45, 0.0 }
  0x33   : > { %391 = vst.msk [vmem:[%s555_s26 + $0x70] sm:$0xf] %vm362_vm0, %v354_v38  ;;  %v323_v50 = vmax.f32 %v287_v46, 0.0  ;;  %v324_v51 = vmax.f32 %v288_v47, 0.0  ;;  %v325_v52 = vmax.f32 %v289_v49, 0.0 }
  0x34   : > { %392 = vst.msk [vmem:[%s555_s26 + $0x74] sm:$0xf] %vm362_vm0, %v355_v42  ;;  %v358_v53 = vpack.c.bf16 %v322_v0, %v322_v0 }
  0x35   : > { %393 = vst.msk [vmem:[%s555_s26 + $0x78] sm:$0xf] %vm362_vm0, %v356_v44  ;;  %v359_v54 = vpack.c.bf16 %v323_v50, %v323_v50  ;;  %v360_v55 = vpack.c.bf16 %v324_v51, %v324_v51  ;;  %v361_v56 = vpack.c.bf16 %v325_v52, %v325_v52 }
  0x36   : > { %394 = vst.msk [vmem:[%s555_s26 + $0x7c] sm:$0xf] %vm362_vm0, %v357_v48 }
  0x37   : > { %395 = vst.msk [vmem:[%s555_s26 + $0x80] sm:$0xf] %vm362_vm0, %v358_v53 }
  0x38   : > { %396 = vst.msk [vmem:[%s555_s26 + $0x84] sm:$0xf] %vm362_vm0, %v359_v54 }
  0x39   : > { %397 = vst.msk [vmem:[%s555_s26 + $0x88] sm:$0xf] %vm362_vm0, %v360_v55 }
  0x3a   : > { %398 = vst.msk [vmem:[%s555_s26 + $0x8c] sm:$0xf] %vm362_vm0, %v361_v56 }
  0x3b PF: > { %s13_s12 = sadd.s32 1, %s480_s12  }
  0x3c   : > { %p10_p4 = scmp.ge.s32.totalorder %s13_s12, 4  }
  0x3e   :  { %12 = sbr.rel (!%p10_p4) target bundleno = 1 (0x1), region = 62 }

// kernel: _forward.7
= control target key start
LH: loop header
LB: loop body
LE: loop exit
PB: predicated region body
PF: predicated region fallthrough
CT: control target
= control target key end

     0   :  { %s605_s15 = smov 0   ;;  %s862_s0 = inlined_call_operand.vmem [shape: f32[576,8], index: 0, kind: input, shape index: {}]   ;;  %s863_s1 = inlined_call_operand.vmem [shape: f32[1,8], index: 1, kind: input, shape index: {}]   ;;  %s864_s2 = inlined_call_operand.vmem [shape: f32[1,8], index: 2, kind: input, shape index: {}]   ;;  %s865_s3 = inlined_call_operand.vmem [shape: f32[576,8], index: 3, kind: input, shape index: {}]   ;;  %s866_s4 = inlined_call_operand.vmem [shape: f32[576,8], index: 4, kind: output, shape index: {}]  }
   0x1 LB: > { %s552_s16 = sadd.s32 4294967295, %s578_s15   ;;  %p556_p0 = scmp.ge.s32.totalorder %s578_s15, 1  ;;  %s578_s15 = sphi %s605_s15, %s14_s15  }
   0x2   : > { %p174_p1 = scmp.lt.s32.totalorder %s578_s15, 3 }
   0x4   : > { %p175_p2 = pnand %p556_p0, %p174_p1 }
   0x5   : > { %s205_s17 = smul.u32 (!%p175_p2), 36, %s552_s16 }
   0x6   : > { %178 = sbr.rel (%p175_p2) target bundleno = 59 (0x3b), region = 36 }
   0x7   : > { %p206_p3 = scmp.lt.s32.totalorder (!%p175_p2), %s205_s17, 71 }
   0xb   : > { %s868_s17 = smov (!%p206_p3, %s205_s17), 71  ;;  %v616_v0 = vld [vmem:[%s863_s1] ss:$0 sm:$0xff]  ;;  %vm447_vm0 = vcmask 64512  }
   0xc   : > { %s618_s20 = sshll.u32 %s868_s17, 3  ;;  %v635_v1 = vld [vmem:[%s864_s2] ss:$0 sm:$0xff] }
   0xd   : > { %s624_s23 = scalar_lea.vmem %s862_s0, %s618_s20  ;;  %s630_s26 = scalar_lea.vmem %s865_s3, %s618_s20 }
   0xe   : > { %v223_v2 = vld [vmem:[%s624_s23] sm:$0xff]  ;;  %v224_v3 = vld [vmem:[%s624_s23 + $0x8] sm:$0xff]  ;;  %v225_v7 = vld [vmem:[%s624_s23 + $0x10] sm:$0xff]  ;;  %s666_s5 = scalar_lea.vmem %s866_s4, %s618_s20 }
   0xf   : > { %v263_v4 = vmul.f32 %v616_v0, %v223_v2  ;;  %v339_v5 = vld [vmem:[%s630_s26] sm:$0xff]  ;;  %v264_v6 = vmul.f32 %v616_v0, %v224_v3  ;;  %v340_v8 = vld [vmem:[%s630_s26 + $0x8] sm:$0xff]  ;;  %v265_v9 = vmul.f32 %v616_v0, %v225_v7  ;;  %v226_v10 = vld [vmem:[%s624_s23 + $0x18] sm:$0xff] }
  0x10   : > { %v227_v11 = vld [vmem:[%s624_s23 + $0x20] sm:$0xff]  ;;  %v341_v14 = vld [vmem:[%s630_s26 + $0x10] sm:$0xff]  ;;  %v266_v15 = vmul.f32 %v616_v0, %v226_v10  ;;  %v342_v16 = vld [vmem:[%s630_s26 + $0x18] sm:$0xff] }
  0x11   : > { %v303_v12 = vadd.f32 %v635_v1, %v263_v4  ;;  %v304_v13 = vadd.f32 %v635_v1, %v264_v6  ;;  %v267_v17 = vmul.f32 %v616_v0, %v227_v11  ;;  %v228_v18 = vld [vmem:[%s624_s23 + $0x28] sm:$0xff]  ;;  %v305_v19 = vadd.f32 %v635_v1, %v265_v9  ;;  %v343_v20 = vld [vmem:[%s630_s26 + $0x20] sm:$0xff]  ;;  %v229_v22 = vld [vmem:[%s624_s23 + $0x30] sm:$0xff] }
  0x12   : > { %v268_v21 = vmul.f32 %v616_v0, %v228_v18  ;;  %v230_v23 = vld [vmem:[%s624_s23 + $0x38] sm:$0xff]  ;;  %v306_v26 = vadd.f32 %v635_v1, %v266_v15  ;;  %v344_v28 = vld [vmem:[%s630_s26 + $0x28] sm:$0xff]  ;;  %v269_v31 = vmul.f32 %v616_v0, %v229_v22  ;;  %v231_v33 = vld [vmem:[%s624_s23 + $0x40] sm:$0xff] }
  0x13   : > { %v375_v24 = vadd.f32 %v339_v5, %v303_v12  ;;  %v376_v25 = vadd.f32 %v340_v8, %v304_v13  ;;  %v307_v27 = vadd.f32 %v635_v1, %v267_v17  ;;  %v377_v29 = vadd.f32 %v341_v14, %v305_v19  ;;  %v232_v34 = vld [vmem:[%s624_s23 + $0x48] sm:$0xff]  ;;  %v345_v39 = vld [vmem:[%s630_s26 + $0x30] sm:$0xff]  ;;  %v346_v40 = vld [vmem:[%s630_s26 + $0x38] sm:$0xff] }
  0x14   : > { %v308_v30 = vadd.f32 %v635_v1, %v268_v21  ;;  %v270_v32 = vmul.f32 %v616_v0, %v230_v23  ;;  %v378_v37 = vadd.f32 %v342_v16, %v306_v26  ;;  %v233_v41 = vld [vmem:[%s624_s23 + $0x50] sm:$0xff]  ;;  %v309_v44 = vadd.f32 %v635_v1, %v269_v31  ;;  %v234_v46 = vld [vmem:[%s624_s23 + $0x58] sm:$0xff]  ;;  %v235_v47 = vld [vmem:[%s624_s23 + $0x60] sm:$0xff] }
  0x15   : > { %v411_v35 = vmax.f32 %v375_v24, 0.0  ;;  %v412_v36 = vmax.f32 %v376_v25, 0.0  ;;  %v379_v38 = vadd.f32 %v343_v20, %v307_v27  ;;  %v413_v42 = vmax.f32 %v377_v29, 0.0  ;;  %v236_v52 = vld [vmem:[%s624_s23 + $0x68] sm:$0xff]  ;;  %v347_v56 = vld [vmem:[%s630_s26 + $0x40] sm:$0xff]  ;;  %v349_v61 = vld [vmem:[%s630_s26 + $0x50] sm:$0xff] }
  0x16   : > { %v380_v43 = vadd.f32 %v344_v28, %v308_v30  ;;  %v310_v45 = vadd.f32 %v635_v1, %v270_v32  ;;  %v414_v48 = vmax.f32 %v378_v37, 0.0  ;;  %v271_v50 = vmul.f32 %v616_v0, %v231_v33  ;;  %v348_v57 = vld [vmem:[%s630_s26 + $0x48] sm:$0xff]  ;;  %v237_v2 = vld [vmem:[%s624_s23 + $0x70] sm:$0xff]  ;;  %v238_v3 = vld [vmem:[%s624_s23 + $0x78] sm:$0xff] }
  0x17   : > { %448 = vst.msk [vmem:[%s666_s5] sm:$0xff] %vm447_vm0, %v411_v35  ;;  %v415_v49 = vmax.f32 %v379_v38, 0.0  ;;  %v272_v51 = vmul.f32 %v616_v0, %v232_v34  ;;  %v381_v54 = vadd.f32 %v345_v39, %v309_v44  ;;  %v273_v58 = vmul.f32 %v616_v0, %v233_v41  ;;  %v350_v7 = vld [vmem:[%s630_s26 + $0x58] sm:$0xff]  ;;  %v351_v8 = vld [vmem:[%s630_s26 + $0x60] sm:$0xff]  ;;  %v352_v14 = vld [vmem:[%s630_s26 + $0x68] sm:$0xff] }
  0x18   : > { %449 = vst.msk [vmem:[%s666_s5 + $0x8] sm:$0xff] %vm447_vm0, %v412_v36  ;;  %v416_v53 = vmax.f32 %v380_v43, 0.0  ;;  %v382_v55 = vadd.f32 %v346_v40, %v310_v45  ;;  %v311_v59 = vadd.f32 %v635_v1, %v271_v50  ;;  %v274_v62 = vmul.f32 %v616_v0, %v234_v46  ;;  %v239_v19 = vld [vmem:[%s624_s23 + $0x80] sm:$0xff]  ;;  %v240_v20 = vld [vmem:[%s624_s23 + $0x88] sm:$0xff]  ;;  %v353_v25 = vld [vmem:[%s630_s26 + $0x70] sm:$0xff] }
  0x19   : > { %450 = vst.msk [vmem:[%s666_s5 + $0x10] sm:$0xff] %vm447_vm0, %v413_v42  ;;  %v312_v60 = vadd.f32 %v635_v1, %v272_v51  ;;  %v275_v63 = vmul.f32 %v616_v0, %v235_v47  ;;  %v417_v4 = vmax.f32 %v381_v54, 0.0  ;;  %v313_v6 = vadd.f32 %v635_v1, %v273_v58  ;;  %v354_v26 = vld [vmem:[%s630_s26 + $0x78] sm:$0xff]  ;;  %v241_v27 = vld [vmem:[%s624_s23 + $0x90] sm:$0xff]  ;;  %v243_v33 = vld [vmem:[%s624_s23 + $0xa0] sm:$0xff] }
  0x1a   : > { %451 = vst.msk [vmem:[%s666_s5 + $0x18] sm:$0xff] %vm447_vm0, %v414_v48  ;;  %v418_v5 = vmax.f32 %v382_v55, 0.0  ;;  %v276_v9 = vmul.f32 %v616_v0, %v236_v52  ;;  %v383_v10 = vadd.f32 %v347_v56, %v311_v59  ;;  %v314_v12 = vadd.f32 %v635_v1, %v274_v62  ;;  %v242_v32 = vld [vmem:[%s624_s23 + $0x98] sm:$0xff]  ;;  %v244_v38 = vld [vmem:[%s624_s23 + $0xa8] sm:$0xff]  ;;  %v355_v42 = vld [vmem:[%s630_s26 + $0x80] sm:$0xff] }
  0x1b   : > { %452 = vst.msk [vmem:[%s666_s5 + $0x20] sm:$0xff] %vm447_vm0, %v415_v49  ;;  %v384_v11 = vadd.f32 %v348_v57, %v312_v60  ;;  %v315_v13 = vadd.f32 %v635_v1, %v275_v63  ;;  %v385_v15 = vadd.f32 %v349_v61, %v313_v6  ;;  %v277_v17 = vmul.f32 %v616_v0, %v237_v2  ;;  %v356_v43 = vld [vmem:[%s630_s26 + $0x88] sm:$0xff]  ;;  %v357_v47 = vld [vmem:[%s630_s26 + $0x90] sm:$0xff]  ;;  %v246_v51 = vld [vmem:[%s624_s23 + $0xb8] sm:$0xff] }
  0x1c   : > { %453 = vst.msk [vmem:[%s666_s5 + $0x28] sm:$0xff] %vm447_vm0, %v416_v53  ;;  %v316_v16 = vadd.f32 %v635_v1, %v276_v9  ;;  %v278_v18 = vmul.f32 %v616_v0, %v238_v3  ;;  %v419_v21 = vmax.f32 %v383_v10, 0.0  ;;  %v386_v23 = vadd.f32 %v350_v7, %v314_v12  ;;  %v245_v50 = vld [vmem:[%s624_s23 + $0xb0] sm:$0xff]  ;;  %v358_v55 = vld [vmem:[%s630_s26 + $0x98] sm:$0xff]  ;;  %v359_v56 = vld [vmem:[%s630_s26 + $0xa0] sm:$0xff] }
  0x1d   : > { %454 = vst.msk [vmem:[%s666_s5 + $0x30] sm:$0xff] %vm447_vm0, %v417_v4  ;;  %v420_v22 = vmax.f32 %v384_v11, 0.0  ;;  %v387_v24 = vadd.f32 %v351_v8, %v315_v13  ;;  %v421_v28 = vmax.f32 %v385_v15, 0.0  ;;  %v317_v30 = vadd.f32 %v635_v1, %v277_v17  ;;  %v360_v62 = vld [vmem:[%s630_s26 + $0xa8] sm:$0xff]  ;;  %v361_v11 = vld [vmem:[%s630_s26 + $0xb0] sm:$0xff]  ;;  %v362_v12 = vld [vmem:[%s630_s26 + $0xb8] sm:$0xff] }
  0x1e   : > { %455 = vst.msk [vmem:[%s666_s5 + $0x38] sm:$0xff] %vm447_vm0, %v418_v5  ;;  %v388_v29 = vadd.f32 %v352_v14, %v316_v16  ;;  %v318_v31 = vadd.f32 %v635_v1, %v278_v18  ;;  %v422_v34 = vmax.f32 %v386_v23, 0.0  ;;  %v279_v36 = vmul.f32 %v616_v0, %v239_v19  ;;  %v247_v5 = vld [vmem:[%s624_s23 + $0xc0] sm:$0xff]  ;;  %v248_v6 = vld [vmem:[%s624_s23 + $0xc8] sm:$0xff]  ;;  %v249_v13 = vld [vmem:[%s624_s23 + $0xd0] sm:$0xff] }
  0x1f   : > { %456 = vst.msk [vmem:[%s666_s5 + $0x40] sm:$0xff] %vm447_vm0, %v419_v21  ;;  %v423_v35 = vmax.f32 %v387_v24, 0.0  ;;  %v280_v37 = vmul.f32 %v616_v0, %v240_v20  ;;  %v389_v40 = vadd.f32 %v353_v25, %v317_v30  ;;  %v281_v44 = vmul.f32 %v616_v0, %v241_v27  ;;  %v250_v18 = vld [vmem:[%s624_s23 + $0xd8] sm:$0xff]  ;;  %v251_v19 = vld [vmem:[%s624_s23 + $0xe0] sm:$0xff]  ;;  %v252_v24 = vld [vmem:[%s624_s23 + $0xe8] sm:$0xff] }
  0x20   : > { %457 = vst.msk [vmem:[%s666_s5 + $0x48] sm:$0xff] %vm447_vm0, %v420_v22  ;;  %v424_v39 = vmax.f32 %v388_v29, 0.0  ;;  %v390_v41 = vadd.f32 %v354_v26, %v318_v31  ;;  %v319_v45 = vadd.f32 %v635_v1, %v279_v36  ;;  %v282_v48 = vmul.f32 %v616_v0, %v242_v32  ;;  %v364_v29 = vld [vmem:[%s630_s26 + $0xc8] sm:$0xff]  ;;  %v253_v36 = vld [vmem:[%s624_s23 + $0xf0] sm:$0xff] }
  0x21   : > { %458 = vst.msk [vmem:[%s666_s5 + $0x50] sm:$0xff] %vm447_vm0, %v421_v28  ;;  %v320_v46 = vadd.f32 %v635_v1, %v280_v37  ;;  %v283_v49 = vmul.f32 %v616_v0, %v243_v33  ;;  %v425_v52 = vmax.f32 %v389_v40, 0.0  ;;  %v321_v54 = vadd.f32 %v635_v1, %v281_v44  ;;  %v363_v28 = vld [vmem:[%s630_s26 + $0xc0] sm:$0xff]  ;;  %v365_v33 = vld [vmem:[%s630_s26 + $0xd0] sm:$0xff]  ;;  %v254_v37 = vld [vmem:[%s624_s23 + $0xf8] sm:$0xff] }
  0x22   : > { %459 = vst.msk [vmem:[%s666_s5 + $0x58] sm:$0xff] %vm447_vm0, %v422_v34  ;;  %v426_v53 = vmax.f32 %v390_v41, 0.0  ;;  %v284_v57 = vmul.f32 %v616_v0, %v244_v38  ;;  %v391_v58 = vadd.f32 %v355_v42, %v319_v45  ;;  %v322_v60 = vadd.f32 %v635_v1, %v282_v48  ;;  %v366_v41 = vld [vmem:[%s630_s26 + $0xd8] sm:$0xff]  ;;  %v367_v42 = vld [vmem:[%s630_s26 + $0xe0] sm:$0xff]  ;;  %v368_v48 = vld [vmem:[%s630_s26 + $0xe8] sm:$0xff] }
  0x23   : > { %460 = vst.msk [vmem:[%s666_s5 + $0x60] sm:$0xff] %vm447_vm0, %v423_v35  ;;  %v392_v59 = vadd.f32 %v356_v43, %v320_v46  ;;  %v323_v61 = vadd.f32 %v635_v1, %v283_v49  ;;  %v393_v63 = vadd.f32 %v357_v47, %v321_v54  ;;  %v285_v3 = vmul.f32 %v616_v0, %v245_v50  ;;  %v256_v54 = vld [vmem:[%s624_s23 + $0x108] sm:$0xff] }
  0x24   : > { %461 = vst.msk [vmem:[%s666_s5 + $0x68] sm:$0xff] %vm447_vm0, %v424_v39  ;;  %v324_v2 = vadd.f32 %v635_v1, %v284_v57  ;;  %v286_v4 = vmul.f32 %v616_v0, %v246_v51  ;;  %v427_v7 = vmax.f32 %v391_v58, 0.0  ;;  %v394_v9 = vadd.f32 %v358_v55, %v322_v60  ;;  %v370_v60 = vld [vmem:[%s630_s26 + $0xf8] sm:$0xff] }
  0x25   : > { %462 = vst.msk [vmem:[%s666_s5 + $0x70] sm:$0xff] %vm447_vm0, %v425_v52  ;;  %v428_v8 = vmax.f32 %v392_v59, 0.0  ;;  %v395_v10 = vadd.f32 %v359_v56, %v323_v61  ;;  %v429_v14 = vmax.f32 %v393_v63, 0.0  ;;  %v325_v16 = vadd.f32 %v635_v1, %v285_v3  ;;  %v369_v59 = vld [vmem:[%s630_s26 + $0xf0] sm:$0xff] }
  0x26   : > { %463 = vst.msk [vmem:[%s666_s5 + $0x78] sm:$0xff] %vm447_vm0, %v426_v53  ;;  %v396_v15 = vadd.f32 %v360_v62, %v324_v2  ;;  %v326_v17 = vadd.f32 %v635_v1, %v286_v4  ;;  %v430_v20 = vmax.f32 %v394_v9, 0.0  ;;  %v287_v22 = vmul.f32 %v616_v0, %v247_v5  ;;  %v255_v53 = vld [vmem:[%s624_s23 + $0x100] sm:$0xff]  ;;  %v257_v61 = vld [vmem:[%s624_s23 + $0x110] sm:$0xff]  ;;  %v258_v4 = vld [vmem:[%s624_s23 + $0x118] sm:$0xff] }
  0x27   : > { %464 = vst.msk [vmem:[%s666_s5 + $0x80] sm:$0xff] %vm447_vm0, %v427_v7  ;;  %v431_v21 = vmax.f32 %v395_v10, 0.0  ;;  %v288_v23 = vmul.f32 %v616_v0, %v248_v6  ;;  %v397_v26 = vadd.f32 %v361_v11, %v325_v16  ;;  %v289_v30 = vmul.f32 %v616_v0, %v249_v13  ;;  %v372_v13 = vld [vmem:[%s630_s26 + $0x108] sm:$0xff] }
  0x28   : > { %465 = vst.msk [vmem:[%s666_s5 + $0x88] sm:$0xff] %vm447_vm0, %v428_v8  ;;  %v432_v25 = vmax.f32 %v396_v15, 0.0  ;;  %v398_v27 = vadd.f32 %v362_v12, %v326_v17  ;;  %v327_v31 = vadd.f32 %v635_v1, %v287_v22  ;;  %v290_v34 = vmul.f32 %v616_v0, %v250_v18  ;;  %v371_v12 = vld [vmem:[%s630_s26 + $0x100] sm:$0xff]  ;;  %v373_v17 = vld [vmem:[%s630_s26 + $0x110] sm:$0xff]  ;;  %v374_v22 = vld [vmem:[%s630_s26 + $0x118] sm:$0xff] }
  0x29   : > { %466 = vst.msk [vmem:[%s666_s5 + $0x90] sm:$0xff] %vm447_vm0, %v429_v14  ;;  %v328_v32 = vadd.f32 %v635_v1, %v288_v23  ;;  %v291_v35 = vmul.f32 %v616_v0, %v251_v19  ;;  %v433_v38 = vmax.f32 %v397_v26, 0.0  ;;  %v329_v40 = vadd.f32 %v635_v1, %v289_v30 }
  0x2a   : > { %467 = vst.msk [vmem:[%s666_s5 + $0x98] sm:$0xff] %vm447_vm0, %v430_v20  ;;  %v434_v39 = vmax.f32 %v398_v27, 0.0  ;;  %v292_v43 = vmul.f32 %v616_v0, %v252_v24  ;;  %v399_v44 = vadd.f32 %v363_v28, %v327_v31  ;;  %v330_v46 = vadd.f32 %v635_v1, %v290_v34 }
  0x2b   : > { %468 = vst.msk [vmem:[%s666_s5 + $0xa0] sm:$0xff] %vm447_vm0, %v431_v21  ;;  %v400_v45 = vadd.f32 %v364_v29, %v328_v32  ;;  %v331_v47 = vadd.f32 %v635_v1, %v291_v35  ;;  %v401_v49 = vadd.f32 %v365_v33, %v329_v40  ;;  %v293_v51 = vmul.f32 %v616_v0, %v253_v36 }
  0x2c   : > { %469 = vst.msk [vmem:[%s666_s5 + $0xa8] sm:$0xff] %vm447_vm0, %v432_v25  ;;  %v332_v50 = vadd.f32 %v635_v1, %v292_v43  ;;  %v294_v52 = vmul.f32 %v616_v0, %v254_v37  ;;  %v435_v55 = vmax.f32 %v399_v44, 0.0  ;;  %v402_v57 = vadd.f32 %v366_v41, %v330_v46 }
  0x2d   : > { %470 = vst.msk [vmem:[%s666_s5 + $0xb0] sm:$0xff] %vm447_vm0, %v433_v38  ;;  %v436_v56 = vmax.f32 %v400_v45, 0.0  ;;  %v403_v58 = vadd.f32 %v367_v42, %v331_v47  ;;  %v437_v62 = vmax.f32 %v401_v49, 0.0  ;;  %v333_v2 = vadd.f32 %v635_v1, %v293_v51 }
  0x2e   : > { %471 = vst.msk [vmem:[%s666_s5 + $0xb8] sm:$0xff] %vm447_vm0, %v434_v39  ;;  %v404_v63 = vadd.f32 %v368_v48, %v332_v50  ;;  %v334_v3 = vadd.f32 %v635_v1, %v294_v52  ;;  %v438_v5 = vmax.f32 %v402_v57, 0.0  ;;  %v295_v7 = vmul.f32 %v616_v0, %v255_v53 }
  0x2f   : > { %472 = vst.msk [vmem:[%s666_s5 + $0xc0] sm:$0xff] %vm447_vm0, %v435_v55  ;;  %v439_v6 = vmax.f32 %v403_v58, 0.0  ;;  %v296_v8 = vmul.f32 %v616_v0, %v256_v54  ;;  %v405_v10 = vadd.f32 %v369_v59, %v333_v2  ;;  %v297_v14 = vmul.f32 %v616_v0, %v257_v61 }
  0x30   : > { %473 = vst.msk [vmem:[%s666_s5 + $0xc8] sm:$0xff] %vm447_vm0, %v436_v56  ;;  %v440_v9 = vmax.f32 %v404_v63, 0.0  ;;  %v406_v11 = vadd.f32 %v370_v60, %v334_v3  ;;  %v335_v15 = vadd.f32 %v635_v1, %v295_v7  ;;  %v298_v18 = vmul.f32 %v616_v0, %v258_v4 }
  0x31   : > { %474 = vst.msk [vmem:[%s666_s5 + $0xd0] sm:$0xff] %vm447_vm0, %v437_v62  ;;  %v336_v16 = vadd.f32 %v635_v1, %v296_v8  ;;  %v441_v19 = vmax.f32 %v405_v10, 0.0  ;;  %v337_v21 = vadd.f32 %v635_v1, %v297_v14 }
  0x32   : > { %475 = vst.msk [vmem:[%s666_s5 + $0xd8] sm:$0xff] %vm447_vm0, %v438_v5  ;;  %v442_v20 = vmax.f32 %v406_v11, 0.0  ;;  %v407_v23 = vadd.f32 %v371_v12, %v335_v15  ;;  %v338_v25 = vadd.f32 %v635_v1, %v298_v18 }
  0x33   : > { %476 = vst.msk [vmem:[%s666_s5 + $0xe0] sm:$0xff] %vm447_vm0, %v439_v6  ;;  %v408_v24 = vadd.f32 %v372_v13, %v336_v16  ;;  %v409_v0 = vadd.f32 %v373_v17, %v337_v21 }
  0x34   : > { %477 = vst.msk [vmem:[%s666_s5 + $0xe8] sm:$0xff] %vm447_vm0, %v440_v9  ;;  %v443_v26 = vmax.f32 %v407_v23, 0.0  ;;  %v410_v28 = vadd.f32 %v374_v22, %v338_v25 }
  0x35   : > { %478 = vst.msk [vmem:[%s666_s5 + $0xf0] sm:$0xff] %vm447_vm0, %v441_v19  ;;  %v444_v27 = vmax.f32 %v408_v24, 0.0  ;;  %v445_v29 = vmax.f32 %v409_v0, 0.0 }
  0x36   : > { %479 = vst.msk [vmem:[%s666_s5 + $0xf8] sm:$0xff] %vm447_vm0, %v442_v20  ;;  %v446_v30 = vmax.f32 %v410_v28, 0.0 }
  0x37   : > { %480 = vst.msk [vmem:[%s666_s5 + $0x100] sm:$0xff] %vm447_vm0, %v443_v26 }
  0x38   : > { %481 = vst.msk [vmem:[%s666_s5 + $0x108] sm:$0xff] %vm447_vm0, %v444_v27 }
  0x39   : > { %482 = vst.msk [vmem:[%s666_s5 + $0x110] sm:$0xff] %vm447_vm0, %v445_v29 }
  0x3a   : > { %483 = vst.msk [vmem:[%s666_s5 + $0x118] sm:$0xff] %vm447_vm0, %v446_v30 }
  0x3b PF: > { %s14_s15 = sadd.s32 1, %s578_s15  }
  0x3c   : > { %p11_p4 = scmp.ge.s32.totalorder %s14_s15, 4  }
  0x3e   :  { %13 = sbr.rel (!%p11_p4) target bundleno = 1 (0x1), region = 69 }

// kernel: _forward.4
= control target key start
LH: loop header
LB: loop body
LE: loop exit
PB: predicated region body
PF: predicated region fallthrough
CT: control target
= control target key end

     0   :  { %s5986_s15 = smov 0   ;;  %s8671_s0 = inlined_call_operand.vmem [shape: bf16[2,326,8], index: 0, kind: input, shape index: {}]   ;;  %s8672_s1 = inlined_call_operand.vmem [shape: bf16[9,8,8], index: 1, kind: input, shape index: {}]   ;;  %s8673_s2 = inlined_call_operand.vmem [shape: f32[288,1], index: 2, kind: input, shape index: {}]   ;;  %s8674_s3 = inlined_call_operand.vmem [shape: f32[2,288,8], index: 3, kind: output, shape index: {0}]   ;;  %s8675_s4 = inlined_call_operand.vmem [shape: f32[2,2,8], index: 4, kind: output, shape index: {1}]  }
   0x1 LB: > { %s4945_s16 = sadd.s32 4294967295, %s5958_s15   ;;  %p4949_p0 = scmp.ge.s32.totalorder %s5958_s15, 1  ;;  %s5958_s15 = sphi %s5986_s15, %s15_s15  }
   0x2   : > { %p165_p1 = scmp.lt.s32.totalorder %s5958_s15, 3 }
   0x4   : > { %p166_p2 = pnand %p4949_p0, %p165_p1 }
   0x5   : > { %p195_p3 = scmp.lt.s32.totalorder (!%p166_p2), %s4945_s16, 1 }
   0x6   : > { %169 = sbr.rel (%p166_p2) target bundleno = 852 (0x354), region = 32 }
   0xb   : > { %v246_v0 = vld [vmem:[%s8672_s1] sm:$0xf]  ;;  %vm392_vm0 = vcmask 1043456   ;;  %v5043_v2 = vld [vmem:[%s8672_s1 + $0x4] sm:$0xf]  ;;  %s8677_s16 = smov (!%p195_p3, %s4945_s16), 1 }
   0xc   : > { %v394_v1 = vsel %vm392_vm0, %v246_v0, 0  ;;  %v5134_v3 = vld [vmem:[%s8672_s1 + $0x8] sm:$0xf]  ;;  %v903_v4 = vsel %vm392_vm0, %v5043_v2, 0  ;;  %v5316_v6 = vld [vmem:[%s8672_s1 + $0x10] sm:$0xf] }
   0xd   : > { %5935 = vmatpush.bf16.msra.mxu1 %v394_v1  ;;  %5936 = vmatpush.bf16.msra.mxu2 %v394_v1  ;;  %v1337_v5 = vsel %vm392_vm0, %v5134_v3, 0  ;;  %v2337_v7 = vsel %vm392_vm0, %v5316_v6, 0  ;;  %s5938_s25 = smul.u32 164, %s8677_s16  ;;  %vm337_vm1 = vcmask 64512   ;;  %v5225_v12 = vld [vmem:[%s8672_s1 + $0xc] sm:$0xf] }
   0xe   : > { %403 = vmatpush.bf16.msra.mxu0 %v394_v1  ;;  %5937 = vmatpush.bf16.msra.mxu3 %v394_v1  ;;  %v1770_v13 = vsel %vm392_vm0, %v5225_v12, 0  ;;  %v5407_v25 = vld [vmem:[%s8672_s1 + $0x14] sm:$0xf]  ;;  %v5498_v26 = vld [vmem:[%s8672_s1 + $0x18] sm:$0xf]  ;;  %vm1244_vm2 = vcmask 1046528  }
   0xf   : > { %s6016_s28 = scalar_lea.vmem %s8671_s0, %s5938_s25  ;;  %v2771_v27 = vsel %vm392_vm0, %v5407_v25, 0  ;;  %v3204_v28 = vsel %vm392_vm0, %v5498_v26, 0  ;;  %v5589_v33 = vld [vmem:[%s8672_s1 + $0x1c] sm:$0xf]  ;;  %v5680_v47 = vld [vmem:[%s8672_s1 + $0x20] sm:$0xf] }
  0x10   : > { %v5778_v8 = vld [vmem:[%s6016_s28 + $0x28] sm:$0xff]  ;;  %v5783_v9 = vld [vmem:[%s6016_s28 + $0x50] sm:$0xff]  ;;  %v5773_v10 = vld [vmem:[%s6016_s28] sm:$0xff]  ;;  %v3771_v34 = vsel %vm392_vm0, %v5589_v33, 0  ;;  %v4205_v52 = vsel %vm392_vm0, %v5680_v47, 0  ;;  %s5939_s13 = smul.u32 288, %s8677_s16 }
  0x11   : > { %912 = vmatpush.bf16.msrb.mxu1 %v903_v4  ;;  %1346 = vmatpush.bf16.msrb.mxu2 %v1337_v5  ;;  %v5788_v11 = vld [vmem:[%s6016_s28 + $0x78] sm:$0xff]  ;;  %v5779_v14 = vld [vmem:[%s6016_s28 + $0x30] sm:$0xff]  ;;  %v5774_v16 = vld [vmem:[%s6016_s28 + $0x8] sm:$0xff]  ;;  %vm699_vm3 = vsmask.f32 7424  ;;  %vm2678_vm6 = vcmask 1045504  }
  0x12   : > { %2346 = vmatpush.bf16.msrb.mxu0 %v2337_v7  ;;  %5030 = vmatmul.msk.bf16.vlgmr.msra.gmra.mxu1 %vm337_vm1, %v5778_v8  ;;  %v5784_v15 = vld [vmem:[%s6016_s28 + $0x58] sm:$0xff]  ;;  %v5789_v17 = vld [vmem:[%s6016_s28 + $0x80] sm:$0xff]  ;;  %v5775_v20 = vld [vmem:[%s6016_s28 + $0x10] sm:$0xff]  ;;  %vm2111_vm4 = vsmask.f32 6400  ;;  %s6130_s18 = scalar_lea.vmem %s8674_s3, %s5939_s13  ;;  %vm4112_vm7 = vcmask 1044480  }
  0x13   : > { %5035 = vmatmul.msk.bf16.vlgmr.msra.gmra.mxu2 %vm337_vm1, %v5783_v9  ;;  %5025 = vmatmul.msk.bf16.vlgmr.msra.gmra.mxu0 %vm337_vm1, %v5773_v10  ;;  %v5780_v18 = vld [vmem:[%s6016_s28 + $0x38] sm:$0xff]  ;;  %v5785_v19 = vld [vmem:[%s6016_s28 + $0x60] sm:$0xff]  ;;  %v5790_v21 = vld [vmem:[%s6016_s28 + $0x88] sm:$0xff]  ;;  %vm3545_vm5 = vsmask.f32 5376  ;;  %vm4743_vm8 = vcmask 57344  }
  0x14   : > { %5040 = vmatmul.msk.bf16.vlgmr.msra.gmra.mxu3 %vm337_vm1, %v5788_v11  ;;  %v5781_v22 = vld [vmem:[%s6016_s28 + $0x40] sm:$0xff]  ;;  %v5786_v23 = vld [vmem:[%s6016_s28 + $0x68] sm:$0xff]  ;;  %v5776_v24 = vld [vmem:[%s6016_s28 + $0x18] sm:$0xff] }
  0x15   : > { %1779 = vmatpush.bf16.msrb.mxu3 %v1770_v13  ;;  %v5228_v29 = vld [vmem:[%s6016_s28 + $0x8] sm:$0xe]  ;;  %v5827_v30 = vld [vmem:[%s6016_s28 + $0x8] sm:$0xf0]  ;;  %2780 = vmatpush.bf16.msra.mxu1 %v2771_v27  ;;  %v5828_v31 = vld [vmem:[%s6016_s28 + $0x10] sm:$0xff] }
  0x16   : > { %3213 = vmatpush.bf16.msra.mxu2 %v3204_v28  ;;  %v5229_v32 = vor.u32 %v5827_v30, %v5228_v29  ;;  %v1679_v36 = vrot.slane %v5828_v31, 1  ;;  %v5782_v38 = vld [vmem:[%s6016_s28 + $0x48] sm:$0xff]  ;;  %v5787_v39 = vld [vmem:[%s6016_s28 + $0x70] sm:$0xff]  ;;  %v5791_v42 = vld [vmem:[%s6016_s28] sm:$0xff]  ;;  %4214 = vmatpush.bf16.msra.mxu0 %v4205_v52 }
  0x17   : > { %v5319_v40 = vld [vmem:[%s6016_s28 + $0x8] sm:$0xe]  ;;  %v5845_v41 = vld [vmem:[%s6016_s28 + $0x8] sm:$0xf0]  ;;  %v5777_v43 = vld [vmem:[%s6016_s28 + $0x20] sm:$0xff]  ;;  %v703_v49 = vshll.u32 %v5791_v42, 16 }
  0x18   : > { %v1678_v35 = vrot.slane %v5229_v32, 1  ;;  %v5320_v44 = vor.u32 %v5845_v41, %v5319_v40  ;;  %v5846_v45 = vld [vmem:[%s6016_s28 + $0x10] sm:$0xff]  ;;  %v5829_v46 = vld [vmem:[%s6016_s28 + $0x18] sm:$0xff]  ;;  %v5792_v48 = vld [vmem:[%s6016_s28 + $0x8] sm:$0xff]  ;;  %v701_v59 = vshrl.u32 %v5791_v42, 16 }
  0x19   : > { %3780 = vmatpush.bf16.msra.mxu3 %v3771_v34  ;;  %v5137_v50 = vld [vmem:[%s6016_s28] sm:$0xe]  ;;  %v5809_v53 = vld [vmem:[%s6016_s28] sm:$0xf0]  ;;  %v1681_v54 = vrot.slane %v5829_v46, 1  ;;  %v2121_v56 = vshrl.u32 %v5846_v45, 16 }
  0x1a   : > { %v1680_v37 = vsel %vm1244_vm2, %v1678_v35, %v1679_v36  ;;  %v2113_v51 = vshrl.u32 %v5320_v44, 16  ;;  %v2116_v55 = vshll.u32 %v5320_v44, 16  ;;  %v2124_v57 = vshll.u32 %v5846_v45, 16  ;;  %v5810_v62 = vld [vmem:[%s6016_s28 + $0x8] sm:$0xff]  ;;  %v5847_v13 = vld [vmem:[%s6016_s28 + $0x18] sm:$0xff]  ;;  %v5848_v32 = vld [vmem:[%s6016_s28 + $0x20] sm:$0xff] }
  0x1b   : > { %v1682_v58 = vsel %vm1244_vm2, %v1679_v36, %v1681_v54  ;;  %v705_v60 = vrot.slane %v703_v49, 1  ;;  %v708_v61 = vshll.u32 %v5792_v48, 16  ;;  %v5138_v63 = vor.u32 %v5809_v53, %v5137_v50  ;;  %v5794_v33 = vld [vmem:[%s6016_s28 + $0x18] sm:$0xff]  ;;  %v5831_v34 = vld [vmem:[%s6016_s28 + $0x28] sm:$0xff]  ;;  %v5795_v52 = vld [vmem:[%s6016_s28 + $0x20] sm:$0xff] }
  0x1c   : > { %v2115_v0 = vrot.slane %v2113_v51, 1  ;;  %v2118_v1 = vrot.slane %v2116_v55, 2  ;;  %v2123_v2 = vrot.slane %v2121_v56, 1  ;;  %v2126_v3 = vrot.slane %v2124_v57, 2  ;;  %v5812_v40 = vld [vmem:[%s6016_s28 + $0x18] sm:$0xff]  ;;  %v5849_v51 = vld [vmem:[%s6016_s28 + $0x28] sm:$0xff] }
  0x1d   : > { %v706_v4 = vor.u32 %v705_v60, %v701_v59  ;;  %v710_v5 = vrot.slane %v708_v61, 1  ;;  %v1245_v6 = vrot.slane %v5138_v63, 1  ;;  %v1246_v7 = vrot.slane %v5810_v62, 1  ;;  %v5832_v53 = vld [vmem:[%s6016_s28 + $0x30] sm:$0xff]  ;;  %v5813_v59 = vld [vmem:[%s6016_s28 + $0x20] sm:$0xff] }
  0x1e   : > { %v2119_v8 = vor.u32 %v2118_v1, %v2115_v0  ;;  %v2127_v9 = vor.u32 %v2126_v3, %v2123_v2  ;;  %v2139_v35 = vshrl.u32 %v5848_v32, 16  ;;  %v2142_v36 = vshll.u32 %v5848_v32, 16 }
  0x1f   : > { %v711_v10 = vsel %vm699_vm3, %v706_v4, %v710_v5  ;;  %v1247_v11 = vsel %vm1244_vm2, %v1245_v6, %v1246_v7  ;;  %v1250_v46 = vrot.slane %v5812_v40, 1  ;;  %v2151_v55 = vshll.u32 %v5849_v51, 16 }
  0x20   : > { %v2128_v12 = vsel %vm2111_vm4, %v2119_v8, %v2127_v9  ;;  %v2141_v42 = vrot.slane %v2139_v35, 1  ;;  %v1687_v56 = vrot.slane %v5832_v53, 1  ;;  %v728_v57 = vshrl.u32 %v5794_v33, 16  ;;  %v5850_v8 = vld [vmem:[%s6016_s28 + $0x30] sm:$0xff] }
  0x21   : > { %v2153_v62 = vrot.slane %v2151_v55, 2  ;;  %v1252_v1 = vrot.slane %v5813_v59, 1 }
  0x22   : > { %5031 = vmatmul.msk.bf16.gmra.mxu1 %vm337_vm1, %v5779_v14  ;;  %v5830_v14 = vld [vmem:[%s6016_s28 + $0x20] sm:$0xff] }
  0x23   : > { %5036 = vmatmul.msk.bf16.gmra.mxu2 %vm337_vm1, %v5784_v15  ;;  %5026 = vmatmul.msk.bf16.gmra.mxu0 %vm337_vm1, %v5774_v16  ;;  %v5793_v15 = vld [vmem:[%s6016_s28 + $0x10] sm:$0xff]  ;;  %v1683_v16 = vrot.slane %v5830_v14, 1 }
  0x24   : > { %5041 = vmatmul.msk.bf16.gmra.mxu3 %vm337_vm1, %v5789_v17  ;;  %v2130_v17 = vshrl.u32 %v5847_v13, 16 }
  0x32   : > { %5032 = vmatmul.msk.bf16.gmra.mxu1 %vm337_vm1, %v5780_v18  ;;  %v2133_v18 = vshll.u32 %v5847_v13, 16 }
  0x33   : > { %5037 = vmatmul.msk.bf16.gmra.mxu2 %vm337_vm1, %v5785_v19  ;;  %5027 = vmatmul.msk.bf16.gmra.mxu0 %vm337_vm1, %v5775_v20  ;;  %v1684_v19 = vsel %vm1244_vm2, %v1681_v54, %v1683_v16  ;;  %v712_v20 = vshrl.u32 %v5792_v48, 16  ;;  %v2148_v54 = vshrl.u32 %v5849_v51, 16 }
  0x34   : > { %5042 = vmatmul.msk.bf16.gmra.mxu3 %vm337_vm1, %v5790_v21  ;;  %v716_v21 = vshll.u32 %v5793_v15, 16 }
  0x35   : > { %v714_v25 = vor.u32 %v712_v20, %v710_v5  ;;  %v2150_v61 = vrot.slane %v2148_v54, 1  ;;  %v1253_v5 = vsel %vm1244_vm2, %v1250_v46, %v1252_v1 }
  0x36   : > { %v718_v26 = vrot.slane %v716_v21, 1 }
  0x37   : > { %v2154_v2 = vor.u32 %v2153_v62, %v2150_v61  ;;  %v5852_v61 = vld [vmem:[%s6016_s28 + $0x40] sm:$0xff] }
  0x38   : > { %v719_v29 = vsel %vm699_vm3, %v714_v25, %v718_v26 }
  0x42   : > { %5033 = vmatmul.msk.bf16.gmra.mxu1 %vm337_vm1, %v5781_v22  ;;  %v5811_v22 = vld [vmem:[%s6016_s28 + $0x10] sm:$0xff] }
  0x43   : > { %5038 = vmatmul.msk.bf16.gmra.mxu2 %vm337_vm1, %v5786_v23  ;;  %5028 = vmatmul.msk.bf16.gmra.mxu0 %vm337_vm1, %v5776_v24  ;;  %v2132_v23 = vrot.slane %v2130_v17, 1  ;;  %v2135_v24 = vrot.slane %v2133_v18, 2  ;;  %v1248_v27 = vrot.slane %v5811_v22, 1  ;;  %v5814_v18 = vld [vmem:[%s6016_s28 + $0x28] sm:$0xff] }
  0x44   : > { %5298 = vmatmul.msk.bf16.vlgmr.msrb.gmra.mxu3 %vm337_vm1, %v1680_v37  ;;  %v1685_v37 = vrot.slane %v5831_v34, 1  ;;  %v5851_v34 = vld [vmem:[%s6016_s28 + $0x38] sm:$0xff] }
  0x45   : > { %v2136_v28 = vor.u32 %v2135_v24, %v2132_v23  ;;  %v1249_v30 = vsel %vm1244_vm2, %v1246_v7, %v1248_v27  ;;  %v1251_v49 = vsel %vm1244_vm2, %v1248_v27, %v1250_v46 }
  0x46   : > { %v1686_v41 = vsel %vm1244_vm2, %v1683_v16, %v1685_v37  ;;  %v1688_v60 = vsel %vm1244_vm2, %v1685_v37, %v1687_v56  ;;  %v736_v16 = vshrl.u32 %v5795_v52, 16  ;;  %v5834_v37 = vld [vmem:[%s6016_s28 + $0x40] sm:$0xff] }
  0x47   : > { %v2137_v31 = vsel %vm2111_vm4, %v2127_v9, %v2136_v28  ;;  %v5796_v9 = vld [vmem:[%s6016_s28 + $0x28] sm:$0xff] }
  0x48   : > { %v740_v17 = vshll.u32 %v5796_v9, 16 }
  0x4a   : > { %v742_v25 = vrot.slane %v740_v17, 1 }
  0x52   : > { %5034 = vmatmul.msk.bf16.gmra.mxu1 %vm337_vm1, %v5782_v38  ;;  %v720_v38 = vshrl.u32 %v5793_v15, 16 }
  0x53   : > { %5039 = vmatmul.msk.bf16.gmra.mxu2 %vm337_vm1, %v5787_v39  ;;  %5029 = vmatmul.msk.bf16.gmra.mxu0 %vm337_vm1, %v5777_v43  ;;  %v724_v39 = vshll.u32 %v5794_v33, 16  ;;  %v2144_v43 = vrot.slane %v2142_v36, 2  ;;  %v5797_v36 = vld [vmem:[%s6016_s28 + $0x30] sm:$0xff] }
  0x54   : > { %5299 = vmatmul.msk.bf16.gmra.mxu3 %vm337_vm1, %v1682_v58  ;;  %v722_v44 = vor.u32 %v720_v38, %v718_v26  ;;  %v732_v58 = vshll.u32 %v5795_v52, 16  ;;  %v1254_v26 = vrot.slane %v5814_v18, 1  ;;  %v2166_v38 = vshrl.u32 %v5851_v34, 16 }
  0x55   : > { %v726_v45 = vrot.slane %v724_v39, 1  ;;  %v2145_v47 = vor.u32 %v2144_v43, %v2141_v42  ;;  %v2169_v39 = vshll.u32 %v5851_v34, 16  ;;  %v744_v43 = vshrl.u32 %v5796_v9, 16 }
  0x56   : > { %v734_v0 = vrot.slane %v732_v58, 1 }
  0x57   : > { %v727_v48 = vsel %vm699_vm3, %v722_v44, %v726_v45  ;;  %v2146_v50 = vsel %vm2111_vm4, %v2136_v28, %v2145_v47  ;;  %v730_v63 = vor.u32 %v728_v57, %v726_v45  ;;  %v2155_v7 = vsel %vm2111_vm4, %v2145_v47, %v2154_v2  ;;  %v5815_v45 = vld [vmem:[%s6016_s28 + $0x30] sm:$0xff] }
  0x58   : > { %v738_v24 = vor.u32 %v736_v16, %v734_v0  ;;  %v748_v44 = vshll.u32 %v5797_v36, 16  ;;  %v746_v51 = vor.u32 %v744_v43, %v742_v25  ;;  %v1256_v53 = vrot.slane %v5815_v45, 1 }
  0x59   : > { %v735_v4 = vsel %vm699_vm3, %v730_v63, %v734_v0  ;;  %v5798_v63 = vld [vmem:[%s6016_s28 + $0x38] sm:$0xff]  ;;  %v5835_v0 = vld [vmem:[%s6016_s28 + $0x48] sm:$0xff] }
  0x5a   : > { %v750_v52 = vrot.slane %v748_v44, 1  ;;  %v1257_v58 = vsel %vm1244_vm2, %v1254_v26, %v1256_v53 }
  0x5c   : > { %v751_v57 = vsel %vm699_vm3, %v746_v51, %v750_v52  ;;  %v5854_v51 = vld [vmem:[%s6016_s28 + $0x50] sm:$0xff] }
  0x62   : > { %5116 = vmatmul.msk.bf16.vlgmr.msrb.gmra.mxu1 %vm337_vm1, %v711_v10  ;;  %v5833_v10 = vld [vmem:[%s6016_s28 + $0x38] sm:$0xff] }
  0x63   : > { %5207 = vmatmul.msk.bf16.vlgmr.msrb.gmra.mxu2 %vm337_vm1, %v1247_v11  ;;  %5389 = vmatmul.msk.bf16.vlgmr.msrb.gmra.mxu0 %vm337_vm1, %v2128_v12  ;;  %v2157_v11 = vshrl.u32 %v5850_v8, 16  ;;  %v2160_v12 = vshll.u32 %v5850_v8, 16  ;;  %v1689_v14 = vrot.slane %v5833_v10, 1  ;;  %v5816_v8 = vld [vmem:[%s6016_s28 + $0x38] sm:$0xff] }
  0x64   : > { %5300 = vmatmul.msk.bf16.gmra.mxu3 %vm337_vm1, %v1684_v19  ;;  %v1258_v16 = vrot.slane %v5816_v8, 1 }
  0x65   : > { %v1690_v19 = vsel %vm1244_vm2, %v1687_v56, %v1689_v14  ;;  %v2159_v21 = vrot.slane %v2157_v11, 1  ;;  %v2162_v22 = vrot.slane %v2160_v12, 2 }
  0x67   : > { %v2163_v27 = vor.u32 %v2162_v22, %v2159_v21  ;;  %v1259_v21 = vsel %vm1244_vm2, %v1256_v53, %v1258_v16  ;;  %v5837_v53 = vld [vmem:[%s6016_s28 + $0x58] sm:$0xff] }
  0x69   : > { %v2164_v33 = vsel %vm2111_vm4, %v2154_v2, %v2163_v27  ;;  %v2178_v2 = vshll.u32 %v5852_v61, 16 }
  0x6b   : > { %v2180_v12 = vrot.slane %v2178_v2, 2 }
  0x72   : > { %5117 = vmatmul.msk.bf16.gmra.mxu1 %vm337_vm1, %v719_v29 }
  0x73   : > { %5208 = vmatmul.msk.bf16.gmra.mxu2 %vm337_vm1, %v1249_v30  ;;  %5390 = vmatmul.msk.bf16.gmra.mxu0 %vm337_vm1, %v2137_v31  ;;  %v743_v30 = vsel %vm699_vm3, %v738_v24, %v742_v25  ;;  %v1255_v31 = vsel %vm1244_vm2, %v1252_v1, %v1254_v26  ;;  %v2175_v1 = vshrl.u32 %v5852_v61, 16  ;;  %v5853_v24 = vld [vmem:[%s6016_s28 + $0x48] sm:$0xff]  ;;  %v5799_v26 = vld [vmem:[%s6016_s28 + $0x40] sm:$0xff] }
  0x74   : > { %5301 = vmatmul.msk.bf16.gmra.mxu3 %vm337_vm1, %v1686_v41  ;;  %v1691_v41 = vrot.slane %v5834_v37, 1  ;;  %v764_v34 = vshll.u32 %v5799_v26, 16 }
  0x75   : > { %v2177_v11 = vrot.slane %v2175_v1, 1 }
  0x76   : > { %v1692_v46 = vsel %vm1244_vm2, %v1689_v14, %v1691_v41 }
  0x77   : > { %v2181_v17 = vor.u32 %v2180_v12, %v2177_v11 }
  0x82   : > { %5118 = vmatmul.msk.bf16.gmra.mxu1 %vm337_vm1, %v727_v48  ;;  %v2168_v48 = vrot.slane %v2166_v38, 1 }
  0x83   : > { %5209 = vmatmul.msk.bf16.gmra.mxu2 %vm337_vm1, %v1251_v49  ;;  %5391 = vmatmul.msk.bf16.gmra.mxu0 %vm337_vm1, %v2146_v50  ;;  %v2171_v49 = vrot.slane %v2169_v39, 2 }
  0x84   : > { %5302 = vmatmul.msk.bf16.gmra.mxu3 %vm337_vm1, %v1688_v60 }
  0x85   : > { %v2172_v54 = vor.u32 %v2171_v49, %v2168_v48 }
  0x87   : > { %v2173_v60 = vsel %vm2111_vm4, %v2163_v27, %v2172_v54  ;;  %v5836_v27 = vld [vmem:[%s6016_s28 + $0x50] sm:$0xff] }
  0x8f   : > { %v430_v3 = vpop.f32.mrf.mxu1 }
  0x90   : > { %505 = vst.msk [vmem:[%s6130_s18 + $0x50] sm:$0xff] %vm337_vm1, %v430_v3  ;;  %v405_v6 = vpop.f32.mrf.mxu0 }
  0x91   : > { %495 = vst.msk [vmem:[%s6130_s18] sm:$0xff] %vm337_vm1, %v405_v6  ;;  %v752_v6 = vshrl.u32 %v5797_v36, 16 }
  0x92   : > { %5119 = vmatmul.msk.bf16.gmra.mxu1 %vm337_vm1, %v735_v4  ;;  %v1693_v4 = vrot.slane %v5835_v0, 1 }
  0x93   : > { %5210 = vmatmul.msk.bf16.gmra.mxu2 %vm337_vm1, %v1253_v5  ;;  %5392 = vmatmul.msk.bf16.gmra.mxu0 %vm337_vm1, %v2155_v7  ;;  %v756_v7 = vshll.u32 %v5798_v63, 16  ;;  %v754_v14 = vor.u32 %v752_v6, %v750_v52  ;;  %v5800_v52 = vld [vmem:[%s6016_s28 + $0x48] sm:$0xff] }
  0x94   : > { %5303 = vmatmul.msk.bf16.gmra.mxu3 %vm337_vm1, %v1690_v19  ;;  %v1694_v9 = vsel %vm1244_vm2, %v1691_v41, %v1693_v4  ;;  %v766_v41 = vrot.slane %v764_v34, 1  ;;  %v772_v61 = vshll.u32 %v5800_v52, 16 }
  0x96   : > { %v455_v13 = vpop.f32.mrf.mxu2 }
  0x97   : > { %515 = vst.msk [vmem:[%s6130_s18 + $0xa0] sm:$0xff] %vm337_vm1, %v455_v13  ;;  %v432_v15 = vpop.f32.mrf.mxu1  ;;  %v480_v23 = vpop.f32.mrf.mxu3 }
  0x98   : > { %506 = vst.msk [vmem:[%s6130_s18 + $0x58] sm:$0xff] %vm337_vm1, %v432_v15  ;;  %v407_v20 = vpop.f32.mrf.mxu0  ;;  %v758_v15 = vrot.slane %v756_v7, 1 }
  0x99   : > { %496 = vst.msk [vmem:[%s6130_s18 + $0x8] sm:$0xff] %vm337_vm1, %v407_v20 }
  0x9a   : > { %525 = vst.msk [vmem:[%s6130_s18 + $0xf0] sm:$0xff] %vm337_vm1, %v480_v23  ;;  %v759_v20 = vsel %vm699_vm3, %v754_v14, %v758_v15  ;;  %v2182_v23 = vsel %vm2111_vm4, %v2172_v54, %v2181_v17 }
  0x9e   : > { %v457_v28 = vpop.f32.mrf.mxu2 }
  0x9f   : > { %516 = vst.msk [vmem:[%s6130_s18 + $0xa8] sm:$0xff] %vm337_vm1, %v457_v28  ;;  %v435_v29 = vpop.f32.mrf.mxu1  ;;  %v482_v35 = vpop.f32.mrf.mxu3  ;;  %v2184_v28 = vshrl.u32 %v5853_v24, 16 }
  0xa0   : > { %507 = vst.msk [vmem:[%s6130_s18 + $0x60] sm:$0xff] %vm337_vm1, %v435_v29  ;;  %v410_v32 = vpop.f32.mrf.mxu0  ;;  %v2187_v29 = vshll.u32 %v5853_v24, 16  ;;  %v532_v24 = vld [vmem:[%s6130_s18 + $0x8] sm:$0xff] }
  0xa1   : > { %497 = vst.msk [vmem:[%s6130_s18 + $0x10] sm:$0xff] %vm337_vm1, %v410_v32  ;;  %v2186_v38 = vrot.slane %v2184_v28, 1  ;;  %v6291_v28 = vld [vmem:[%s6016_s28 + $0x50] sm:$0xff] }
  0xa2   : > { %5120 = vmatmul.msk.bf16.gmra.mxu1 %vm337_vm1, %v743_v30  ;;  %526 = vst.msk [vmem:[%s6130_s18 + $0xf8] sm:$0xff] %vm337_vm1, %v482_v35  ;;  %v5817_v35 = vld [vmem:[%s6016_s28 + $0x40] sm:$0xff]  ;;  %v2189_v39 = vrot.slane %v2187_v29, 2 }
  0xa3   : > { %5211 = vmatmul.msk.bf16.gmra.mxu2 %vm337_vm1, %v1255_v31  ;;  %5393 = vmatmul.msk.bf16.gmra.mxu0 %vm337_vm1, %v2164_v33  ;;  %v1695_v31 = vrot.slane %v5836_v27, 1  ;;  %v760_v33 = vshrl.u32 %v5798_v63, 16 }
  0xa4   : > { %5304 = vmatmul.msk.bf16.gmra.mxu3 %vm337_vm1, %v1692_v46  ;;  %v2190_v43 = vor.u32 %v2189_v39, %v2186_v38  ;;  %v1264_v38 = vrot.slane %v6291_v28, 1 }
  0xa5   : > { %v1696_v36 = vsel %vm1244_vm2, %v1693_v4, %v1695_v31  ;;  %v774_v4 = vrot.slane %v772_v61, 1 }
  0xa6   : > { %v460_v40 = vpop.f32.mrf.mxu2 }
  0xa7   : > { %517 = vst.msk [vmem:[%s6130_s18 + $0xb0] sm:$0xff] %vm337_vm1, %v460_v40  ;;  %v437_v42 = vpop.f32.mrf.mxu1  ;;  %v485_v50 = vpop.f32.mrf.mxu3  ;;  %v762_v40 = vor.u32 %v760_v33, %v758_v15 }
  0xa8   : > { %508 = vst.msk [vmem:[%s6130_s18 + $0x68] sm:$0xff] %vm337_vm1, %v437_v42  ;;  %v412_v47 = vpop.f32.mrf.mxu0  ;;  %v1260_v42 = vrot.slane %v5817_v35, 1 }
  0xa9   : > { %498 = vst.msk [vmem:[%s6130_s18 + $0x18] sm:$0xff] %vm337_vm1, %v412_v47  ;;  %v767_v47 = vsel %vm699_vm3, %v762_v40, %v766_v41 }
  0xaa   : > { %527 = vst.msk [vmem:[%s6130_s18 + $0x100] sm:$0xff] %vm337_vm1, %v485_v50  ;;  %v1261_v48 = vsel %vm1244_vm2, %v1258_v16, %v1260_v42  ;;  %v2191_v50 = vsel %vm2111_vm4, %v2181_v17, %v2190_v43  ;;  %v5855_v16 = vld [vmem:[%s6016_s28 + $0x58] sm:$0xff]  ;;  %v6282_v17 = vld [vmem:[%s6016_s28 + $0x50] sm:$0xff] }
  0xab   : > { %v780_v27 = vshll.u32 %v6282_v17, 16 }
  0xae   : > { %v462_v55 = vpop.f32.mrf.mxu2 }
  0xaf   : > { %518 = vst.msk [vmem:[%s6130_s18 + $0xb8] sm:$0xff] %vm337_vm1, %v462_v55  ;;  %v440_v56 = vpop.f32.mrf.mxu1  ;;  %v487_v62 = vpop.f32.mrf.mxu3  ;;  %v2193_v55 = vshrl.u32 %v5854_v51, 16 }
  0xb0   : > { %509 = vst.msk [vmem:[%s6130_s18 + $0x70] sm:$0xff] %vm337_vm1, %v440_v56  ;;  %v415_v59 = vpop.f32.mrf.mxu0  ;;  %v2196_v56 = vshll.u32 %v5854_v51, 16 }
  0xb1   : > { %499 = vst.msk [vmem:[%s6130_s18 + $0x20] sm:$0xff] %vm337_vm1, %v415_v59  ;;  %v2195_v1 = vrot.slane %v2193_v55, 1  ;;  %v6319_v55 = vld [vmem:[%s6016_s28 + $0x58] sm:$0xff] }
  0xb2   : > { %5121 = vmatmul.msk.bf16.gmra.mxu1 %vm337_vm1, %v751_v57  ;;  %528 = vst.msk [vmem:[%s6130_s18 + $0x108] sm:$0xff] %vm337_vm1, %v487_v62  ;;  %v5818_v62 = vld [vmem:[%s6016_s28 + $0x48] sm:$0xff]  ;;  %v2198_v2 = vrot.slane %v2196_v56, 2 }
  0xb3   : > { %5212 = vmatmul.msk.bf16.gmra.mxu2 %vm337_vm1, %v1257_v58  ;;  %5394 = vmatmul.msk.bf16.gmra.mxu0 %vm337_vm1, %v2173_v60  ;;  %v1697_v58 = vrot.slane %v5837_v53, 1  ;;  %v768_v60 = vshrl.u32 %v5799_v26, 16  ;;  %v776_v26 = vshrl.u32 %v5800_v52, 16  ;;  %v6323_v56 = vld [vmem:[%s6016_s28 + $0x68] sm:$0xff] }
  0xb4   : > { %5305 = vmatmul.msk.bf16.gmra.mxu3 %vm337_vm1, %v1694_v9  ;;  %v2199_v6 = vor.u32 %v2198_v2, %v2195_v1  ;;  %v531_v9 = vld [vmem:[%s6130_s18] sm:$0xff]  ;;  %v784_v1 = vshrl.u32 %v6282_v17, 16  ;;  %v6337_v2 = vld [vmem:[%s6016_s28 + $0x58] sm:$0xff] }
  0xb5   : > { %v1698_v63 = vsel %vm1244_vm2, %v1695_v31, %v1697_v58 }
  0xb6   : > { %v465_v3 = vpop.f32.mrf.mxu2  ;;  %v2200_v15 = vsel %vm2111_vm4, %v2190_v43, %v2199_v6 }
  0xb7   : > { %519 = vst.msk [vmem:[%s6130_s18 + $0xc0] sm:$0xff] %vm337_vm1, %v465_v3  ;;  %v442_v5 = vpop.f32.mrf.mxu1  ;;  %v490_v13 = vpop.f32.mrf.mxu3  ;;  %v770_v3 = vor.u32 %v768_v60, %v766_v41 }
  0xb8   : > { %510 = vst.msk [vmem:[%s6130_s18 + $0x78] sm:$0xff] %vm337_vm1, %v442_v5  ;;  %v417_v10 = vpop.f32.mrf.mxu0  ;;  %v1262_v5 = vrot.slane %v5818_v62, 1  ;;  %v1701_v62 = vrot.slane %v6323_v56, 1 }
  0xb9   : > { %500 = vst.msk [vmem:[%s6130_s18 + $0x28] sm:$0xff] %vm337_vm1, %v417_v10  ;;  %v775_v11 = vsel %vm699_vm3, %v770_v3, %v774_v4 }
  0xba   : > { %529 = vst.msk [vmem:[%s6130_s18 + $0x110] sm:$0xff] %vm337_vm1, %v490_v13  ;;  %v1263_v12 = vsel %vm1244_vm2, %v1260_v42, %v1262_v5  ;;  %v533_v42 = vld [vmem:[%s6130_s18 + $0x10] sm:$0xff] }
  0xbe   : > { %v467_v18 = vpop.f32.mrf.mxu2 }
  0xbf   : > { %520 = vst.msk [vmem:[%s6130_s18 + $0xc8] sm:$0xff] %vm337_vm1, %v467_v18  ;;  %v445_v19 = vpop.f32.mrf.mxu1  ;;  %v492_v25 = vpop.f32.mrf.mxu3  ;;  %v5838_v18 = vld [vmem:[%s6016_s28 + $0x60] sm:$0xff] }
  0xc0   : > { %511 = vst.msk [vmem:[%s6130_s18 + $0x80] sm:$0xff] %vm337_vm1, %v445_v19  ;;  %v420_v22 = vpop.f32.mrf.mxu0 }
  0xc1   : > { %501 = vst.msk [vmem:[%s6130_s18 + $0x30] sm:$0xff] %vm337_vm1, %v420_v22 }
  0xc2   : > { %5122 = vmatmul.msk.bf16.gmra.mxu1 %vm337_vm1, %v759_v20  ;;  %530 = vst.msk [vmem:[%s6130_s18 + $0x118] sm:$0xff] %vm337_vm1, %v492_v25  ;;  %v2202_v20 = vshrl.u32 %v5855_v16, 16 }
  0xc3   : > { %5213 = vmatmul.msk.bf16.gmra.mxu2 %vm337_vm1, %v1259_v21  ;;  %5395 = vmatmul.msk.bf16.gmra.mxu0 %vm337_vm1, %v2182_v23  ;;  %v2205_v21 = vshll.u32 %v5855_v16, 16  ;;  %v1699_v23 = vrot.slane %v5838_v18, 1 }
  0xc4   : > { %5306 = vmatmul.msk.bf16.gmra.mxu3 %vm337_vm1, %v1696_v36  ;;  %v778_v36 = vor.u32 %v776_v26, %v774_v4 }
  0xc5   : > { %v1700_v29 = vsel %vm1244_vm2, %v1697_v58, %v1699_v23  ;;  %v2207_v33 = vrot.slane %v2205_v21, 2  ;;  %v1702_v3 = vsel %vm1244_vm2, %v1699_v23, %v1701_v62  ;;  %v535_v23 = vld [vmem:[%s6130_s18 + $0x20] sm:$0xff] }
  0xc6   : > { %v470_v30 = vpop.f32.mrf.mxu2 }
  0xc7   : > { %521 = vst.msk [vmem:[%s6130_s18 + $0xd0] sm:$0xff] %vm337_vm1, %v470_v30  ;;  %v447_v32 = vpop.f32.mrf.mxu1  ;;  %v6238_v44 = vpop.f32.mrf.mxu3 }
  0xc8   : > { %512 = vst.msk [vmem:[%s6130_s18 + $0x88] sm:$0xff] %vm337_vm1, %v447_v32  ;;  %v422_v37 = vpop.f32.mrf.mxu0  ;;  %v2204_v32 = vrot.slane %v2202_v20, 1 }
  0xc9   : > { %502 = vst.msk [vmem:[%s6130_s18 + $0x38] sm:$0xff] %vm337_vm1, %v422_v37  ;;  %v782_v37 = vrot.slane %v780_v27, 1 }
  0xca   : > { %v2208_v39 = vor.u32 %v2207_v33, %v2204_v32  ;;  %v6378_v33 = vld [vmem:[%s6016_s28 + $0x60] sm:$0xff] }
  0xce   : > { %v472_v45 = vpop.f32.mrf.mxu2 }
  0xcf   : > { %522 = vst.msk [vmem:[%s6130_s18 + $0xd8] sm:$0xff] %vm337_vm1, %v472_v45  ;;  %v450_v46 = vpop.f32.mrf.mxu1  ;;  %v6255_v54 = vpop.f32.mrf.mxu3  ;;  %v783_v45 = vsel %vm699_vm3, %v778_v36, %v782_v37 }
  0xd0   : > { %513 = vst.msk [vmem:[%s6130_s18 + $0x90] sm:$0xff] %vm337_vm1, %v450_v46  ;;  %v425_v49 = vpop.f32.mrf.mxu0  ;;  %v1265_v46 = vsel %vm1244_vm2, %v1262_v5, %v1264_v38 }
  0xd1   : > { %503 = vst.msk [vmem:[%s6130_s18 + $0x40] sm:$0xff] %vm337_vm1, %v425_v49  ;;  %v2209_v49 = vsel %vm2111_vm4, %v2199_v6, %v2208_v39 }
  0xd2   : > { %5123 = vmatmul.msk.bf16.gmra.mxu1 %vm337_vm1, %v767_v47 }
  0xd3   : > { %5214 = vmatmul.msk.bf16.gmra.mxu2 %vm337_vm1, %v1261_v48  ;;  %5396 = vmatmul.msk.bf16.gmra.mxu0 %vm337_vm1, %v2191_v50  ;;  %v5856_v50 = vld [vmem:[%s6016_s28 + $0x60] sm:$0xff] }
  0xd4   : > { %5307 = vmatmul.msk.bf16.gmra.mxu3 %vm337_vm1, %v1698_v63  ;;  %v2214_v60 = vshll.u32 %v5856_v50, 16  ;;  %v534_v63 = vld [vmem:[%s6130_s18 + $0x18] sm:$0xff] }
  0xd6   : > { %v475_v57 = vpop.f32.mrf.mxu2 }
  0xd7   : > { %523 = vst.msk [vmem:[%s6130_s18 + $0xe0] sm:$0xff] %vm337_vm1, %v475_v57  ;;  %v452_v59 = vpop.f32.mrf.mxu1  ;;  %v6266_v7 = vpop.f32.mrf.mxu3 }
  0xd8   : > { %514 = vst.msk [vmem:[%s6130_s18 + $0x98] sm:$0xff] %vm337_vm1, %v452_v59  ;;  %v427_v0 = vpop.f32.mrf.mxu0  ;;  %v2211_v59 = vshrl.u32 %v5856_v50, 16 }
  0xd9   : > { %504 = vst.msk [vmem:[%s6130_s18 + $0x48] sm:$0xff] %vm337_vm1, %v427_v0 }
  0xda   : > { %v2213_v6 = vrot.slane %v2211_v59, 1 }
  0xde   : > { %v477_v8 = vpop.f32.mrf.mxu2 }
  0xdf   : > { %524 = vst.msk [vmem:[%s6130_s18 + $0xe8] sm:$0xff] %vm337_vm1, %v477_v8  ;;  %v914_v10 = vpop.f32.mrf.mxu1  ;;  %v6286_v19 = vpop.f32.mrf.mxu3  ;;  %v2216_v8 = vrot.slane %v2214_v60, 2 }
  0xe0   : > { %v1004_v13 = vadd.f32 %v914_v10, %v531_v9  ;;  %v6273_v14 = vpop.f32.mrf.mxu0 }
  0xe1   : > { %v6351_v17 = vor.u32 %v2216_v8, %v2213_v6 }
  0xe2   : > { %1040 = vst.msk [vmem:[%s6130_s18] sm:$0xff] %vm337_vm1, %v1004_v13  ;;  %5124 = vmatmul.msk.bf16.gmra.mxu1 %vm337_vm1, %v775_v11 }
  0xe3   : > { %5215 = vmatmul.msk.bf16.gmra.mxu2 %vm337_vm1, %v1263_v12  ;;  %5397 = vmatmul.msk.bf16.gmra.mxu0 %vm337_vm1, %v2200_v15  ;;  %v786_v12 = vor.u32 %v784_v1, %v782_v37  ;;  %v1266_v15 = vrot.slane %v6337_v2, 1  ;;  %v2218_v28 = vsel %vm2111_vm4, %v2208_v39, %v6351_v17 }
  0xe4   : > { %5308 = vmatmul.msk.bf16.gmra.mxu3 %vm337_vm1, %v1700_v29 }
  0xe6   : > { %v1348_v22 = vpop.f32.mrf.mxu2 }
  0xe7   : > { %v916_v25 = vpop.f32.mrf.mxu1  ;;  %v6303_v40 = vpop.f32.mrf.mxu3 }
  0xe8   : > { %v1005_v30 = vadd.f32 %v916_v25, %v532_v24  ;;  %v6294_v31 = vpop.f32.mrf.mxu0  ;;  %v1267_v25 = vsel %vm1244_vm2, %v1264_v38, %v1266_v15 }
  0xe9   : > { %v1076_v34 = vld [vmem:[%s6130_s18] sm:$0xff] }
  0xea   : > { %v1438_v35 = vadd.f32 %v1348_v22, %v1076_v34  ;;  %1041 = vst.msk [vmem:[%s6130_s18 + $0x8] sm:$0xff] %vm337_vm1, %v1005_v30  ;;  %v6382_v34 = vld [vmem:[%s6016_s28 + $0x70] sm:$0xff] }
  0xec   : > { %1474 = vst.msk [vmem:[%s6130_s18] sm:$0xff] %vm337_vm1, %v1438_v35 }
  0xee   : > { %v1350_v41 = vpop.f32.mrf.mxu2 }
  0xef   : > { %v919_v43 = vpop.f32.mrf.mxu1  ;;  %v6328_v58 = vpop.f32.mrf.mxu3 }
  0xf0   : > { %v1006_v47 = vadd.f32 %v919_v43, %v533_v42  ;;  %v6308_v48 = vpop.f32.mrf.mxu0  ;;  %v1703_v42 = vrot.slane %v6382_v34, 1 }
  0xf1   : > { %v1077_v51 = vld [vmem:[%s6130_s18 + $0x8] sm:$0xff] }
  0xf2   : > { %v1439_v52 = vadd.f32 %v1350_v41, %v1077_v51  ;;  %1042 = vst.msk [vmem:[%s6130_s18 + $0x10] sm:$0xff] %vm337_vm1, %v1006_v47  ;;  %5125 = vmatmul.msk.bf16.gmra.mxu1 %vm337_vm1, %v783_v45  ;;  %v536_v45 = vld [vmem:[%s6130_s18 + $0x28] sm:$0xff]  ;;  %v796_v47 = vshll.u32 %v6378_v33, 16  ;;  %v1704_v50 = vsel %vm1244_vm2, %v1701_v62, %v1703_v42 }
  0xf3   : > { %5216 = vmatmul.msk.bf16.gmra.mxu2 %vm337_vm1, %v1265_v46  ;;  %v1510_v53 = vld [vmem:[%s6130_s18] sm:$0xff]  ;;  %5398 = vmatmul.msk.bf16.gmra.mxu0 %vm337_vm1, %v2209_v49  ;;  %v792_v46 = vshrl.u32 %v6319_v55, 16 }
  0xf4   : > { %v1871_v57 = vadd.f32 %v6238_v44, %v1510_v53  ;;  %1475 = vst.msk [vmem:[%s6130_s18 + $0x8] sm:$0xff] %vm337_vm1, %v1439_v52  ;;  %v788_v44 = vshll.u32 %v6319_v55, 16  ;;  %5309 = vmatmul.msk.bf16.gmra.mxu3 %vm337_vm1, %v1702_v3  ;;  %v6398_v49 = vld [vmem:[%s6016_s28 + $0x60] sm:$0xff]  ;;  %v798_v60 = vrot.slane %v796_v47, 1 }
  0xf6   : > { %v1353_v61 = vpop.f32.mrf.mxu2  ;;  %1907 = vst.msk [vmem:[%s6130_s18] sm:$0xff] %vm337_vm1, %v1871_v57  ;;  %v790_v13 = vrot.slane %v788_v44, 1 }
  0xf7   : > { %v921_v0 = vpop.f32.mrf.mxu1  ;;  %v6353_v18 = vpop.f32.mrf.mxu3 }
  0xf8   : > { %v1007_v4 = vadd.f32 %v921_v0, %v534_v63  ;;  %v6340_v5 = vpop.f32.mrf.mxu0  ;;  %v794_v59 = vor.u32 %v792_v46, %v790_v13 }
  0xf9   : > { %v1078_v9 = vld [vmem:[%s6130_s18 + $0x10] sm:$0xff] }
  0xfa   : > { %v1440_v10 = vadd.f32 %v1353_v61, %v1078_v9  ;;  %1043 = vst.msk [vmem:[%s6130_s18 + $0x18] sm:$0xff] %vm337_vm1, %v1007_v4  ;;  %v1268_v61 = vrot.slane %v6398_v49, 1  ;;  %v537_v4 = vld [vmem:[%s6130_s18 + $0x30] sm:$0xff] }
  0xfb   : > { %v1511_v11 = vld [vmem:[%s6130_s18 + $0x8] sm:$0xff] }
  0xfc   : > { %v1872_v16 = vadd.f32 %v6255_v54, %v1511_v11  ;;  %1476 = vst.msk [vmem:[%s6130_s18 + $0x10] sm:$0xff] %vm337_vm1, %v1440_v10  ;;  %v791_v54 = vsel %vm699_vm3, %v786_v12, %v790_v13  ;;  %v1269_v8 = vsel %vm1244_vm2, %v1266_v15, %v1268_v61  ;;  %v5858_v11 = vld [vmem:[%s6016_s28 + $0x70] sm:$0xff]  ;;  %v6446_v15 = vld [vmem:[%s6016_s28 + $0x68] sm:$0xff] }
  0xfd   : > { %v1943_v20 = vld [vmem:[%s6130_s18] sm:$0xff] }
  0xfe   : > { %v1355_v21 = vpop.f32.mrf.mxu2  ;;  %1908 = vst.msk [vmem:[%s6130_s18 + $0x8] sm:$0xff] %vm337_vm1, %v1872_v16  ;;  %v2438_v22 = vadd.f32 %v6273_v14, %v1943_v20  ;;  %v5857_v14 = vld [vmem:[%s6016_s28 + $0x68] sm:$0xff]  ;;  %v6450_v16 = vld [vmem:[%s6016_s28 + $0x78] sm:$0xff] }
  0xff   : > { %v924_v24 = vpop.f32.mrf.mxu1  ;;  %v6387_v36 = vpop.f32.mrf.mxu3  ;;  %v2220_v37 = vshrl.u32 %v5857_v14, 16  ;;  %v2223_v38 = vshll.u32 %v5857_v14, 16  ;;  %v804_v14 = vshll.u32 %v6446_v15, 16 }
 0x100   : > { %2474 = vst.msk [vmem:[%s6130_s18] sm:$0xff] %vm337_vm1, %v2438_v22  ;;  %v1008_v26 = vadd.f32 %v924_v24, %v535_v23  ;;  %v6366_v27 = vpop.f32.mrf.mxu0  ;;  %v2232_v22 = vshll.u32 %v5858_v11, 16 }
 0x101   : > { %v1079_v29 = vld [vmem:[%s6130_s18 + $0x18] sm:$0xff]  ;;  %v2225_v53 = vrot.slane %v2223_v38, 2 }
 0x102   : > { %v1441_v30 = vadd.f32 %v1355_v21, %v1079_v29  ;;  %1044 = vst.msk [vmem:[%s6130_s18 + $0x20] sm:$0xff] %vm337_vm1, %v1008_v26  ;;  %5126 = vmatmul.msk.bf16.gmra.mxu1 %vm337_vm1, %v791_v54  ;;  %v2229_v21 = vshrl.u32 %v5858_v11, 16  ;;  %v1705_v54 = vrot.slane %v6450_v16, 1  ;;  %v538_v26 = vld [vmem:[%s6130_s18 + $0x38] sm:$0xff]  ;;  %v6466_v29 = vld [vmem:[%s6016_s28 + $0x68] sm:$0xff] }
 0x103   : > { %5217 = vmatmul.msk.bf16.gmra.mxu2 %vm337_vm1, %v1267_v25  ;;  %v1512_v32 = vld [vmem:[%s6130_s18 + $0x10] sm:$0xff]  ;;  %5399 = vmatmul.msk.bf16.gmra.mxu0 %vm337_vm1, %v2218_v28  ;;  %v800_v28 = vshrl.u32 %v6378_v33, 16  ;;  %v2234_v33 = vrot.slane %v2232_v22, 2 }
 0x104   : > { %v1873_v35 = vadd.f32 %v6266_v7, %v1512_v32  ;;  %1477 = vst.msk [vmem:[%s6130_s18 + $0x18] sm:$0xff] %vm337_vm1, %v1441_v30  ;;  %5310 = vmatmul.msk.bf16.gmra.mxu3 %vm337_vm1, %v1704_v50  ;;  %v1706_v30 = vsel %vm1244_vm2, %v1703_v42, %v1705_v54  ;;  %v1270_v42 = vrot.slane %v6466_v29, 1 }
 0x105   : > { %v1944_v39 = vld [vmem:[%s6130_s18 + $0x8] sm:$0xff] }
 0x106   : > { %v1358_v41 = vpop.f32.mrf.mxu2  ;;  %1909 = vst.msk [vmem:[%s6130_s18 + $0x10] sm:$0xff] %vm337_vm1, %v1873_v35  ;;  %v2439_v43 = vadd.f32 %v6294_v31, %v1944_v39  ;;  %v2222_v31 = vrot.slane %v2220_v37, 1  ;;  %v2231_v35 = vrot.slane %v2229_v21, 1  ;;  %v802_v39 = vor.u32 %v800_v28, %v798_v60 }
 0x107   : > { %v926_v7 = vpop.f32.mrf.mxu1  ;;  %v6418_v0 = vpop.f32.mrf.mxu3 }
 0x108   : > { %2475 = vst.msk [vmem:[%s6130_s18 + $0x8] sm:$0xff] %vm337_vm1, %v2439_v43  ;;  %v1009_v51 = vadd.f32 %v926_v7, %v536_v45  ;;  %v6405_v52 = vpop.f32.mrf.mxu0  ;;  %v6416_v63 = vor.u32 %v2225_v53, %v2222_v31  ;;  %v6486_v45 = vor.u32 %v2234_v33, %v2231_v35  ;;  %v1271_v53 = vsel %vm1244_vm2, %v1268_v61, %v1270_v42  ;;  %v6516_v61 = vld [vmem:[%s6016_s28 + $0x70] sm:$0xff] }
 0x109   : > { %v1080_v56 = vld [vmem:[%s6130_s18 + $0x20] sm:$0xff]  ;;  %v812_v11 = vshll.u32 %v6516_v61, 16 }
 0x10a   : > { %v1442_v55 = vadd.f32 %v1358_v41, %v1080_v56  ;;  %1045 = vst.msk [vmem:[%s6130_s18 + $0x28] sm:$0xff] %vm337_vm1, %v1009_v51  ;;  %v806_v41 = vrot.slane %v804_v14, 1  ;;  %v539_v51 = vld [vmem:[%s6130_s18 + $0x40] sm:$0xff] }
 0x10b   : > { %v1513_v57 = vld [vmem:[%s6130_s18 + $0x18] sm:$0xff] }
 0x10c   : > { %v1874_v62 = vadd.f32 %v6286_v19, %v1513_v57  ;;  %1478 = vst.msk [vmem:[%s6130_s18 + $0x20] sm:$0xff] %vm337_vm1, %v1442_v55  ;;  %v799_v19 = vsel %vm699_vm3, %v794_v59, %v798_v60  ;;  %v5859_v57 = vld [vmem:[%s6016_s28 + $0x78] sm:$0xff] }
 0x10d   : > { %v1945_v1 = vld [vmem:[%s6130_s18 + $0x10] sm:$0xff] }
 0x10e   : > { %v1360_v44 = vpop.f32.mrf.mxu2  ;;  %1910 = vst.msk [vmem:[%s6130_s18 + $0x18] sm:$0xff] %vm337_vm1, %v1874_v62  ;;  %v2440_v3 = vadd.f32 %v6308_v48, %v1945_v1  ;;  %v2227_v48 = vsel %vm2111_vm4, %v6351_v17, %v6416_v63  ;;  %v6520_v62 = vld [vmem:[%s6016_s28 + $0x80] sm:$0xff] }
 0x10f   : > { %v929_v6 = vpop.f32.mrf.mxu1  ;;  %v6455_v20 = vpop.f32.mrf.mxu3 }
 0x110   : > { %2476 = vst.msk [vmem:[%s6130_s18 + $0x10] sm:$0xff] %vm337_vm1, %v2440_v3  ;;  %v1010_v9 = vadd.f32 %v929_v6, %v537_v4  ;;  %v6433_v10 = vpop.f32.mrf.mxu0  ;;  %v2241_v3 = vshll.u32 %v5859_v57, 16 }
 0x111   : > { %v1081_v12 = vld [vmem:[%s6130_s18 + $0x28] sm:$0xff] }
 0x112   : > { %v1443_v13 = vadd.f32 %v1360_v44, %v1081_v12  ;;  %1046 = vst.msk [vmem:[%s6130_s18 + $0x30] sm:$0xff] %vm337_vm1, %v1010_v9  ;;  %5127 = vmatmul.msk.bf16.gmra.mxu1 %vm337_vm1, %v799_v19  ;;  %v2238_v44 = vshrl.u32 %v5859_v57, 16  ;;  %v1707_v19 = vrot.slane %v6520_v62, 1  ;;  %v540_v9 = vld [vmem:[%s6130_s18 + $0x48] sm:$0xff]  ;;  %v6536_v12 = vld [vmem:[%s6016_s28 + $0x70] sm:$0xff] }
 0x113   : > { %5218 = vmatmul.msk.bf16.gmra.mxu2 %vm337_vm1, %v1269_v8  ;;  %v1514_v2 = vld [vmem:[%s6130_s18 + $0x20] sm:$0xff]  ;;  %5400 = vmatmul.msk.bf16.gmra.mxu0 %vm337_vm1, %v2227_v48  ;;  %v808_v48 = vshrl.u32 %v6446_v15, 16  ;;  %v2243_v15 = vrot.slane %v2241_v3, 2 }
 0x114   : > { %v1875_v17 = vadd.f32 %v6303_v40, %v1514_v2  ;;  %1479 = vst.msk [vmem:[%s6130_s18 + $0x28] sm:$0xff] %vm337_vm1, %v1443_v13  ;;  %5311 = vmatmul.msk.bf16.gmra.mxu3 %vm337_vm1, %v1706_v30  ;;  %v1708_v13 = vsel %vm1244_vm2, %v1705_v54, %v1707_v19  ;;  %v1272_v54 = vrot.slane %v6536_v12, 1 }
 0x115   : > { %v1946_v23 = vld [vmem:[%s6130_s18 + $0x18] sm:$0xff] }
 0x116   : > { %v1363_v24 = vpop.f32.mrf.mxu2  ;;  %1911 = vst.msk [vmem:[%s6130_s18 + $0x20] sm:$0xff] %vm337_vm1, %v1875_v17  ;;  %v2441_v25 = vadd.f32 %v6340_v5, %v1946_v23  ;;  %v2240_v17 = vrot.slane %v2238_v44, 1  ;;  %v810_v23 = vor.u32 %v808_v48, %v806_v41  ;;  %v1273_v33 = vsel %vm1244_vm2, %v1270_v42, %v1272_v54  ;;  %v6586_v42 = vld [vmem:[%s6016_s28 + $0x78] sm:$0xff] }
 0x117   : > { %v931_v40 = vpop.f32.mrf.mxu1  ;;  %v6488_v7 = vpop.f32.mrf.mxu3  ;;  %v820_v57 = vshll.u32 %v6586_v42, 16 }
 0x118   : > { %2477 = vst.msk [vmem:[%s6130_s18 + $0x18] sm:$0xff] %vm337_vm1, %v2441_v25  ;;  %v1011_v32 = vadd.f32 %v931_v40, %v538_v26  ;;  %v6475_v5 = vpop.f32.mrf.mxu0  ;;  %v6556_v26 = vor.u32 %v2243_v15, %v2240_v17 }
 0x119   : > { %v1082_v37 = vld [vmem:[%s6130_s18 + $0x30] sm:$0xff] }
 0x11a   : > { %v1444_v38 = vadd.f32 %v1363_v24, %v1082_v37  ;;  %1047 = vst.msk [vmem:[%s6130_s18 + $0x38] sm:$0xff] %vm337_vm1, %v1011_v32  ;;  %v814_v24 = vrot.slane %v812_v11, 1  ;;  %v541_v32 = vld [vmem:[%s6130_s18 + $0x50] sm:$0xff] }
 0x11b   : > { %v1515_v34 = vld [vmem:[%s6130_s18 + $0x28] sm:$0xff] }
 0x11c   : > { %v1876_v43 = vadd.f32 %v6328_v58, %v1515_v34  ;;  %1480 = vst.msk [vmem:[%s6130_s18 + $0x30] sm:$0xff] %vm337_vm1, %v1444_v38  ;;  %v807_v58 = vsel %vm699_vm3, %v802_v39, %v806_v41  ;;  %v5860_v34 = vld [vmem:[%s6016_s28 + $0x80] sm:$0xff] }
 0x11d   : > { %v1947_v46 = vld [vmem:[%s6130_s18 + $0x20] sm:$0xff] }
 0x11e   : > { %v1365_v47 = vpop.f32.mrf.mxu2  ;;  %1912 = vst.msk [vmem:[%s6130_s18 + $0x28] sm:$0xff] %vm337_vm1, %v1876_v43  ;;  %v2442_v50 = vadd.f32 %v6366_v27, %v1947_v46  ;;  %v2236_v27 = vsel %vm2111_vm4, %v6416_v63, %v6486_v45  ;;  %v6590_v43 = vld [vmem:[%s6016_s28 + $0x88] sm:$0xff] }
 0x11f   : > { %v934_v31 = vpop.f32.mrf.mxu1  ;;  %v6525_v1 = vpop.f32.mrf.mxu3 }
 0x120   : > { %2478 = vst.msk [vmem:[%s6130_s18 + $0x20] sm:$0xff] %vm337_vm1, %v2442_v50  ;;  %v1012_v56 = vadd.f32 %v934_v31, %v539_v51  ;;  %v6503_v55 = vpop.f32.mrf.mxu0  ;;  %v2250_v50 = vshll.u32 %v5860_v34, 16 }
 0x121   : > { %v1083_v59 = vld [vmem:[%s6130_s18 + $0x38] sm:$0xff] }
 0x122   : > { %v1445_v60 = vadd.f32 %v1365_v47, %v1083_v59  ;;  %1048 = vst.msk [vmem:[%s6130_s18 + $0x40] sm:$0xff] %vm337_vm1, %v1012_v56  ;;  %5128 = vmatmul.msk.bf16.gmra.mxu1 %vm337_vm1, %v807_v58  ;;  %v2247_v47 = vshrl.u32 %v5860_v34, 16  ;;  %v1709_v58 = vrot.slane %v6590_v43, 1  ;;  %v542_v56 = vld [vmem:[%s6130_s18 + $0x58] sm:$0xff] }
 0x123   : > { %5219 = vmatmul.msk.bf16.gmra.mxu2 %vm337_vm1, %v1271_v53  ;;  %v1516_v49 = vld [vmem:[%s6130_s18 + $0x30] sm:$0xff]  ;;  %5401 = vmatmul.msk.bf16.gmra.mxu0 %vm337_vm1, %v2236_v27  ;;  %v816_v27 = vshrl.u32 %v6516_v61, 16  ;;  %v6606_v59 = vld [vmem:[%s6016_s28 + $0x78] sm:$0xff]  ;;  %v2252_v61 = vrot.slane %v2250_v50, 2 }
 0x124   : > { %v1877_v63 = vadd.f32 %v6353_v18, %v1516_v49  ;;  %1481 = vst.msk [vmem:[%s6130_s18 + $0x38] sm:$0xff] %vm337_vm1, %v1445_v60  ;;  %5312 = vmatmul.msk.bf16.gmra.mxu3 %vm337_vm1, %v1708_v13  ;;  %v1710_v60 = vsel %vm1244_vm2, %v1707_v19, %v1709_v58  ;;  %v1274_v19 = vrot.slane %v6606_v59, 1 }
 0x125   : > { %v1948_v4 = vld [vmem:[%s6130_s18 + $0x28] sm:$0xff] }
 0x126   : > { %v1368_v6 = vpop.f32.mrf.mxu2  ;;  %1913 = vst.msk [vmem:[%s6130_s18 + $0x30] sm:$0xff] %vm337_vm1, %v1877_v63  ;;  %v2443_v8 = vadd.f32 %v6405_v52, %v1948_v4  ;;  %v2249_v63 = vrot.slane %v2247_v47, 1  ;;  %v818_v4 = vor.u32 %v816_v27, %v814_v24  ;;  %v1275_v15 = vsel %vm1244_vm2, %v1272_v54, %v1274_v19  ;;  %v6656_v54 = vld [vmem:[%s6016_s28 + $0x80] sm:$0xff] }
 0x127   : > { %v936_v18 = vpop.f32.mrf.mxu1  ;;  %v6558_v40 = vpop.f32.mrf.mxu3  ;;  %v828_v34 = vshll.u32 %v6656_v54, 16 }
 0x128   : > { %2479 = vst.msk [vmem:[%s6130_s18 + $0x28] sm:$0xff] %vm337_vm1, %v2443_v8  ;;  %v1013_v2 = vadd.f32 %v936_v18, %v540_v9  ;;  %v6545_v52 = vpop.f32.mrf.mxu0  ;;  %v6626_v9 = vor.u32 %v2252_v61, %v2249_v63 }
 0x129   : > { %v1084_v21 = vld [vmem:[%s6130_s18 + $0x40] sm:$0xff] }
 0x12a   : > { %v1446_v22 = vadd.f32 %v1368_v6, %v1084_v21  ;;  %1049 = vst.msk [vmem:[%s6130_s18 + $0x48] sm:$0xff] %vm337_vm1, %v1013_v2  ;;  %v822_v6 = vrot.slane %v820_v57, 1  ;;  %v543_v2 = vld [vmem:[%s6130_s18 + $0x60] sm:$0xff] }
 0x12b   : > { %v1517_v16 = vld [vmem:[%s6130_s18 + $0x38] sm:$0xff] }
 0x12c   : > { %v1878_v25 = vadd.f32 %v6387_v36, %v1517_v16  ;;  %1482 = vst.msk [vmem:[%s6130_s18 + $0x40] sm:$0xff] %vm337_vm1, %v1446_v22  ;;  %v815_v36 = vsel %vm699_vm3, %v810_v23, %v814_v24  ;;  %v5861_v16 = vld [vmem:[%s6016_s28 + $0x88] sm:$0xff] }
 0x12d   : > { %v1949_v28 = vld [vmem:[%s6130_s18 + $0x30] sm:$0xff] }
 0x12e   : > { %v1370_v14 = vpop.f32.mrf.mxu2  ;;  %1914 = vst.msk [vmem:[%s6130_s18 + $0x38] sm:$0xff] %vm337_vm1, %v1878_v25  ;;  %v2444_v30 = vadd.f32 %v6433_v10, %v1949_v28  ;;  %v2245_v10 = vsel %vm2111_vm4, %v6486_v45, %v6556_v26  ;;  %v6660_v25 = vld [vmem:[%s6016_s28 + $0x90] sm:$0xff] }
 0x12f   : > { %v939_v35 = vpop.f32.mrf.mxu1  ;;  %v6595_v46 = vpop.f32.mrf.mxu3 }
 0x130   : > { %2480 = vst.msk [vmem:[%s6130_s18 + $0x30] sm:$0xff] %vm337_vm1, %v2444_v30  ;;  %v1014_v37 = vadd.f32 %v939_v35, %v541_v32  ;;  %v6573_v38 = vpop.f32.mrf.mxu0  ;;  %v2259_v30 = vshll.u32 %v5861_v16, 16 }
 0x131   : > { %v1085_v39 = vld [vmem:[%s6130_s18 + $0x48] sm:$0xff] }
 0x132   : > { %v1447_v41 = vadd.f32 %v1370_v14, %v1085_v39  ;;  %1050 = vst.msk [vmem:[%s6130_s18 + $0x50] sm:$0xff] %vm337_vm1, %v1014_v37  ;;  %5129 = vmatmul.msk.bf16.gmra.mxu1 %vm337_vm1, %v815_v36  ;;  %v2256_v14 = vshrl.u32 %v5861_v16, 16  ;;  %v1711_v36 = vrot.slane %v6660_v25, 1  ;;  %v544_v37 = vld [vmem:[%s6130_s18 + $0x68] sm:$0xff]  ;;  %v6676_v39 = vld [vmem:[%s6016_s28 + $0x80] sm:$0xff]  ;;  %v546_v16 = vld [vmem:[%s6130_s18 + $0x78] sm:$0xff] }
 0x133   : > { %5220 = vmatmul.msk.bf16.gmra.mxu2 %vm337_vm1, %v1273_v33  ;;  %v1518_v29 = vld [vmem:[%s6130_s18 + $0x40] sm:$0xff]  ;;  %5402 = vmatmul.msk.bf16.gmra.mxu0 %vm337_vm1, %v2245_v10  ;;  %v824_v10 = vshrl.u32 %v6586_v42, 16  ;;  %v2261_v42 = vrot.slane %v2259_v30, 2  ;;  %v603_v25 = vld [vmem:[%s6016_s28 + $0x90] sm:$0x1] }
 0x134   : > { %v1879_v45 = vadd.f32 %v6418_v0, %v1518_v29  ;;  %1483 = vst.msk [vmem:[%s6130_s18 + $0x48] sm:$0xff] %vm337_vm1, %v1447_v41  ;;  %5313 = vmatmul.msk.bf16.gmra.mxu3 %vm337_vm1, %v1710_v60  ;;  %v1712_v41 = vsel %vm1244_vm2, %v1709_v58, %v1711_v36  ;;  %v1276_v58 = vrot.slane %v6676_v39, 1 }
 0x135   : > { %v1950_v51 = vld [vmem:[%s6130_s18 + $0x38] sm:$0xff] }
 0x136   : > { %v1373_v31 = vpop.f32.mrf.mxu2  ;;  %1915 = vst.msk [vmem:[%s6130_s18 + $0x40] sm:$0xff] %vm337_vm1, %v1879_v45  ;;  %v2445_v53 = vadd.f32 %v6475_v5, %v1950_v51  ;;  %v2258_v45 = vrot.slane %v2256_v14, 1  ;;  %v826_v51 = vor.u32 %v824_v10, %v822_v6  ;;  %v1277_v61 = vsel %vm1244_vm2, %v1274_v19, %v1276_v58  ;;  %v6727_v19 = vld [vmem:[%s6016_s28 + $0x88] sm:$0xff] }
 0x137   : > { %v941_v0 = vpop.f32.mrf.mxu1  ;;  %v6628_v18 = vpop.f32.mrf.mxu3 }
 0x138   : > { %2481 = vst.msk [vmem:[%s6130_s18 + $0x38] sm:$0xff] %vm337_vm1, %v2445_v53  ;;  %v1015_v49 = vadd.f32 %v941_v0, %v542_v56  ;;  %v6615_v5 = vpop.f32.mrf.mxu0  ;;  %v6696_v56 = vor.u32 %v2261_v42, %v2258_v45  ;;  %v679_v42 = vunpack.c.l.b16 %v603_v25 }
 0x139   : > { %v1086_v44 = vld [vmem:[%s6130_s18 + $0x50] sm:$0xff] }
 0x13a   : > { %v1448_v3 = vadd.f32 %v1373_v31, %v1086_v44  ;;  %1051 = vst.msk [vmem:[%s6130_s18 + $0x58] sm:$0xff] %vm337_vm1, %v1015_v49  ;;  %v830_v31 = vrot.slane %v828_v34, 1  ;;  %v545_v49 = vld [vmem:[%s6130_s18 + $0x70] sm:$0xff] }
 0x13b   : > { %v1519_v62 = vld [vmem:[%s6130_s18 + $0x48] sm:$0xff] }
 0x13c   : > { %v1880_v8 = vadd.f32 %v6455_v20, %v1519_v62  ;;  %1484 = vst.msk [vmem:[%s6130_s18 + $0x50] sm:$0xff] %vm337_vm1, %v1448_v3  ;;  %v823_v20 = vsel %vm699_vm3, %v818_v4, %v822_v6  ;;  %v1582_v62 = vld [vmem:[%s6016_s28 + $0x98] sm:$0x1]  ;;  %v5862_v4 = vld [vmem:[%s6016_s28 + $0x90] sm:$0xff] }
 0x13d   : > { %v1951_v48 = vld [vmem:[%s6130_s18 + $0x40] sm:$0xff] }
 0x13e   : > { %v1375_v11 = vpop.f32.mrf.mxu2  ;;  %1916 = vst.msk [vmem:[%s6130_s18 + $0x48] sm:$0xff] %vm337_vm1, %v1880_v8  ;;  %v2446_v13 = vadd.f32 %v6503_v55, %v1951_v48  ;;  %v2254_v55 = vsel %vm2111_vm4, %v6556_v26, %v6626_v9  ;;  %v1658_v8 = vunpack.c.l.b16 %v1582_v62 }
 0x13f   : > { %v944_v17 = vpop.f32.mrf.mxu1  ;;  %v6665_v28 = vpop.f32.mrf.mxu3 }
 0x140   : > { %2482 = vst.msk [vmem:[%s6130_s18 + $0x40] sm:$0xff] %vm337_vm1, %v2446_v13  ;;  %v1016_v21 = vadd.f32 %v944_v17, %v543_v2  ;;  %v6643_v22 = vpop.f32.mrf.mxu0  ;;  %v2265_v2 = vshrl.u32 %v5862_v4, 16  ;;  %v2268_v17 = vshll.u32 %v5862_v4, 16 }
 0x141   : > { %v1087_v23 = vld [vmem:[%s6130_s18 + $0x58] sm:$0xff] }
 0x142   : > { %v1449_v24 = vadd.f32 %v1375_v11, %v1087_v23  ;;  %1052 = vst.msk [vmem:[%s6130_s18 + $0x60] sm:$0xff] %vm337_vm1, %v1016_v21  ;;  %5130 = vmatmul.msk.bf16.gmra.mxu1 %vm337_vm1, %v823_v20  ;;  %v832_v23 = vshrl.u32 %v6656_v54, 16 }
 0x143   : > { %5221 = vmatmul.msk.bf16.gmra.mxu2 %vm337_vm1, %v1275_v15  ;;  %v1520_v12 = vld [vmem:[%s6130_s18 + $0x50] sm:$0xff]  ;;  %5403 = vmatmul.msk.bf16.gmra.mxu0 %vm337_vm1, %v2254_v55 }
 0x144   : > { %v1881_v26 = vadd.f32 %v6488_v7, %v1520_v12  ;;  %1485 = vst.msk [vmem:[%s6130_s18 + $0x58] sm:$0xff] %vm337_vm1, %v1449_v24  ;;  %5314 = vmatmul.msk.bf16.gmra.mxu3 %vm337_vm1, %v1712_v41  ;;  %v836_v24 = vshll.u32 %v6727_v19, 16  ;;  %v6743_v12 = vld [vmem:[%s6016_s28 + $0x88] sm:$0xff] }
 0x145   : > { %v1952_v32 = vld [vmem:[%s6130_s18 + $0x48] sm:$0xff] }
 0x146   : > { %v1378_v35 = vpop.f32.mrf.mxu2  ;;  %1917 = vst.msk [vmem:[%s6130_s18 + $0x50] sm:$0xff] %vm337_vm1, %v1881_v26  ;;  %v2447_v33 = vadd.f32 %v6545_v52, %v1952_v32  ;;  %v2270_v32 = vrot.slane %v2268_v17, 2 }
 0x147   : > { %v946_v7 = vpop.f32.mrf.mxu1  ;;  %v6698_v0 = vpop.f32.mrf.mxu3 }
 0x148   : > { %2483 = vst.msk [vmem:[%s6130_s18 + $0x48] sm:$0xff] %vm337_vm1, %v2447_v33  ;;  %v1017_v29 = vadd.f32 %v946_v7, %v544_v37  ;;  %v6685_v52 = vpop.f32.mrf.mxu0  ;;  %v834_v33 = vor.u32 %v832_v23, %v830_v31  ;;  %v6758_v37 = vrot.slane %v836_v24, 1  ;;  %v1278_v7 = vrot.slane %v6743_v12, 1 }
 0x149   : > { %v1088_v47 = vld [vmem:[%s6130_s18 + $0x60] sm:$0xff] }
 0x14a   : > { %v1450_v50 = vadd.f32 %v1378_v35, %v1088_v47  ;;  %1053 = vst.msk [vmem:[%s6130_s18 + $0x68] sm:$0xff] %vm337_vm1, %v1017_v29 }
 0x14b   : > { %v1521_v43 = vld [vmem:[%s6130_s18 + $0x58] sm:$0xff] }
 0x14c   : > { %v1882_v53 = vadd.f32 %v6525_v1, %v1521_v43  ;;  %1486 = vst.msk [vmem:[%s6130_s18 + $0x60] sm:$0xff] %vm337_vm1, %v1450_v50  ;;  %v831_v1 = vsel %vm699_vm3, %v826_v51, %v830_v31  ;;  %v2015_v50 = vld [vmem:[%s6016_s28 + $0x98] sm:$0x3]  ;;  %v839_v51 = vsel %vm699_vm3, %v834_v33, %v6758_v37  ;;  %v1279_v31 = vsel %vm1244_vm2, %v1276_v58, %v1278_v7 }
 0x14d   : > { %v1953_v27 = vld [vmem:[%s6130_s18 + $0x50] sm:$0xff] }
 0x14e   : > { %v1380_v57 = vpop.f32.mrf.mxu2  ;;  %1918 = vst.msk [vmem:[%s6130_s18 + $0x58] sm:$0xff] %vm337_vm1, %v1882_v53  ;;  %v2448_v60 = vadd.f32 %v6573_v38, %v1953_v27  ;;  %v2263_v38 = vsel %vm2111_vm4, %v6626_v9, %v6696_v56  ;;  %v1677_v9 = vpack.c.b16 %v1658_v8, %v1658_v8  ;;  %v2091_v53 = vunpack.c.l.b16 %v2015_v50  ;;  %v5592_v27 = vld [vmem:[%s6016_s28 + $0x10] sm:$0xc] }
 0x14f   : > { %v949_v63 = vpop.f32.mrf.mxu1  ;;  %v6733_v13 = vpop.f32.mrf.mxu3 }
 0x150   : > { %2484 = vst.msk [vmem:[%s6130_s18 + $0x50] sm:$0xff] %vm337_vm1, %v2448_v60  ;;  %v1018_v44 = vadd.f32 %v949_v63, %v545_v49  ;;  %v6713_v3 = vpop.f32.mrf.mxu0  ;;  %v1713_v21 = vrot.slane %v1677_v9, 1  ;;  %v1148_v60 = vld [vmem:[%s6016_s28 + $0x90] sm:$0x1]  ;;  %v2110_v58 = vpack.c.b16 %v2091_v53, %v2091_v53 }
 0x151   : > { %v1089_v6 = vld [vmem:[%s6130_s18 + $0x68] sm:$0xff]  ;;  %v549_v53 = vld [vmem:[%s6130_s18 + $0x90] sm:$0xff] }
 0x152   : > { %v1451_v48 = vadd.f32 %v1380_v57, %v1089_v6  ;;  %1054 = vst.msk [vmem:[%s6130_s18 + $0x70] sm:$0xff] %vm337_vm1, %v1018_v44  ;;  %5131 = vmatmul.msk.bf16.gmra.mxu1 %vm337_vm1, %v831_v1  ;;  %v1714_v26 = vsel %vm1244_vm2, %v1711_v36, %v1713_v21  ;;  %v5899_v57 = vld [vmem:[%s6016_s28 + $0x10] sm:$0xf0]  ;;  %v5900_v1 = vld [vmem:[%s6016_s28 + $0x18] sm:$0xff]  ;;  %v698_v44 = vpack.c.b16 %v679_v42, %v679_v42 }
 0x153   : > { %5222 = vmatmul.msk.bf16.gmra.mxu2 %vm337_vm1, %v1277_v61  ;;  %v1522_v59 = vld [vmem:[%s6130_s18 + $0x60] sm:$0xff]  ;;  %5404 = vmatmul.msk.bf16.gmra.mxu0 %vm337_vm1, %v2263_v38  ;;  %v5593_v61 = vor.u32 %v5899_v57, %v5592_v27  ;;  %v3555_v6 = vshrl.u32 %v5900_v1, 16  ;;  %v3558_v9 = vshll.u32 %v5900_v1, 16 }
 0x154   : > { %v1883_v11 = vadd.f32 %v6558_v40, %v1522_v59  ;;  %1487 = vst.msk [vmem:[%s6130_s18 + $0x68] sm:$0xff] %vm337_vm1, %v1451_v48  ;;  %5315 = vmatmul.msk.bf16.gmra.mxu3 %vm337_vm1, %v1714_v26  ;;  %v2274_v48 = vshrl.u32 %v2110_v58, 16  ;;  %v2277_v59 = vshll.u32 %v2110_v58, 16  ;;  %v840_v26 = vshrl.u32 %v6727_v19, 16  ;;  %v5901_v57 = vld [vmem:[%s6016_s28 + $0x20] sm:$0xff] }
 0x155   : > { %v1954_v20 = vld [vmem:[%s6130_s18 + $0x58] sm:$0xff]  ;;  %v3547_v62 = vshrl.u32 %v5593_v61, 16  ;;  %v3550_v4 = vshll.u32 %v5593_v61, 16  ;;  %v3564_v1 = vshrl.u32 %v5901_v57, 16  ;;  %v3567_v61 = vshll.u32 %v5901_v57, 16 }
 0x156   : > { %v1383_v15 = vpop.f32.mrf.mxu2  ;;  %1919 = vst.msk [vmem:[%s6130_s18 + $0x60] sm:$0xff] %vm337_vm1, %v1883_v11  ;;  %v2449_v55 = vadd.f32 %v6615_v5, %v1954_v20  ;;  %v2267_v5 = vrot.slane %v2265_v2, 1  ;;  %v2279_v25 = vrot.slane %v2277_v59, 2  ;;  %v5683_v59 = vld [vmem:[%s6016_s28 + $0x10] sm:$0x8] }
 0x157   : > { %v951_v40 = vpop.f32.mrf.mxu1  ;;  %v6766_v41 = vpop.f32.mrf.mxu3  ;;  %v3549_v17 = vrot.slane %v3547_v62, 2  ;;  %v3552_v20 = vrot.slane %v3550_v4, 3  ;;  %v3569_v58 = vrot.slane %v3567_v61, 3  ;;  %v5501_v62 = vld [vmem:[%s6016_s28 + $0x10] sm:$0xc] }
 0x158   : > { %2485 = vst.msk [vmem:[%s6130_s18 + $0x58] sm:$0xff] %vm337_vm1, %v2449_v55  ;;  %v1019_v14 = vadd.f32 %v951_v40, %v546_v16  ;;  %v6750_v30 = vpop.f32.mrf.mxu0  ;;  %v6764_v34 = vor.u32 %v2270_v32, %v2267_v5  ;;  %v3560_v16 = vrot.slane %v3558_v9, 3  ;;  %v5881_v4 = vld [vmem:[%s6016_s28 + $0x10] sm:$0xf0] }
 0x159   : > { %v1090_v35 = vld [vmem:[%s6130_s18 + $0x70] sm:$0xff]  ;;  %v3553_v23 = vor.u32 %v3552_v20, %v3549_v17 }
 0x15a   : > { %v1452_v54 = vadd.f32 %v1383_v15, %v1090_v35  ;;  %1055 = vst.msk [vmem:[%s6130_s18 + $0x78] sm:$0xff] %vm337_vm1, %v1019_v14  ;;  %v2272_v63 = vsel %vm2111_vm4, %v6696_v56, %v6764_v34  ;;  %v1224_v56 = vunpack.c.l.b16 %v1148_v60  ;;  %v3557_v15 = vrot.slane %v3555_v6, 2  ;;  %v5917_v9 = vld [vmem:[%s6016_s28 + $0x10] sm:$0xf0] }
 0x15b   : > { %v1523_v36 = vld [vmem:[%s6130_s18 + $0x68] sm:$0xff]  ;;  %v844_v14 = vshll.u32 %v698_v44, 16  ;;  %v6871_v20 = vld [vmem:[%s6016_s28 + $0x10] sm:$0xff] }
 0x15c   : > { %v1884_v10 = vadd.f32 %v6595_v46, %v1523_v36  ;;  %1488 = vst.msk [vmem:[%s6130_s18 + $0x70] sm:$0xff] %vm337_vm1, %v1452_v54  ;;  %v547_v46 = vld [vmem:[%s6130_s18 + $0x80] sm:$0xff]  ;;  %v1243_v5 = vpack.c.b16 %v1224_v56, %v1224_v56  ;;  %v6810_v32 = vor.u32 %v3560_v16, %v3557_v15  ;;  %v5863_v44 = vld [vmem:[%s6016_s28 + $0x8] sm:$0xf0] }
 0x15d   : > { %v1955_v29 = vld [vmem:[%s6130_s18 + $0x60] sm:$0xff] }
 0x15e   : > { %v1385_v45 = vpop.f32.mrf.mxu2  ;;  %1920 = vst.msk [vmem:[%s6130_s18 + $0x68] sm:$0xff] %vm337_vm1, %v1884_v10  ;;  %v2450_v47 = vadd.f32 %v6643_v22, %v1955_v29  ;;  %v3562_v33 = vsel %vm3545_vm5, %v3553_v23, %v6810_v32  ;;  %v842_v29 = vor.u32 %v840_v26, %v6758_v37  ;;  %v1280_v42 = vrot.slane %v1243_v5, 1 }
 0x15f   : > { %v954_v43 = vpop.f32.mrf.mxu1  ;;  %v6802_v2 = vpop.f32.mrf.mxu3 }
 0x160   : > { %2486 = vst.msk [vmem:[%s6130_s18 + $0x60] sm:$0xff] %vm337_vm1, %v2450_v47  ;;  %v1020_v22 = vadd.f32 %v954_v43, %v547_v46  ;;  %v6786_v49 = vpop.f32.mrf.mxu0 }
 0x161   : > { %v1091_v39 = vld [vmem:[%s6130_s18 + $0x78] sm:$0xff] }
 0x162   : > { %v1453_v38 = vadd.f32 %v1385_v45, %v1091_v39  ;;  %1056 = vst.msk [vmem:[%s6130_s18 + $0x80] sm:$0xff] %vm337_vm1, %v1020_v22  ;;  %5132 = vmatmul.msk.bf16.gmra.mxu1 %vm337_vm1, %v839_v51  ;;  %v846_v45 = vrot.slane %v844_v14, 1 }
 0x163   : > { %5223 = vmatmul.msk.bf16.gmra.mxu2 %vm337_vm1, %v1279_v31  ;;  %v1524_v8 = vld [vmem:[%s6130_s18 + $0x70] sm:$0xff]  ;;  %5405 = vmatmul.msk.bf16.gmra.mxu0 %vm337_vm1, %v2272_v63 }
 0x164   : > { %v1885_v11 = vadd.f32 %v6628_v18, %v1524_v8  ;;  %1489 = vst.msk [vmem:[%s6130_s18 + $0x78] sm:$0xff] %vm337_vm1, %v1453_v38  ;;  %v548_v18 = vld [vmem:[%s6130_s18 + $0x88] sm:$0xff]  ;;  %5662 = vmatmul.msk.bf16.vlgmr.msra.gmra.mxu3 %vm337_vm1, %v3562_v33  ;;  %v847_v27 = vsel %vm699_vm3, %v842_v29, %v846_v45 }
 0x165   : > { %v1956_v21 = vld [vmem:[%s6130_s18 + $0x68] sm:$0xff] }
 0x166   : > { %v1388_v55 = vpop.f32.mrf.mxu2  ;;  %1921 = vst.msk [vmem:[%s6130_s18 + $0x70] sm:$0xff] %vm337_vm1, %v1885_v11  ;;  %v2451_v40 = vadd.f32 %v6685_v52, %v1956_v21  ;;  %v2276_v52 = vrot.slane %v2274_v48, 1  ;;  %v550_v11 = vld [vmem:[%s6130_s18 + $0x98] sm:$0xff] }
 0x167   : > { %v956_v24 = vpop.f32.mrf.mxu1  ;;  %v6827_v46 = vpop.f32.mrf.mxu3  ;;  %v6874_v21 = vld [vmem:[%s6016_s28 + $0x18] sm:$0xff] }
 0x168   : > { %2487 = vst.msk [vmem:[%s6130_s18 + $0x68] sm:$0xff] %vm337_vm1, %v2451_v40  ;;  %v1021_v35 = vadd.f32 %v956_v24, %v548_v18  ;;  %v6814_v54 = vpop.f32.mrf.mxu0  ;;  %v2280_v50 = vor.u32 %v2279_v25, %v2276_v52  ;;  %v5684_v18 = vor.u32 %v5917_v9, %v5683_v59  ;;  %v3113_v52 = vrot.slane %v6874_v21, 2 }
 0x169   : > { %v1092_v36 = vld [vmem:[%s6130_s18 + $0x80] sm:$0xff] }
 0x16a   : > { %v1454_v19 = vadd.f32 %v1388_v55, %v1092_v36  ;;  %1057 = vst.msk [vmem:[%s6130_s18 + $0x88] sm:$0xff] %vm337_vm1, %v1021_v35  ;;  %v5502_v55 = vor.u32 %v5881_v4, %v5501_v62  ;;  %v4113_v36 = vrot.slane %v5684_v18, 3 }
 0x16b   : > { %v1525_v10 = vld [vmem:[%s6130_s18 + $0x78] sm:$0xff] }
 0x16c   : > { %v1886_v47 = vadd.f32 %v6665_v28, %v1525_v10  ;;  %1490 = vst.msk [vmem:[%s6130_s18 + $0x80] sm:$0xff] %vm337_vm1, %v1454_v19  ;;  %v1281_v28 = vsel %vm1244_vm2, %v1278_v7, %v1280_v42  ;;  %v5410_v7 = vld [vmem:[%s6016_s28 + $0x8] sm:$0xc]  ;;  %v3112_v35 = vrot.slane %v5502_v55, 2  ;;  %v551_v42 = vld [vmem:[%s6130_s18 + $0xa0] sm:$0xff] }
 0x16d   : > { %v1957_v43 = vld [vmem:[%s6130_s18 + $0x70] sm:$0xff]  ;;  %v5411_v15 = vor.u32 %v5863_v44, %v5410_v7  ;;  %v552_v44 = vld [vmem:[%s6130_s18 + $0xa8] sm:$0xff] }
 0x16e   : > { %v1390_v51 = vpop.f32.mrf.mxu2  ;;  %1922 = vst.msk [vmem:[%s6130_s18 + $0x78] sm:$0xff] %vm337_vm1, %v1886_v47  ;;  %v2452_v31 = vadd.f32 %v6713_v3, %v1957_v43  ;;  %v2281_v3 = vsel %vm2111_vm4, %v6764_v34, %v2280_v50  ;;  %v3566_v34 = vrot.slane %v3564_v1, 2  ;;  %v3114_v50 = vsel %vm2678_vm6, %v3112_v35, %v3113_v52  ;;  %v5902_v43 = vld [vmem:[%s6016_s28 + $0x28] sm:$0xff] }
 0x16f   : > { %v959_v37 = vpop.f32.mrf.mxu1  ;;  %v6859_v6 = vpop.f32.mrf.mxu3  ;;  %v2679_v5 = vrot.slane %v5411_v15, 2 }
 0x170   : > { %2488 = vst.msk [vmem:[%s6130_s18 + $0x70] sm:$0xff] %vm337_vm1, %v2452_v31  ;;  %v1022_v22 = vadd.f32 %v959_v37, %v549_v53  ;;  %v6841_v60 = vpop.f32.mrf.mxu0  ;;  %v6862_v48 = vor.u32 %v3569_v58, %v3566_v34  ;;  %v3573_v37 = vshrl.u32 %v5902_v43, 16  ;;  %v6941_v58 = vld [vmem:[%s6016_s28 + $0x20] sm:$0xff] }
 0x171   : > { %v1093_v63 = vld [vmem:[%s6130_s18 + $0x88] sm:$0xff]  ;;  %v3115_v9 = vrot.slane %v6941_v58, 2 }
 0x172   : > { %v1455_v12 = vadd.f32 %v1390_v51, %v1093_v63  ;;  %1058 = vst.msk [vmem:[%s6130_s18 + $0x90] sm:$0xff] %vm337_vm1, %v1022_v22  ;;  %5133 = vmatmul.msk.bf16.gmra.mxu1 %vm337_vm1, %v847_v27  ;;  %v3571_v16 = vsel %vm3545_vm5, %v6810_v32, %v6862_v48  ;;  %v2680_v32 = vrot.slane %v6871_v20, 2  ;;  %v3576_v27 = vshll.u32 %v5902_v43, 16  ;;  %v7014_v43 = vld [vmem:[%s6016_s28 + $0x20] sm:$0xff] }
 0x173   : > { %5224 = vmatmul.msk.bf16.gmra.mxu2 %vm337_vm1, %v1281_v28  ;;  %v1526_v39 = vld [vmem:[%s6130_s18 + $0x80] sm:$0xff]  ;;  %5406 = vmatmul.msk.bf16.gmra.mxu0 %vm337_vm1, %v2281_v3  ;;  %v3575_v22 = vrot.slane %v3573_v37, 2 }
 0x174   : > { %v1887_v38 = vadd.f32 %v6698_v0, %v1526_v39  ;;  %1491 = vst.msk [vmem:[%s6130_s18 + $0x88] sm:$0xff] %vm337_vm1, %v1455_v12  ;;  %5663 = vmatmul.msk.bf16.gmra.mxu3 %vm337_vm1, %v3571_v16  ;;  %v2681_v47 = vsel %vm2678_vm6, %v2679_v5, %v2680_v32  ;;  %v3578_v3 = vrot.slane %v3576_v27, 3  ;;  %v7027_v27 = vld [vmem:[%s6016_s28 + $0x28] sm:$0xff] }
 0x175   : > { %v1958_v8 = vld [vmem:[%s6130_s18 + $0x78] sm:$0xff] }
 0x176   : > { %v1393_v56 = vpop.f32.mrf.mxu2  ;;  %1923 = vst.msk [vmem:[%s6130_s18 + $0x80] sm:$0xff] %vm337_vm1, %v1887_v38  ;;  %v2453_v0 = vadd.f32 %v6750_v30, %v1958_v8  ;;  %v6884_v30 = vld [vmem:[%s6016_s28 + $0x18] sm:$0xff]  ;;  %v6931_v7 = vor.u32 %v3578_v3, %v3575_v22  ;;  %v6951_v8 = vld [vmem:[%s6016_s28 + $0x20] sm:$0xff]  ;;  %v2684_v22 = vrot.slane %v7014_v43, 2 }
 0x177   : > { %v961_v17 = vpop.f32.mrf.mxu1  ;;  %v4114_v33 = vrot.slane %v6884_v30, 3  ;;  %v6897_v19 = vpop.f32.mrf.mxu3 }
 0x178   : > { %2489 = vst.msk [vmem:[%s6130_s18 + $0x78] sm:$0xff] %vm337_vm1, %v2453_v0  ;;  %v1023_v40 = vadd.f32 %v961_v17, %v550_v11  ;;  %v6881_v23 = vpop.f32.mrf.mxu0  ;;  %v3580_v38 = vsel %vm3545_vm5, %v6862_v48, %v6931_v7  ;;  %v4116_v11 = vrot.slane %v6951_v8, 3 }
 0x179   : > { %v1094_v24 = vld [vmem:[%s6130_s18 + $0x90] sm:$0xff] }
 0x17a   : > { %v1456_v26 = vadd.f32 %v1393_v56, %v1094_v24  ;;  %1059 = vst.msk [vmem:[%s6130_s18 + $0x98] sm:$0xff] %vm337_vm1, %v1023_v40  ;;  %v553_v40 = vld [vmem:[%s6130_s18 + $0xb0] sm:$0xff]  ;;  %v3116_v24 = vsel %vm2678_vm6, %v3113_v52, %v3115_v9  ;;  %v4117_v20 = vsel %vm4112_vm7, %v4114_v33, %v4116_v11 }
 0x17b   : > { %v1527_v14 = vld [vmem:[%s6130_s18 + $0x88] sm:$0xff] }
 0x17c   : > { %v1888_v25 = vadd.f32 %v6733_v13, %v1527_v14  ;;  %1492 = vst.msk [vmem:[%s6130_s18 + $0x90] sm:$0xff] %vm337_vm1, %v1456_v26  ;;  %v5903_v26 = vld [vmem:[%s6016_s28 + $0x30] sm:$0xff] }
 0x17d   : > { %v1959_v10 = vld [vmem:[%s6130_s18 + $0x80] sm:$0xff]  ;;  %v3585_v35 = vshll.u32 %v5903_v26, 16 }
 0x17e   : > { %v1395_v29 = vpop.f32.mrf.mxu2  ;;  %1924 = vst.msk [vmem:[%s6130_s18 + $0x88] sm:$0xff] %vm337_vm1, %v1888_v25  ;;  %v2454_v45 = vadd.f32 %v6786_v49, %v1959_v10  ;;  %v4115_v49 = vsel %vm4112_vm7, %v4113_v36, %v4114_v33  ;;  %v5960_v10 = vmov 0  }
 0x17f   : > { %v964_v13 = vpop.f32.mrf.mxu1  ;;  %v6928_v1 = vpop.f32.mrf.mxu3  ;;  %v3587_v30 = vrot.slane %v3585_v35, 3  ;;  %5949 = vset.pattern.permute.xlu0 %v5960_v10  ;;  %5950 = vset.pattern.permute.xlu1 %v5960_v10 }
 0x180   : > { %2490 = vst.msk [vmem:[%s6130_s18 + $0x80] sm:$0xff] %vm337_vm1, %v2454_v45  ;;  %v1024_v51 = vadd.f32 %v964_v13, %v551_v42  ;;  %v6913_v31 = vpop.f32.mrf.mxu0  ;;  %5951 = vset.pattern.permute.xlu2 %v5960_v10 }
 0x181   : > { %v1095_v53 = vld [vmem:[%s6130_s18 + $0x98] sm:$0xff] }
 0x182   : > { %v1457_v28 = vadd.f32 %v1395_v29, %v1095_v53  ;;  %1060 = vst.msk [vmem:[%s6130_s18 + $0xa0] sm:$0xff] %vm337_vm1, %v1024_v51  ;;  %5480 = vmatmul.msk.bf16.vlgmr.msra.gmra.mxu1 %vm337_vm1, %v2681_v47  ;;  %v4414_v29 = vld [vmem:[%s8673_s2] sm:$0xff]  ;;  %v554_v47 = vld [vmem:[%s6130_s18 + $0xb8] sm:$0xff]  ;;  %v7017_v51 = vld [vmem:[%s6016_s28 + $0x28] sm:$0xff] }
 0x183   : > { %5571 = vmatmul.msk.bf16.vlgmr.msra.gmra.mxu2 %vm337_vm1, %v3114_v50  ;;  %v1528_v57 = vld [vmem:[%s6130_s18 + $0x90] sm:$0xff]  ;;  %5753 = vmatmul.msk.bf16.vlgmr.msra.gmra.mxu0 %vm337_vm1, %v4115_v49  ;;  %v3117_v3 = vrot.slane %v7017_v51, 2 }
 0x184   : > { %v1889_v63 = vadd.f32 %v6766_v41, %v1528_v57  ;;  %1493 = vst.msk [vmem:[%s6130_s18 + $0x98] sm:$0xff] %vm337_vm1, %v1457_v28  ;;  %v6938_v41 = vld [vmem:[%s6016_s28 + $0x18] sm:$0xff]  ;;  %5664 = vmatmul.msk.bf16.gmra.mxu3 %vm337_vm1, %v3580_v38  ;;  %4452 = vperm.xlu0 %5949, %v4414_v29  }
 0x185   : > { %v1960_v61 = vld [vmem:[%s6130_s18 + $0x88] sm:$0xff]  ;;  %v2682_v48 = vrot.slane %v6938_v41, 2 }
 0x186   : > { %v1398_v12 = vpop.f32.mrf.mxu2  ;;  %1925 = vst.msk [vmem:[%s6130_s18 + $0x90] sm:$0xff] %vm337_vm1, %v1889_v63  ;;  %v2455_v39 = vadd.f32 %v6814_v54, %v1960_v61  ;;  %v4118_v61 = vrot.slane %v7027_v27, 3 }
 0x187   : > { %v966_v34 = vpop.f32.mrf.mxu1  ;;  %v6964_v17 = vpop.f32.mrf.mxu3 }
 0x188   : > { %2491 = vst.msk [vmem:[%s6130_s18 + $0x88] sm:$0xff] %vm337_vm1, %v2455_v39  ;;  %v1025_v62 = vadd.f32 %v966_v34, %v552_v44  ;;  %v6948_v4 = vpop.f32.mrf.mxu0  ;;  %v4119_v41 = vsel %vm4112_vm7, %v4116_v11, %v4118_v61 }
 0x189   : > { %v1096_v54 = vld [vmem:[%s6130_s18 + $0xa0] sm:$0xff] }
 0x18a   : > { %v1458_v56 = vadd.f32 %v1398_v12, %v1096_v54  ;;  %1061 = vst.msk [vmem:[%s6130_s18 + $0xa8] sm:$0xff] %vm337_vm1, %v1025_v62  ;;  %v2685_v62 = vsel %vm2678_vm6, %v2682_v48, %v2684_v22  ;;  %v3118_v54 = vsel %vm2678_vm6, %v3115_v9, %v3117_v3 }
 0x18b   : > { %v1529_v59 = vld [vmem:[%s6130_s18 + $0x98] sm:$0xff] }
 0x18c   : > { %v1890_v0 = vadd.f32 %v6802_v2, %v1529_v59  ;;  %1494 = vst.msk [vmem:[%s6130_s18 + $0xa0] sm:$0xff] %vm337_vm1, %v1458_v56  ;;  %v2683_v2 = vsel %vm2678_vm6, %v2680_v32, %v2682_v48  ;;  %v3582_v32 = vshrl.u32 %v5903_v26, 16  ;;  %v5904_v56 = vld [vmem:[%s6016_s28 + $0x38] sm:$0xff]  ;;  %v556_v26 = vld [vmem:[%s6130_s18 + $0xc8] sm:$0xff] }
 0x18d   : > { %v1961_v15 = vld [vmem:[%s6130_s18 + $0x90] sm:$0xff] }
 0x18e   : > { %v1400_v55 = vpop.f32.mrf.mxu2  ;;  %1926 = vst.msk [vmem:[%s6130_s18 + $0x98] sm:$0xff] %vm337_vm1, %v1890_v0  ;;  %v2456_v16 = vadd.f32 %v6841_v60, %v1961_v15  ;;  %v3584_v25 = vrot.slane %v3582_v32, 2  ;;  %v3591_v0 = vshrl.u32 %v5904_v56, 16  ;;  %v3594_v15 = vshll.u32 %v5904_v56, 16 }
 0x18f   : > { %v969_v18 = vpop.f32.mrf.mxu1  ;;  %v7001_v33 = vpop.f32.mrf.mxu3 }
 0x190   : > { %2492 = vst.msk [vmem:[%s6130_s18 + $0x90] sm:$0xff] %vm337_vm1, %v2456_v16  ;;  %v1026_v60 = vadd.f32 %v969_v18, %v553_v40  ;;  %v6984_v14 = vpop.f32.mrf.mxu0  ;;  %v3593_v8 = vrot.slane %v3591_v0, 2  ;;  %v3596_v11 = vrot.slane %v3594_v15, 3  ;;  %v4416_v40 = vld [vmem:[%s8673_s2 + $0x10] sm:$0xff]  ;;  %v7175_v15 = vld [vmem:[%s6016_s28 + $0x38] sm:$0xff] }
 0x191   : > { %v1097_v5 = vld [vmem:[%s6130_s18 + $0xa8] sm:$0xff]  ;;  %4462 = vperm.xlu1 %5950, %v4416_v40   ;;  %v4122_v40 = vrot.slane %v7175_v15, 3 }
 0x192   : > { %v1459_v21 = vadd.f32 %v1400_v55, %v1097_v5  ;;  %1062 = vst.msk [vmem:[%s6130_s18 + $0xb0] sm:$0xff] %vm337_vm1, %v1026_v60  ;;  %5481 = vmatmul.msk.bf16.gmra.mxu1 %vm337_vm1, %v2683_v2  ;;  %v7094_v5 = vld [vmem:[%s6016_s28 + $0x30] sm:$0xff] }
 0x193   : > { %5572 = vmatmul.msk.bf16.gmra.mxu2 %vm337_vm1, %v3116_v24  ;;  %v1530_v52 = vld [vmem:[%s6130_s18 + $0xa0] sm:$0xff]  ;;  %5754 = vmatmul.msk.bf16.gmra.mxu0 %vm337_vm1, %v4117_v20  ;;  %v3597_v24 = vor.u32 %v3596_v11, %v3593_v8  ;;  %v7091_v20 = vld [vmem:[%s6016_s28 + $0x28] sm:$0xff]  ;;  %v3119_v10 = vrot.slane %v7094_v5, 2 }
 0x194   : > { %v1891_v36 = vadd.f32 %v6827_v46, %v1530_v52  ;;  %1495 = vst.msk [vmem:[%s6130_s18 + $0xa8] sm:$0xff] %vm337_vm1, %v1459_v21  ;;  %v7007_v46 = vor.u32 %v3587_v30, %v3584_v25  ;;  %v7103_v52 = vld [vmem:[%s6016_s28 + $0x30] sm:$0xff] }
 0x195   : > { %v1962_v45 = vld [vmem:[%s6130_s18 + $0x98] sm:$0xff] }
 0x196   : > { %v1403_v42 = vpop.f32.mrf.mxu2  ;;  %1927 = vst.msk [vmem:[%s6130_s18 + $0xa0] sm:$0xff] %vm337_vm1, %v1891_v36  ;;  %v2457_v13 = vadd.f32 %v6881_v23, %v1962_v45  ;;  %v3589_v49 = vsel %vm3545_vm5, %v6931_v7, %v7007_v46  ;;  %v4415_v7 = vld [vmem:[%s8673_s2 + $0x8] sm:$0xff]  ;;  %v3598_v32 = vsel %vm3545_vm5, %v7007_v46, %v3597_v24  ;;  %v2686_v36 = vrot.slane %v7091_v20, 2  ;;  %v4417_v46 = vld [vmem:[%s8673_s2 + $0x18] sm:$0xff] }
 0x197   : > { %v971_v50 = vpop.f32.mrf.mxu1  ;;  %5665 = vmatmul.msk.bf16.gmra.mxu3 %vm337_vm1, %v3589_v49  ;;  %v7040_v12 = vpop.f32.mrf.mxu3  ;;  %4457 = vperm.xlu0 %5949, %v4415_v7   ;;  %v4120_v45 = vrot.slane %v7103_v52, 3 }
 0x198   : > { %2493 = vst.msk [vmem:[%s6130_s18 + $0x98] sm:$0xff] %vm337_vm1, %v2457_v13  ;;  %v1027_v53 = vadd.f32 %v971_v50, %v554_v47  ;;  %v7024_v37 = vpop.f32.mrf.mxu0 }
 0x199   : > { %v1098_v23 = vld [vmem:[%s6130_s18 + $0xb0] sm:$0xff]  ;;  %4467 = vperm.xlu1 %5950, %v4417_v46   ;;  %v4121_v43 = vsel %vm4112_vm7, %v4118_v61, %v4120_v45  ;;  %v4123_v20 = vsel %vm4112_vm7, %v4120_v45, %v4122_v40 }
 0x19a   : > { %v1460_v28 = vadd.f32 %v1403_v42, %v1098_v23  ;;  %1063 = vst.msk [vmem:[%s6130_s18 + $0xb8] sm:$0xff] %vm337_vm1, %v1027_v53  ;;  %v2687_v53 = vsel %vm2678_vm6, %v2684_v22, %v2686_v36  ;;  %v3120_v23 = vsel %vm2678_vm6, %v3117_v3, %v3119_v10 }
 0x19b   : > { %v1531_v57 = vld [vmem:[%s6130_s18 + $0xa8] sm:$0xff] }
 0x19c   : > { %v1892_v63 = vadd.f32 %v6859_v6, %v1531_v57  ;;  %1496 = vst.msk [vmem:[%s6130_s18 + $0xb0] sm:$0xff] %vm337_vm1, %v1460_v28  ;;  %v555_v6 = vld [vmem:[%s6130_s18 + $0xc0] sm:$0xff] }
 0x19d   : > { %v1963_v39 = vld [vmem:[%s6130_s18 + $0xa0] sm:$0xff] }
 0x19e   : > { %v1405_v44 = vpop.f32.mrf.mxu2  ;;  %1928 = vst.msk [vmem:[%s6130_s18 + $0xa8] sm:$0xff] %vm337_vm1, %v1892_v63  ;;  %v2458_v34 = vadd.f32 %v6913_v31, %v1963_v39  ;;  %v5905_v28 = vld [vmem:[%s6016_s28 + $0x40] sm:$0xff] }
 0x19f   : > { %v974_v38 = vpop.f32.mrf.mxu1  ;;  %v7080_v16 = vpop.f32.mrf.mxu3  ;;  %v3600_v63 = vshrl.u32 %v5905_v28, 16  ;;  %v3603_v51 = vshll.u32 %v5905_v28, 16  ;;  %v7241_v28 = vld [vmem:[%s6016_s28 + $0x40] sm:$0xff] }
 0x1a0   : > { %2494 = vst.msk [vmem:[%s6130_s18 + $0xa0] sm:$0xff] %vm337_vm1, %v2458_v34  ;;  %v1028_v31 = vadd.f32 %v974_v38, %v555_v6  ;;  %v7063_v59 = vpop.f32.mrf.mxu0 }
 0x1a1   : > { %v1099_v48 = vld [vmem:[%s6130_s18 + $0xb8] sm:$0xff]  ;;  %v3602_v27 = vrot.slane %v3600_v63, 2  ;;  %v3605_v61 = vrot.slane %v3603_v51, 3  ;;  %v7250_v63 = vld [vmem:[%s6016_s28 + $0x40] sm:$0xff] }
 0x1a2   : > { %v1461_v58 = vadd.f32 %v1405_v44, %v1099_v48  ;;  %1064 = vst.msk [vmem:[%s6130_s18 + $0xc0] sm:$0xff] %vm337_vm1, %v1028_v31  ;;  %5482 = vmatmul.msk.bf16.gmra.mxu1 %vm337_vm1, %v2685_v62  ;;  %v7164_v31 = vld [vmem:[%s6016_s28 + $0x30] sm:$0xff] }
 0x1a3   : > { %5573 = vmatmul.msk.bf16.gmra.mxu2 %vm337_vm1, %v3118_v54  ;;  %v1532_v9 = vld [vmem:[%s6130_s18 + $0xb0] sm:$0xff]  ;;  %5755 = vmatmul.msk.bf16.gmra.mxu0 %vm337_vm1, %v4119_v41  ;;  %v3606_v38 = vor.u32 %v3605_v61, %v3602_v27  ;;  %v558_v54 = vld [vmem:[%s6130_s18 + $0xd8] sm:$0xff]  ;;  %v2688_v8 = vrot.slane %v7164_v31, 2  ;;  %v3123_v27 = vrot.slane %v7241_v28, 2 }
 0x1a4   : > { %v1893_v55 = vadd.f32 %v6897_v19, %v1532_v9  ;;  %1497 = vst.msk [vmem:[%s6130_s18 + $0xb8] sm:$0xff] %vm337_vm1, %v1461_v58 }
 0x1a5   : > { %v1964_v18 = vld [vmem:[%s6130_s18 + $0xa8] sm:$0xff]  ;;  %v3607_v41 = vsel %vm3545_vm5, %v3597_v24, %v3606_v38 }
 0x1a6   : > { %v1408_v2 = vpop.f32.mrf.mxu2  ;;  %1929 = vst.msk [vmem:[%s6130_s18 + $0xb0] sm:$0xff] %vm337_vm1, %v1893_v55  ;;  %v2459_v19 = vadd.f32 %v6948_v4, %v1964_v18 }
 0x1a7   : > { %v976_v60 = vpop.f32.mrf.mxu1  ;;  %5666 = vmatmul.msk.bf16.gmra.mxu3 %vm337_vm1, %v3598_v32  ;;  %v7116_v42 = vpop.f32.mrf.mxu3 }
 0x1a8   : > { %2495 = vst.msk [vmem:[%s6130_s18 + $0xa8] sm:$0xff] %vm337_vm1, %v2459_v19  ;;  %v1029_v35 = vadd.f32 %v976_v60, %v556_v26  ;;  %v7100_v21 = vpop.f32.mrf.mxu0  ;;  %v559_v26 = vld [vmem:[%s6130_s18 + $0xe0] sm:$0xff] }
 0x1a9   : > { %v1100_v4 = vld [vmem:[%s6130_s18 + $0xc0] sm:$0xff] }
 0x1aa   : > { %v1462_v25 = vadd.f32 %v1408_v2, %v1100_v4  ;;  %1065 = vst.msk [vmem:[%s6130_s18 + $0xc8] sm:$0xff] %vm337_vm1, %v1029_v35  ;;  %v5906_v35 = vld [vmem:[%s6016_s28 + $0x48] sm:$0xff] }
 0x1ab   : > { %v1533_v30 = vld [vmem:[%s6130_s18 + $0xb8] sm:$0xff] }
 0x1ac   : > { %v1894_v29 = vadd.f32 %v6928_v1, %v1533_v30  ;;  %1498 = vst.msk [vmem:[%s6130_s18 + $0xc0] sm:$0xff] %vm337_vm1, %v1462_v25  ;;  %v557_v1 = vld [vmem:[%s6130_s18 + $0xd0] sm:$0xff]  ;;  %v3609_v30 = vshrl.u32 %v5906_v35, 16 }
 0x1ad   : > { %v1965_v13 = vld [vmem:[%s6130_s18 + $0xb0] sm:$0xff] }
 0x1ae   : > { %v1410_v47 = vpop.f32.mrf.mxu2  ;;  %1930 = vst.msk [vmem:[%s6130_s18 + $0xb8] sm:$0xff] %vm337_vm1, %v1894_v29  ;;  %v2460_v50 = vadd.f32 %v6984_v14, %v1965_v13  ;;  %v3611_v52 = vrot.slane %v3609_v30, 2  ;;  %v4420_v13 = vld [vmem:[%s8673_s2 + $0x30] sm:$0xff] }
 0x1af   : > { %v979_v49 = vpop.f32.mrf.mxu1  ;;  %v7156_v44 = vpop.f32.mrf.mxu3  ;;  %4482 = vperm.xlu0 %5949, %v4420_v13  }
 0x1b0   : > { %2496 = vst.msk [vmem:[%s6130_s18 + $0xb0] sm:$0xff] %vm337_vm1, %v2460_v50  ;;  %v1030_v14 = vadd.f32 %v979_v49, %v557_v1  ;;  %v7139_v57 = vpop.f32.mrf.mxu0  ;;  %v560_v49 = vld [vmem:[%s6130_s18 + $0xe8] sm:$0xff] }
 0x1b1   : > { %v1101_v22 = vld [vmem:[%s6130_s18 + $0xc8] sm:$0xff] }
 0x1b2   : > { %v1463_v7 = vadd.f32 %v1410_v47, %v1101_v22  ;;  %1066 = vst.msk [vmem:[%s6130_s18 + $0xd0] sm:$0xff] %vm337_vm1, %v1030_v14  ;;  %5483 = vmatmul.msk.bf16.gmra.mxu1 %vm337_vm1, %v2687_v53 }
 0x1b3   : > { %5574 = vmatmul.msk.bf16.gmra.mxu2 %vm337_vm1, %v3120_v23  ;;  %v1534_v3 = vld [vmem:[%s6130_s18 + $0xc0] sm:$0xff]  ;;  %5756 = vmatmul.msk.bf16.gmra.mxu0 %vm337_vm1, %v4121_v43  ;;  %v7238_v23 = vld [vmem:[%s6016_s28 + $0x38] sm:$0xff] }
 0x1b4   : > { %v1895_v39 = vadd.f32 %v6964_v17, %v1534_v3  ;;  %1499 = vst.msk [vmem:[%s6130_s18 + $0xc8] sm:$0xff] %vm337_vm1, %v1463_v7  ;;  %v7167_v17 = vld [vmem:[%s6016_s28 + $0x38] sm:$0xff]  ;;  %v2690_v3 = vrot.slane %v7238_v23, 2 }
 0x1b5   : > { %v1966_v34 = vld [vmem:[%s6130_s18 + $0xb8] sm:$0xff]  ;;  %v3121_v11 = vrot.slane %v7167_v17, 2 }
 0x1b6   : > { %v1413_v6 = vpop.f32.mrf.mxu2  ;;  %1931 = vst.msk [vmem:[%s6130_s18 + $0xc0] sm:$0xff] %vm337_vm1, %v1895_v39  ;;  %v2461_v62 = vadd.f32 %v7024_v37, %v1966_v34  ;;  %v4124_v39 = vrot.slane %v7250_v63, 3 }
 0x1b7   : > { %v981_v56 = vpop.f32.mrf.mxu1  ;;  %5667 = vmatmul.msk.bf16.gmra.mxu3 %vm337_vm1, %v3607_v41  ;;  %v7188_v18 = vpop.f32.mrf.mxu3  ;;  %v3122_v32 = vsel %vm2678_vm6, %v3119_v10, %v3121_v11 }
 0x1b8   : > { %2497 = vst.msk [vmem:[%s6130_s18 + $0xb8] sm:$0xff] %vm337_vm1, %v2461_v62  ;;  %v1031_v48 = vadd.f32 %v981_v56, %v558_v54  ;;  %v7172_v0 = vpop.f32.mrf.mxu0  ;;  %v561_v56 = vld [vmem:[%s6130_s18 + $0xf0] sm:$0xff]  ;;  %v4125_v31 = vsel %vm4112_vm7, %v4122_v40, %v4124_v39 }
 0x1b9   : > { %v1102_v37 = vld [vmem:[%s6130_s18 + $0xd0] sm:$0xff] }
 0x1ba   : > { %v1464_v58 = vadd.f32 %v1413_v6, %v1102_v37  ;;  %1067 = vst.msk [vmem:[%s6130_s18 + $0xd8] sm:$0xff] %vm337_vm1, %v1031_v48  ;;  %v4418_v6 = vld [vmem:[%s8673_s2 + $0x20] sm:$0xff]  ;;  %v2691_v48 = vsel %vm2678_vm6, %v2688_v8, %v2690_v3  ;;  %v3124_v37 = vsel %vm2678_vm6, %v3121_v11, %v3123_v27 }
 0x1bb   : > { %v1535_v9 = vld [vmem:[%s6130_s18 + $0xc8] sm:$0xff]  ;;  %4472 = vperm.xlu2 %5951, %v4418_v6  }
 0x1bc   : > { %v1896_v55 = vadd.f32 %v7001_v33, %v1535_v9  ;;  %1500 = vst.msk [vmem:[%s6130_s18 + $0xd0] sm:$0xff] %vm337_vm1, %v1464_v58  ;;  %v2689_v33 = vsel %vm2678_vm6, %v2686_v36, %v2688_v8  ;;  %v3612_v36 = vshll.u32 %v5906_v35, 16  ;;  %v5907_v58 = vld [vmem:[%s6016_s28 + $0x50] sm:$0xff]  ;;  %v562_v35 = vld [vmem:[%s6130_s18 + $0xf8] sm:$0xff] }
 0x1bd   : > { %v1967_v2 = vld [vmem:[%s6130_s18 + $0xc0] sm:$0xff] }
 0x1be   : > { %v1415_v24 = vpop.f32.mrf.mxu2  ;;  %1932 = vst.msk [vmem:[%s6130_s18 + $0xc8] sm:$0xff] %vm337_vm1, %v1896_v55  ;;  %v2462_v19 = vadd.f32 %v7063_v59, %v1967_v2  ;;  %v3614_v29 = vrot.slane %v3612_v36, 3  ;;  %v3618_v55 = vshrl.u32 %v5907_v58, 16  ;;  %v3621_v2 = vshll.u32 %v5907_v58, 16 }
 0x1bf   : > { %v984_v60 = vpop.f32.mrf.mxu1  ;;  %v7225_v46 = vpop.f32.mrf.mxu3 }
 0x1c0   : > { %2498 = vst.msk [vmem:[%s6130_s18 + $0xc0] sm:$0xff] %vm337_vm1, %v2462_v19  ;;  %v1032_v59 = vadd.f32 %v984_v60, %v559_v26  ;;  %v7208_v4 = vpop.f32.mrf.mxu0  ;;  %v7231_v1 = vor.u32 %v3614_v29, %v3611_v52  ;;  %v3620_v15 = vrot.slane %v3618_v55, 2  ;;  %v3623_v40 = vrot.slane %v3621_v2, 3  ;;  %v4419_v26 = vld [vmem:[%s8673_s2 + $0x28] sm:$0xff] }
 0x1c1   : > { %v1103_v25 = vld [vmem:[%s6130_s18 + $0xd8] sm:$0xff] }
 0x1c2   : > { %v1465_v5 = vadd.f32 %v1415_v24, %v1103_v25  ;;  %1068 = vst.msk [vmem:[%s6130_s18 + $0xe0] sm:$0xff] %vm337_vm1, %v1032_v59  ;;  %5484 = vmatmul.msk.bf16.gmra.mxu1 %vm337_vm1, %v2689_v33  ;;  %v3616_v14 = vsel %vm3545_vm5, %v3606_v38, %v7231_v1  ;;  %v4421_v38 = vld [vmem:[%s8673_s2 + $0x38] sm:$0xff]  ;;  %v7322_v25 = vld [vmem:[%s6016_s28 + $0x48] sm:$0xff] }
 0x1c3   : > { %5575 = vmatmul.msk.bf16.gmra.mxu2 %vm337_vm1, %v3122_v32  ;;  %v1536_v10 = vld [vmem:[%s6130_s18 + $0xd0] sm:$0xff]  ;;  %5757 = vmatmul.msk.bf16.gmra.mxu0 %vm337_vm1, %v4123_v20  ;;  %v7312_v32 = vor.u32 %v3623_v40, %v3620_v15  ;;  %v7319_v20 = vld [vmem:[%s6016_s28 + $0x40] sm:$0xff]  ;;  %v3125_v13 = vrot.slane %v7322_v25, 2 }
 0x1c4   : > { %v1897_v45 = vadd.f32 %v7040_v12, %v1536_v10  ;;  %1501 = vst.msk [vmem:[%s6130_s18 + $0xd8] sm:$0xff] %vm337_vm1, %v1465_v5  ;;  %4487 = vperm.xlu1 %5950, %v4421_v38   ;;  %4477 = vperm.xlu2 %5951, %v4419_v26   ;;  %v7332_v10 = vld [vmem:[%s6016_s28 + $0x48] sm:$0xff] }
 0x1c5   : > { %v1968_v47 = vld [vmem:[%s6130_s18 + $0xc8] sm:$0xff]  ;;  %v3625_v30 = vsel %vm3545_vm5, %v7231_v1, %v7312_v32 }
 0x1c6   : > { %v1418_v50 = vpop.f32.mrf.mxu2  ;;  %1933 = vst.msk [vmem:[%s6130_s18 + $0xd0] sm:$0xff] %vm337_vm1, %v1897_v45  ;;  %v2463_v12 = vadd.f32 %v7100_v21, %v1968_v47  ;;  %v2692_v45 = vrot.slane %v7319_v20, 2 }
 0x1c7   : > { %v986_v53 = vpop.f32.mrf.mxu1  ;;  %5668 = vmatmul.msk.bf16.gmra.mxu3 %vm337_vm1, %v3616_v14  ;;  %v7263_v34 = vpop.f32.mrf.mxu3 }
 0x1c8   : > { %2499 = vst.msk [vmem:[%s6130_s18 + $0xc8] sm:$0xff] %vm337_vm1, %v2463_v12  ;;  %v1033_v43 = vadd.f32 %v986_v53, %v560_v49  ;;  %v7247_v22 = vpop.f32.mrf.mxu0  ;;  %v4423_v12 = vld [vmem:[%s8673_s2 + $0x48] sm:$0xff] }
 0x1c9   : > { %v1104_v51 = vld [vmem:[%s6130_s18 + $0xe0] sm:$0xff]  ;;  %4497 = vperm.xlu0 %5949, %v4423_v12  }
 0x1ca   : > { %v1466_v21 = vadd.f32 %v1418_v50, %v1104_v51  ;;  %1069 = vst.msk [vmem:[%s6130_s18 + $0xe8] sm:$0xff] %vm337_vm1, %v1033_v43  ;;  %v4126_v50 = vrot.slane %v7332_v10, 3  ;;  %v2693_v51 = vsel %vm2678_vm6, %v2690_v3, %v2692_v45 }
 0x1cb   : > { %v1537_v7 = vld [vmem:[%s6130_s18 + $0xd8] sm:$0xff] }
 0x1cc   : > { %v1898_v61 = vadd.f32 %v7080_v16, %v1537_v7  ;;  %1502 = vst.msk [vmem:[%s6130_s18 + $0xe0] sm:$0xff] %vm337_vm1, %v1466_v21  ;;  %v3126_v21 = vsel %vm2678_vm6, %v3123_v27, %v3125_v13  ;;  %v5908_v7 = vld [vmem:[%s6016_s28 + $0x58] sm:$0xff]  ;;  %v4127_v23 = vsel %vm4112_vm7, %v4124_v39, %v4126_v50 }
 0x1cd   : > { %v1969_v62 = vld [vmem:[%s6130_s18 + $0xd0] sm:$0xff]  ;;  %v3627_v6 = vshrl.u32 %v5908_v7, 16  ;;  %v3630_v38 = vshll.u32 %v5908_v7, 16 }
 0x1ce   : > { %v1420_v54 = vpop.f32.mrf.mxu2  ;;  %1934 = vst.msk [vmem:[%s6130_s18 + $0xd8] sm:$0xff] %vm337_vm1, %v1898_v61  ;;  %v2464_v16 = vadd.f32 %v7139_v57, %v1969_v62 }
 0x1cf   : > { %v989_v41 = vpop.f32.mrf.mxu1  ;;  %v7306_v19 = vpop.f32.mrf.mxu3  ;;  %v3629_v63 = vrot.slane %v3627_v6, 2  ;;  %v3632_v39 = vrot.slane %v3630_v38, 3 }
 0x1d0   : > { %2500 = vst.msk [vmem:[%s6130_s18 + $0xd0] sm:$0xff] %vm337_vm1, %v2464_v16  ;;  %v1034_v57 = vadd.f32 %v989_v41, %v561_v56  ;;  %v7289_v9 = vpop.f32.mrf.mxu0  ;;  %v4424_v16 = vld [vmem:[%s8673_s2 + $0x50] sm:$0xff] }
 0x1d1   : > { %v1105_v8 = vld [vmem:[%s6130_s18 + $0xe8] sm:$0xff]  ;;  %4502 = vperm.xlu1 %5950, %v4424_v16  }
 0x1d2   : > { %v1467_v17 = vadd.f32 %v1420_v54, %v1105_v8  ;;  %1070 = vst.msk [vmem:[%s6130_s18 + $0xf0] sm:$0xff] %vm337_vm1, %v1034_v57  ;;  %5485 = vmatmul.msk.bf16.gmra.mxu1 %vm337_vm1, %v2691_v48  ;;  %v7391_v48 = vor.u32 %v3632_v39, %v3629_v63  ;;  %v7398_v57 = vld [vmem:[%s6016_s28 + $0x48] sm:$0xff] }
 0x1d3   : > { %5576 = vmatmul.msk.bf16.gmra.mxu2 %vm337_vm1, %v3124_v37  ;;  %v1538_v11 = vld [vmem:[%s6130_s18 + $0xe0] sm:$0xff]  ;;  %5758 = vmatmul.msk.bf16.gmra.mxu0 %vm337_vm1, %v4125_v31  ;;  %v564_v37 = vld [vmem:[%s6130_s18 + $0x108] sm:$0xff]  ;;  %v7401_v31 = vld [vmem:[%s6016_s28 + $0x50] sm:$0xff]  ;;  %v2694_v40 = vrot.slane %v7398_v57, 2 }
 0x1d4   : > { %v1899_v24 = vadd.f32 %v7116_v42, %v1538_v11  ;;  %1503 = vst.msk [vmem:[%s6130_s18 + $0xe8] sm:$0xff] %vm337_vm1, %v1467_v17  ;;  %v3634_v8 = vsel %vm3545_vm5, %v7312_v32, %v7391_v48  ;;  %v7411_v17 = vld [vmem:[%s6016_s28 + $0x50] sm:$0xff] }
 0x1d5   : > { %v1970_v60 = vld [vmem:[%s6130_s18 + $0xd8] sm:$0xff] }
 0x1d6   : > { %v1423_v33 = vpop.f32.mrf.mxu2  ;;  %1935 = vst.msk [vmem:[%s6130_s18 + $0xe0] sm:$0xff] %vm337_vm1, %v1899_v24  ;;  %v2465_v42 = vadd.f32 %v7172_v0, %v1970_v60  ;;  %v3127_v24 = vrot.slane %v7401_v31, 2  ;;  %v4128_v60 = vrot.slane %v7411_v17, 3 }
 0x1d7   : > { %v991_v59 = vpop.f32.mrf.mxu1  ;;  %5669 = vmatmul.msk.bf16.gmra.mxu3 %vm337_vm1, %v3625_v30  ;;  %v7345_v1 = vpop.f32.mrf.mxu3 }
 0x1d8   : > { %2501 = vst.msk [vmem:[%s6130_s18 + $0xd8] sm:$0xff] %vm337_vm1, %v2465_v42  ;;  %v1035_v36 = vadd.f32 %v991_v59, %v562_v35  ;;  %v7329_v5 = vpop.f32.mrf.mxu0  ;;  %v4129_v20 = vsel %vm4112_vm7, %v4126_v50, %v4128_v60 }
 0x1d9   : > { %v1106_v0 = vld [vmem:[%s6130_s18 + $0xf0] sm:$0xff] }
 0x1da   : > { %v1468_v52 = vadd.f32 %v1423_v33, %v1106_v0  ;;  %1071 = vst.msk [vmem:[%s6130_s18 + $0xf8] sm:$0xff] %vm337_vm1, %v1035_v36  ;;  %v4422_v33 = vld [vmem:[%s8673_s2 + $0x40] sm:$0xff]  ;;  %v2695_v36 = vsel %vm2678_vm6, %v2692_v45, %v2694_v40  ;;  %v3128_v0 = vsel %vm2678_vm6, %v3125_v13, %v3127_v24 }
 0x1db   : > { %v1539_v29 = vld [vmem:[%s6130_s18 + $0xe8] sm:$0xff]  ;;  %4492 = vperm.xlu2 %5951, %v4422_v33  }
 0x1dc   : > { %v1900_v47 = vadd.f32 %v7156_v44, %v1539_v29  ;;  %1504 = vst.msk [vmem:[%s6130_s18 + $0xf0] sm:$0xff] %vm337_vm1, %v1468_v52  ;;  %v563_v44 = vld [vmem:[%s6130_s18 + $0x100] sm:$0xff] }
 0x1dd   : > { %v1971_v49 = vld [vmem:[%s6130_s18 + $0xe0] sm:$0xff] }
 0x1de   : > { %v1425_v53 = vpop.f32.mrf.mxu2  ;;  %1936 = vst.msk [vmem:[%s6130_s18 + $0xe8] sm:$0xff] %vm337_vm1, %v1900_v47  ;;  %v2466_v14 = vadd.f32 %v7208_v4, %v1971_v49  ;;  %v5909_v52 = vld [vmem:[%s6016_s28 + $0x60] sm:$0xff] }
 0x1df   : > { %v994_v43 = vpop.f32.mrf.mxu1  ;;  %v7385_v54 = vpop.f32.mrf.mxu3  ;;  %v3636_v47 = vshrl.u32 %v5909_v52, 16  ;;  %v3639_v12 = vshll.u32 %v5909_v52, 16 }
 0x1e0   : > { %2502 = vst.msk [vmem:[%s6130_s18 + $0xe0] sm:$0xff] %vm337_vm1, %v2466_v14  ;;  %v1036_v4 = vadd.f32 %v994_v43, %v563_v44  ;;  %v7368_v61 = vpop.f32.mrf.mxu0 }
 0x1e1   : > { %v1107_v3 = vld [vmem:[%s6130_s18 + $0xf8] sm:$0xff]  ;;  %v3638_v10 = vrot.slane %v3636_v47, 2  ;;  %v3641_v49 = vrot.slane %v3639_v12, 3 }
 0x1e2   : > { %v1469_v28 = vadd.f32 %v1425_v53, %v1107_v3  ;;  %1072 = vst.msk [vmem:[%s6130_s18 + $0x100] sm:$0xff] %vm337_vm1, %v1036_v4  ;;  %5486 = vmatmul.msk.bf16.gmra.mxu1 %vm337_vm1, %v2693_v51  ;;  %v4426_v53 = vld [vmem:[%s8673_s2 + $0x60] sm:$0xff]  ;;  %v7477_v4 = vld [vmem:[%s6016_s28 + $0x50] sm:$0xff] }
 0x1e3   : > { %5577 = vmatmul.msk.bf16.gmra.mxu2 %vm337_vm1, %v3126_v21  ;;  %v1540_v27 = vld [vmem:[%s6130_s18 + $0xf0] sm:$0xff]  ;;  %5759 = vmatmul.msk.bf16.gmra.mxu0 %vm337_vm1, %v4127_v23  ;;  %v7470_v51 = vor.u32 %v3641_v49, %v3638_v10  ;;  %v566_v21 = vld [vmem:[%s6130_s18 + $0x118] sm:$0xff]  ;;  %v2696_v39 = vrot.slane %v7477_v4, 2 }
 0x1e4   : > { %v1901_v62 = vadd.f32 %v7188_v18, %v1540_v27  ;;  %1505 = vst.msk [vmem:[%s6130_s18 + $0xf8] sm:$0xff] %vm337_vm1, %v1469_v28  ;;  %4512 = vperm.xlu0 %5949, %v4426_v53   ;;  %v7480_v23 = vld [vmem:[%s6016_s28 + $0x58] sm:$0xff] }
 0x1e5   : > { %v1972_v56 = vld [vmem:[%s6130_s18 + $0xe8] sm:$0xff]  ;;  %v3643_v3 = vsel %vm3545_vm5, %v7391_v48, %v7470_v51  ;;  %v7490_v28 = vld [vmem:[%s6016_s28 + $0x58] sm:$0xff] }
 0x1e6   : > { %v1428_v41 = vpop.f32.mrf.mxu2  ;;  %1937 = vst.msk [vmem:[%s6130_s18 + $0xf0] sm:$0xff] %vm337_vm1, %v1901_v62  ;;  %v2467_v18 = vadd.f32 %v7247_v22, %v1972_v56  ;;  %v3129_v62 = vrot.slane %v7480_v23, 2  ;;  %v4130_v56 = vrot.slane %v7490_v28, 3 }
 0x1e7   : > { %v996_v58 = vpop.f32.mrf.mxu1  ;;  %5670 = vmatmul.msk.bf16.gmra.mxu3 %vm337_vm1, %v3634_v8  ;;  %v7428_v35 = vpop.f32.mrf.mxu3 }
 0x1e8   : > { %2503 = vst.msk [vmem:[%s6130_s18 + $0xe8] sm:$0xff] %vm337_vm1, %v2467_v18  ;;  %v1037_v55 = vadd.f32 %v996_v58, %v564_v37  ;;  %v7408_v2 = vpop.f32.mrf.mxu0  ;;  %v4131_v57 = vsel %vm4112_vm7, %v4128_v60, %v4130_v56 }
 0x1e9   : > { %v1108_v22 = vld [vmem:[%s6130_s18 + $0x100] sm:$0xff] }
 0x1ea   : > { %v1470_v11 = vadd.f32 %v1428_v41, %v1108_v22  ;;  %1073 = vst.msk [vmem:[%s6130_s18 + $0x108] sm:$0xff] %vm337_vm1, %v1037_v55  ;;  %v4427_v41 = vld [vmem:[%s8673_s2 + $0x68] sm:$0xff]  ;;  %v2697_v55 = vsel %vm2678_vm6, %v2694_v40, %v2696_v39  ;;  %v3130_v22 = vsel %vm2678_vm6, %v3127_v24, %v3129_v62 }
 0x1eb   : > { %v1541_v15 = vld [vmem:[%s6130_s18 + $0xf8] sm:$0xff]  ;;  %4517 = vperm.xlu1 %5950, %v4427_v41  }
 0x1ec   : > { %v1902_v26 = vadd.f32 %v7225_v46, %v1541_v15  ;;  %1506 = vst.msk [vmem:[%s6130_s18 + $0x100] sm:$0xff] %vm337_vm1, %v1470_v11  ;;  %v565_v46 = vld [vmem:[%s6130_s18 + $0x110] sm:$0xff]  ;;  %v5910_v11 = vld [vmem:[%s6016_s28 + $0x68] sm:$0xff] }
 0x1ed   : > { %v1973_v32 = vld [vmem:[%s6130_s18 + $0xf0] sm:$0xff]  ;;  %v3648_v33 = vshll.u32 %v5910_v11, 16 }
 0x1ee   : > { %v1430_v42 = vpop.f32.mrf.mxu2  ;;  %1938 = vst.msk [vmem:[%s6130_s18 + $0xf8] sm:$0xff] %vm337_vm1, %v1902_v26  ;;  %v2468_v59 = vadd.f32 %v7289_v9, %v1973_v32  ;;  %v3645_v26 = vshrl.u32 %v5910_v11, 16 }
 0x1ef   : > { %v999_v30 = vpop.f32.mrf.mxu1  ;;  %v7468_v43 = vpop.f32.mrf.mxu3  ;;  %v3650_v32 = vrot.slane %v3648_v33, 3 }
 0x1f0   : > { %2504 = vst.msk [vmem:[%s6130_s18 + $0xf0] sm:$0xff] %vm337_vm1, %v2468_v59  ;;  %v1038_v9 = vadd.f32 %v999_v30, %v565_v46  ;;  %v7447_v29 = vpop.f32.mrf.mxu0  ;;  %v3647_v17 = vrot.slane %v3645_v26, 2 }
 0x1f1   : > { %v1109_v45 = vld [vmem:[%s6130_s18 + $0x108] sm:$0xff] }
 0x1f2   : > { %v1471_v25 = vadd.f32 %v1430_v42, %v1109_v45  ;;  %1074 = vst.msk [vmem:[%s6130_s18 + $0x110] sm:$0xff] %vm337_vm1, %v1038_v9  ;;  %5487 = vmatmul.msk.bf16.gmra.mxu1 %vm337_vm1, %v2695_v36  ;;  %v4425_v42 = vld [vmem:[%s8673_s2 + $0x58] sm:$0xff]  ;;  %v7549_v36 = vor.u32 %v3650_v32, %v3647_v17 }
 0x1f3   : > { %5578 = vmatmul.msk.bf16.gmra.mxu2 %vm337_vm1, %v3128_v0  ;;  %v1542_v13 = vld [vmem:[%s6130_s18 + $0x100] sm:$0xff]  ;;  %5760 = vmatmul.msk.bf16.gmra.mxu0 %vm337_vm1, %v4129_v20  ;;  %v2511_v0 = vld [vmem:[%s6130_s18 + $0x8] sm:$0xff]  ;;  %v7556_v9 = vld [vmem:[%s6016_s28 + $0x58] sm:$0xff] }
 0x1f4   : > { %v1903_v50 = vadd.f32 %v7263_v34, %v1542_v13  ;;  %1507 = vst.msk [vmem:[%s6130_s18 + $0x108] sm:$0xff] %vm337_vm1, %v1471_v25  ;;  %4507 = vperm.xlu2 %5951, %v4425_v42   ;;  %v7559_v20 = vld [vmem:[%s6016_s28 + $0x60] sm:$0xff]  ;;  %v3652_v45 = vsel %vm3545_vm5, %v7470_v51, %v7549_v36  ;;  %v2698_v49 = vrot.slane %v7556_v9, 2 }
 0x1f5   : > { %v1974_v14 = vld [vmem:[%s6130_s18 + $0xf8] sm:$0xff]  ;;  %v7569_v25 = vld [vmem:[%s6016_s28 + $0x60] sm:$0xff] }
 0x1f6   : > { %v1433_v44 = vpop.f32.mrf.mxu2  ;;  %1939 = vst.msk [vmem:[%s6130_s18 + $0x100] sm:$0xff] %vm337_vm1, %v1903_v50  ;;  %v2469_v34 = vadd.f32 %v7329_v5, %v1974_v14  ;;  %v3131_v50 = vrot.slane %v7559_v20, 2  ;;  %v4132_v14 = vrot.slane %v7569_v25, 3 }
 0x1f7   : > { %v1001_v7 = vpop.f32.mrf.mxu1  ;;  %5671 = vmatmul.msk.bf16.gmra.mxu3 %vm337_vm1, %v3643_v3  ;;  %v7507_v37 = vpop.f32.mrf.mxu3 }
 0x1f8   : > { %2505 = vst.msk [vmem:[%s6130_s18 + $0xf8] sm:$0xff] %vm337_vm1, %v2469_v34  ;;  %v1039_v6 = vadd.f32 %v1001_v7, %v566_v21  ;;  %v7487_v38 = vpop.f32.mrf.mxu0  ;;  %v4133_v4 = vsel %vm4112_vm7, %v4130_v56, %v4132_v14 }
 0x1f9   : > { %v1110_v5 = vld [vmem:[%s6130_s18 + $0x110] sm:$0xff] }
 0x1fa   : > { %v1472_v27 = vadd.f32 %v1433_v44, %v1110_v5  ;;  %1075 = vst.msk [vmem:[%s6130_s18 + $0x118] sm:$0xff] %vm337_vm1, %v1039_v6  ;;  %v4429_v44 = vld [vmem:[%s8673_s2 + $0x78] sm:$0xff]  ;;  %v2699_v6 = vsel %vm2678_vm6, %v2696_v39, %v2698_v49  ;;  %v3132_v5 = vsel %vm2678_vm6, %v3129_v62, %v3131_v50 }
 0x1fb   : > { %v1543_v63 = vld [vmem:[%s6130_s18 + $0x108] sm:$0xff]  ;;  %4527 = vperm.xlu0 %5949, %v4429_v44  }
 0x1fc   : > { %v1904_v16 = vadd.f32 %v7306_v19, %v1543_v63  ;;  %1508 = vst.msk [vmem:[%s6130_s18 + $0x110] sm:$0xff] %vm337_vm1, %v1472_v27  ;;  %v2510_v19 = vld [vmem:[%s6130_s18] sm:$0xff]  ;;  %v5911_v27 = vld [vmem:[%s6016_s28 + $0x70] sm:$0xff] }
 0x1fd   : > { %v1975_v48 = vld [vmem:[%s6130_s18 + $0x100] sm:$0xff]  ;;  %v3657_v41 = vshll.u32 %v5911_v27, 16 }
 0x1fe   : > { %v1435_v18 = vpop.f32.mrf.mxu2  ;;  %1940 = vst.msk [vmem:[%s6130_s18 + $0x108] sm:$0xff] %vm337_vm1, %v1904_v16  ;;  %v2470_v58 = vadd.f32 %v7368_v61, %v1975_v48  ;;  %v3654_v16 = vshrl.u32 %v5911_v27, 16 }
 0x1ff   : > { %v2782_v8 = vpop.f32.mrf.mxu1  ;;  %v7547_v30 = vpop.f32.mrf.mxu3  ;;  %v3659_v48 = vrot.slane %v3657_v41, 3 }
 0x200   : > { %2506 = vst.msk [vmem:[%s6130_s18 + $0x100] sm:$0xff] %vm337_vm1, %v2470_v58  ;;  %v2872_v61 = vadd.f32 %v2782_v8, %v2510_v19  ;;  %v7526_v15 = vpop.f32.mrf.mxu0  ;;  %v3656_v28 = vrot.slane %v3654_v16, 2 }
 0x201   : > { %v1111_v40 = vld [vmem:[%s6130_s18 + $0x118] sm:$0xff] }
 0x202   : > { %v1473_v31 = vadd.f32 %v1435_v18, %v1111_v40  ;;  %2908 = vst.msk [vmem:[%s6130_s18] sm:$0xff] %vm337_vm1, %v2872_v61  ;;  %5488 = vmatmul.msk.bf16.gmra.mxu1 %vm337_vm1, %v2697_v55  ;;  %v4430_v18 = vld [vmem:[%s8673_s2 + $0x80] sm:$0xff]  ;;  %v7628_v55 = vor.u32 %v3659_v48, %v3656_v28  ;;  %v4433_v28 = vld [vmem:[%s8673_s2 + $0x98] sm:$0xff] }
 0x203   : > { %5579 = vmatmul.msk.bf16.gmra.mxu2 %vm337_vm1, %v3130_v22  ;;  %v1544_v24 = vld [vmem:[%s6130_s18 + $0x110] sm:$0xff]  ;;  %5761 = vmatmul.msk.bf16.gmra.mxu0 %vm337_vm1, %v4131_v57  ;;  %v2513_v22 = vld [vmem:[%s6130_s18 + $0x18] sm:$0xff]  ;;  %v7635_v61 = vld [vmem:[%s6016_s28 + $0x60] sm:$0xff] }
 0x204   : > { %v1905_v60 = vadd.f32 %v7345_v1, %v1544_v24  ;;  %1509 = vst.msk [vmem:[%s6130_s18 + $0x118] sm:$0xff] %vm337_vm1, %v1473_v31  ;;  %4532 = vperm.xlu1 %5950, %v4430_v18   ;;  %v7638_v57 = vld [vmem:[%s6016_s28 + $0x68] sm:$0xff]  ;;  %v3661_v40 = vsel %vm3545_vm5, %v7549_v36, %v7628_v55  ;;  %v2700_v32 = vrot.slane %v7635_v61, 2 }
 0x205   : > { %v1976_v59 = vld [vmem:[%s6130_s18 + $0x108] sm:$0xff] }
 0x206   : > { %v3215_v46 = vpop.f32.mrf.mxu2  ;;  %1941 = vst.msk [vmem:[%s6130_s18 + $0x110] sm:$0xff] %vm337_vm1, %v1905_v60  ;;  %v2471_v1 = vadd.f32 %v7408_v2, %v1976_v59  ;;  %v7648_v31 = vld [vmem:[%s6016_s28 + $0x68] sm:$0xff]  ;;  %v3133_v60 = vrot.slane %v7638_v57, 2  ;;  %v5913_v57 = vld [vmem:[%s6016_s28 + $0x80] sm:$0xff] }
 0x207   : > { %v2784_v52 = vpop.f32.mrf.mxu1  ;;  %5672 = vmatmul.msk.bf16.gmra.mxu3 %vm337_vm1, %v3652_v45  ;;  %v7586_v21 = vpop.f32.mrf.mxu3  ;;  %v4134_v59 = vrot.slane %v7648_v31, 3  ;;  %v4435_v61 = vld [vmem:[%s8673_s2 + $0xa8] sm:$0xff]  ;;  %v4436_v31 = vld [vmem:[%s8673_s2 + $0xb0] sm:$0xff] }
 0x208   : > { %2507 = vst.msk [vmem:[%s6130_s18 + $0x108] sm:$0xff] %vm337_vm1, %v2471_v1  ;;  %v2873_v47 = vadd.f32 %v2784_v52, %v2511_v0  ;;  %v7566_v12 = vpop.f32.mrf.mxu0 }
 0x209   : > { %v2944_v2 = vld [vmem:[%s6130_s18] sm:$0xff]  ;;  %v4135_v9 = vsel %vm4112_vm7, %v4132_v14, %v4134_v59 }
 0x20a   : > { %v3305_v13 = vadd.f32 %v3215_v46, %v2944_v2  ;;  %2909 = vst.msk [vmem:[%s6130_s18 + $0x8] sm:$0xff] %vm337_vm1, %v2873_v47  ;;  %v4428_v46 = vld [vmem:[%s8673_s2 + $0x70] sm:$0xff]  ;;  %v2701_v47 = vsel %vm2678_vm6, %v2698_v49, %v2700_v32  ;;  %v3134_v2 = vsel %vm2678_vm6, %v3131_v50, %v3133_v60 }
 0x20b   : > { %v1545_v10 = vld [vmem:[%s6130_s18 + $0x118] sm:$0xff]  ;;  %4522 = vperm.xlu2 %5951, %v4428_v46   ;;  %v3675_v46 = vshll.u32 %v5913_v57, 16 }
 0x20c   : > { %v1906_v53 = vadd.f32 %v7385_v54, %v1545_v10  ;;  %3341 = vst.msk [vmem:[%s6130_s18] sm:$0xff] %vm337_vm1, %v3305_v13  ;;  %v2512_v54 = vld [vmem:[%s6130_s18 + $0x10] sm:$0xff]  ;;  %v5912_v13 = vld [vmem:[%s6016_s28 + $0x78] sm:$0xff]  ;;  %4547 = vperm.xlu1 %5950, %v4433_v28  }
 0x20d   : > { %v1977_v51 = vld [vmem:[%s6130_s18 + $0x110] sm:$0xff]  ;;  %v3666_v44 = vshll.u32 %v5912_v13, 16 }
 0x20e   : > { %v3217_v34 = vpop.f32.mrf.mxu2  ;;  %1942 = vst.msk [vmem:[%s6130_s18 + $0x118] sm:$0xff] %vm337_vm1, %v1906_v53  ;;  %v2472_v7 = vadd.f32 %v7447_v29, %v1977_v51  ;;  %v3663_v53 = vshrl.u32 %v5912_v13, 16  ;;  %v2517_v13 = vld [vmem:[%s6130_s18 + $0x38] sm:$0xff] }
 0x20f   : > { %v2787_v3 = vpop.f32.mrf.mxu1  ;;  %v7626_v8 = vpop.f32.mrf.mxu3  ;;  %v3668_v51 = vrot.slane %v3666_v44, 3 }
 0x210   : > { %2508 = vst.msk [vmem:[%s6130_s18 + $0x110] sm:$0xff] %vm337_vm1, %v2472_v7  ;;  %v2874_v29 = vadd.f32 %v2787_v3, %v2512_v54  ;;  %v7605_v63 = vpop.f32.mrf.mxu0  ;;  %v3665_v25 = vrot.slane %v3663_v53, 2 }
 0x211   : > { %v2945_v39 = vld [vmem:[%s6130_s18 + $0x8] sm:$0xff] }
 0x212   : > { %v3306_v23 = vadd.f32 %v3217_v34, %v2945_v39  ;;  %2910 = vst.msk [vmem:[%s6130_s18 + $0x10] sm:$0xff] %vm337_vm1, %v2874_v29  ;;  %5489 = vmatmul.msk.bf16.gmra.mxu1 %vm337_vm1, %v2699_v6  ;;  %v4432_v34 = vld [vmem:[%s8673_s2 + $0x90] sm:$0xff]  ;;  %v7707_v6 = vor.u32 %v3668_v51, %v3665_v25  ;;  %v7714_v29 = vld [vmem:[%s6016_s28 + $0x68] sm:$0xff]  ;;  %v4438_v51 = vld [vmem:[%s8673_s2 + $0xc0] sm:$0xff] }
 0x213   : > { %5580 = vmatmul.msk.bf16.gmra.mxu2 %vm337_vm1, %v3132_v5  ;;  %v3377_v62 = vld [vmem:[%s6130_s18] sm:$0xff]  ;;  %5762 = vmatmul.msk.bf16.gmra.mxu0 %vm337_vm1, %v4133_v4  ;;  %v2515_v5 = vld [vmem:[%s6130_s18 + $0x28] sm:$0xff]  ;;  %v7717_v4 = vld [vmem:[%s6016_s28 + $0x70] sm:$0xff] }
 0x214   : > { %v3872_v56 = vadd.f32 %v7428_v35, %v3377_v62  ;;  %3342 = vst.msk [vmem:[%s6130_s18 + $0x8] sm:$0xff] %vm337_vm1, %v3306_v23  ;;  %4542 = vperm.xlu0 %5949, %v4432_v34   ;;  %v3670_v39 = vsel %vm3545_vm5, %v7628_v55, %v7707_v6  ;;  %v7727_v23 = vld [vmem:[%s6016_s28 + $0x70] sm:$0xff]  ;;  %v3135_v18 = vrot.slane %v7717_v4, 2  ;;  %4562 = vperm.xlu1 %5950, %v4436_v31   ;;  %v4441_v4 = vld [vmem:[%s8673_s2 + $0xd8] sm:$0xff]  ;;  %v7888_v31 = vld [vmem:[%s6016_s28 + $0x80] sm:$0xff] }
 0x215   : > { %v1978_v58 = vld [vmem:[%s6130_s18 + $0x118] sm:$0xff] }
 0x216   : > { %v3220_v19 = vpop.f32.mrf.mxu2  ;;  %3908 = vst.msk [vmem:[%s6130_s18] sm:$0xff] %vm337_vm1, %v3872_v56  ;;  %v2473_v35 = vadd.f32 %v7487_v38, %v1978_v58  ;;  %v2702_v56 = vrot.slane %v7714_v29, 2  ;;  %v5914_v29 = vld [vmem:[%s6016_s28 + $0x88] sm:$0xff] }
 0x217   : > { %v2789_v11 = vpop.f32.mrf.mxu1  ;;  %5673 = vmatmul.msk.bf16.gmra.mxu3 %vm337_vm1, %v3661_v40  ;;  %v2516_v40 = vld [vmem:[%s6130_s18 + $0x30] sm:$0xff] }
 0x218   : > { %2509 = vst.msk [vmem:[%s6130_s18 + $0x118] sm:$0xff] %vm337_vm1, %v2473_v35  ;;  %v2875_v26 = vadd.f32 %v2789_v11, %v2513_v22  ;;  %v7645_v33 = vpop.f32.mrf.mxu0 }
 0x219   : > { %v2946_v38 = vld [vmem:[%s6130_s18 + $0x10] sm:$0xff] }
 0x21a   : > { %v3307_v24 = vadd.f32 %v3220_v19, %v2946_v38  ;;  %2911 = vst.msk [vmem:[%s6130_s18 + $0x18] sm:$0xff] %vm337_vm1, %v2875_v26  ;;  %v7665_v0 = vpop.f32.mrf.mxu3  ;;  %v4136_v19 = vrot.slane %v7727_v23, 3  ;;  %v3136_v38 = vsel %vm2678_vm6, %v3133_v60, %v3135_v18 }
 0x21b   : > { %v3378_v17 = vld [vmem:[%s6130_s18 + $0x8] sm:$0xff] }
 0x21c   : > { %v3873_v42 = vadd.f32 %v7468_v43, %v3378_v17  ;;  %3343 = vst.msk [vmem:[%s6130_s18 + $0x10] sm:$0xff] %vm337_vm1, %v3307_v24  ;;  %v2514_v43 = vld [vmem:[%s6130_s18 + $0x20] sm:$0xff]  ;;  %4557 = vperm.xlu0 %5949, %v4435_v61  }
 0x21d   : > { %v3944_v36 = vld [vmem:[%s6130_s18] sm:$0xff] }
 0x21e   : > { %v3222_v1 = vpop.f32.mrf.mxu2  ;;  %3909 = vst.msk [vmem:[%s6130_s18 + $0x8] sm:$0xff] %vm337_vm1, %v3873_v42  ;;  %v4306_v52 = vadd.f32 %v7526_v15, %v3944_v36  ;;  %v3672_v42 = vshrl.u32 %v5913_v57, 16  ;;  %v2519_v57 = vld [vmem:[%s6130_s18 + $0x48] sm:$0xff] }
 0x21f   : > { %v2792_v45 = vpop.f32.mrf.mxu1 }
 0x220   : > { %4342 = vst.msk [vmem:[%s6130_s18] sm:$0xff] %vm337_vm1, %v4306_v52  ;;  %v2876_v15 = vadd.f32 %v2792_v45, %v2514_v43  ;;  %v7684_v10 = vpop.f32.mrf.mxu0  ;;  %v3674_v52 = vrot.slane %v3672_v42, 2 }
 0x221   : > { %v2947_v49 = vld [vmem:[%s6130_s18 + $0x18] sm:$0xff] }
 0x222   : > { %v3308_v20 = vadd.f32 %v3222_v1, %v2947_v49  ;;  %2912 = vst.msk [vmem:[%s6130_s18 + $0x20] sm:$0xff] %vm337_vm1, %v2876_v15  ;;  %5490 = vmatmul.msk.bf16.gmra.mxu1 %vm337_vm1, %v2701_v47  ;;  %v7705_v3 = vpop.f32.mrf.mxu3  ;;  %v4431_v1 = vld [vmem:[%s8673_s2 + $0x88] sm:$0xff]  ;;  %v7800_v49 = vld [vmem:[%s6016_s28 + $0x78] sm:$0xff] }
 0x223   : > { %5581 = vmatmul.msk.bf16.gmra.mxu2 %vm337_vm1, %v3134_v2  ;;  %v3379_v50 = vld [vmem:[%s6130_s18 + $0x10] sm:$0xff]  ;;  %5763 = vmatmul.msk.bf16.gmra.mxu0 %vm337_vm1, %v4135_v9  ;;  %v3677_v2 = vrot.slane %v3675_v46, 3 }
 0x224   : > { %v3874_v14 = vadd.f32 %v7507_v37, %v3379_v50  ;;  %3344 = vst.msk [vmem:[%s6130_s18 + $0x18] sm:$0xff] %vm337_vm1, %v3308_v20  ;;  %4537 = vperm.xlu2 %5951, %v4431_v1   ;;  %v7797_v9 = vld [vmem:[%s6016_s28 + $0x70] sm:$0xff]  ;;  %v7809_v50 = vld [vmem:[%s6016_s28 + $0x78] sm:$0xff]  ;;  %4572 = vperm.xlu0 %5949, %v4438_v51  }
 0x225   : > { %v3945_v7 = vld [vmem:[%s6130_s18 + $0x8] sm:$0xff]  ;;  %v7802_v53 = vor.u32 %v3677_v2, %v3674_v52  ;;  %v4444_v52 = vld [vmem:[%s8673_s2 + $0xf0] sm:$0xff]  ;;  %v4437_v51 = vld [vmem:[%s8673_s2 + $0xb8] sm:$0xff] }
 0x226   : > { %v3225_v54 = vpop.f32.mrf.mxu2  ;;  %3910 = vst.msk [vmem:[%s6130_s18 + $0x10] sm:$0xff] %vm337_vm1, %v3874_v14  ;;  %v4307_v37 = vadd.f32 %v7566_v12, %v3945_v7  ;;  %v2704_v7 = vrot.slane %v7797_v9, 2 }
 0x227   : > { %v2794_v27 = vpop.f32.mrf.mxu1  ;;  %5674 = vmatmul.msk.bf16.gmra.mxu3 %vm337_vm1, %v3670_v39 }
 0x228   : > { %4343 = vst.msk [vmem:[%s6130_s18 + $0x8] sm:$0xff] %vm337_vm1, %v4307_v37  ;;  %v2877_v16 = vadd.f32 %v2794_v27, %v2515_v5  ;;  %v7724_v41 = vpop.f32.mrf.mxu0  ;;  %v4138_v5 = vrot.slane %v7809_v50, 3 }
 0x229   : > { %v2948_v12 = vld [vmem:[%s6130_s18 + $0x20] sm:$0xff] }
 0x22a   : > { %v3309_v62 = vadd.f32 %v3225_v54, %v2948_v12  ;;  %2913 = vst.msk [vmem:[%s6130_s18 + $0x28] sm:$0xff] %vm337_vm1, %v2877_v16  ;;  %v7744_v22 = vpop.f32.mrf.mxu3  ;;  %v3137_v54 = vrot.slane %v7800_v49, 2  ;;  %v4447_v49 = vld [vmem:[%s8673_s2 + $0x108] sm:$0xff] }
 0x22b   : > { %v3380_v48 = vld [vmem:[%s6130_s18 + $0x18] sm:$0xff] }
 0x22c   : > { %v3875_v58 = vadd.f32 %v7547_v30, %v3380_v48  ;;  %3345 = vst.msk [vmem:[%s6130_s18 + $0x20] sm:$0xff] %vm337_vm1, %v3309_v62  ;;  %v2703_v30 = vsel %vm2678_vm6, %v2700_v32, %v2702_v56  ;;  %v2518_v62 = vld [vmem:[%s6130_s18 + $0x40] sm:$0xff]  ;;  %v3138_v48 = vsel %vm2678_vm6, %v3135_v18, %v3137_v54  ;;  %4587 = vperm.xlu0 %5949, %v4441_v4   ;;  %v2521_v4 = vld [vmem:[%s6130_s18 + $0x58] sm:$0xff] }
 0x22d   : > { %v3946_v55 = vld [vmem:[%s6130_s18 + $0x10] sm:$0xff] }
 0x22e   : > { %v3227_v35 = vpop.f32.mrf.mxu2  ;;  %3911 = vst.msk [vmem:[%s6130_s18 + $0x18] sm:$0xff] %vm337_vm1, %v3875_v58  ;;  %v4308_v11 = vadd.f32 %v7605_v63, %v3946_v55  ;;  %v4137_v63 = vsel %vm4112_vm7, %v4134_v59, %v4136_v19 }
 0x22f   : > { %v2797_v26 = vpop.f32.mrf.mxu1 }
 0x230   : > { %4344 = vst.msk [vmem:[%s6130_s18 + $0x10] sm:$0xff] %vm337_vm1, %v4308_v11  ;;  %v2878_v24 = vadd.f32 %v2797_v26, %v2516_v40  ;;  %v7762_v17 = vpop.f32.mrf.mxu0  ;;  %v3684_v11 = vshll.u32 %v5914_v29, 16 }
 0x231   : > { %v2949_v32 = vld [vmem:[%s6130_s18 + $0x28] sm:$0xff] }
 0x232   : > { %v3310_v60 = vadd.f32 %v3227_v35, %v2949_v32  ;;  %2914 = vst.msk [vmem:[%s6130_s18 + $0x30] sm:$0xff] %vm337_vm1, %v2878_v24  ;;  %5491 = vmatmul.msk.bf16.gmra.mxu1 %vm337_vm1, %v2703_v30  ;;  %v7790_v47 = vpop.f32.mrf.mxu3  ;;  %v3681_v35 = vshrl.u32 %v5914_v29, 16  ;;  %v3686_v61 = vrot.slane %v3684_v11, 3  ;;  %v4440_v29 = vld [vmem:[%s8673_s2 + $0xd0] sm:$0xff] }
 0x233   : > { %5582 = vmatmul.msk.bf16.gmra.mxu2 %vm337_vm1, %v3136_v38  ;;  %v3381_v59 = vld [vmem:[%s6130_s18 + $0x20] sm:$0xff]  ;;  %5764 = vmatmul.msk.bf16.gmra.mxu0 %vm337_vm1, %v4137_v63 }
 0x234   : > { %v3876_v36 = vadd.f32 %v7586_v21, %v3381_v59  ;;  %3346 = vst.msk [vmem:[%s6130_s18 + $0x28] sm:$0xff] %vm337_vm1, %v3310_v60  ;;  %v3683_v26 = vrot.slane %v3681_v35, 2  ;;  %v4434_v63 = vld [vmem:[%s8673_s2 + $0xa0] sm:$0xff]  ;;  %v7885_v60 = vld [vmem:[%s6016_s28 + $0x78] sm:$0xff]  ;;  %4602 = vperm.xlu0 %5949, %v4444_v52  }
 0x235   : > { %v3947_v43 = vld [vmem:[%s6130_s18 + $0x18] sm:$0xff]  ;;  %4552 = vperm.xlu2 %5951, %v4434_v63   ;;  %v2706_v2 = vrot.slane %v7885_v60, 2  ;;  %v7976_v35 = vld [vmem:[%s6016_s28 + $0x80] sm:$0xff] }
 0x236   : > { %v3230_v45 = vpop.f32.mrf.mxu2  ;;  %3912 = vst.msk [vmem:[%s6130_s18 + $0x20] sm:$0xff] %vm337_vm1, %v3876_v36  ;;  %v4309_v21 = vadd.f32 %v7645_v33, %v3947_v43  ;;  %v3679_v33 = vsel %vm3545_vm5, %v7707_v6, %v7802_v53  ;;  %v4439_v6 = vld [vmem:[%s8673_s2 + $0xc8] sm:$0xff]  ;;  %v7890_v42 = vor.u32 %v3686_v61, %v3683_v26  ;;  %v7897_v36 = vld [vmem:[%s6016_s28 + $0x80] sm:$0xff]  ;;  %v2708_v61 = vrot.slane %v7976_v35, 2 }
 0x237   : > { %v2799_v15 = vpop.f32.mrf.mxu1  ;;  %5675 = vmatmul.msk.bf16.gmra.mxu3 %vm337_vm1, %v3679_v33  ;;  %4577 = vperm.xlu1 %5950, %v4439_v6   ;;  %v2707_v6 = vsel %vm2678_vm6, %v2704_v7, %v2706_v2  ;;  %v7988_v26 = vld [vmem:[%s6016_s28 + $0x88] sm:$0xff] }
 0x238   : > { %4345 = vst.msk [vmem:[%s6130_s18 + $0x18] sm:$0xff] %vm337_vm1, %v4309_v21  ;;  %v2879_v44 = vadd.f32 %v2799_v15, %v2517_v13  ;;  %v7806_v20 = vpop.f32.mrf.mxu0  ;;  %v3688_v1 = vsel %vm3545_vm5, %v7802_v53, %v7890_v42  ;;  %v3139_v21 = vrot.slane %v7888_v31, 2  ;;  %v4445_v13 = vld [vmem:[%s8673_s2 + $0xf8] sm:$0xff]  ;;  %v4140_v53 = vrot.slane %v7897_v36, 3 }
 0x239   : > { %v2950_v25 = vld [vmem:[%s6130_s18 + $0x30] sm:$0xff] }
 0x23a   : > { %v3311_v14 = vadd.f32 %v3230_v45, %v2950_v25  ;;  %2915 = vst.msk [vmem:[%s6130_s18 + $0x38] sm:$0xff] %vm337_vm1, %v2879_v44  ;;  %v7832_v16 = vpop.f32.mrf.mxu3  ;;  %v4141_v9 = vsel %vm4112_vm7, %v4138_v5, %v4140_v53 }
 0x23b   : > { %v3382_v34 = vld [vmem:[%s6130_s18 + $0x28] sm:$0xff] }
 0x23c   : > { %v3877_v37 = vadd.f32 %v7626_v8, %v3382_v34  ;;  %3347 = vst.msk [vmem:[%s6130_s18 + $0x30] sm:$0xff] %vm337_vm1, %v3311_v14  ;;  %v2705_v8 = vsel %vm2678_vm6, %v2702_v56, %v2704_v7  ;;  %v2520_v14 = vld [vmem:[%s6130_s18 + $0x50] sm:$0xff]  ;;  %4617 = vperm.xlu0 %5949, %v4447_v49  }
 0x23d   : > { %v3948_v27 = vld [vmem:[%s6130_s18 + $0x20] sm:$0xff]  ;;  %4567 = vperm.xlu2 %5951, %v4437_v51  }
 0x23e   : > { %v3232_v39 = vpop.f32.mrf.mxu2  ;;  %3913 = vst.msk [vmem:[%s6130_s18 + $0x28] sm:$0xff] %vm337_vm1, %v3877_v37  ;;  %v4310_v12 = vadd.f32 %v7684_v10, %v3948_v27  ;;  %v4139_v10 = vsel %vm4112_vm7, %v4136_v19, %v4138_v5  ;;  %v4442_v19 = vld [vmem:[%s8673_s2 + $0xe0] sm:$0xff]  ;;  %v3140_v37 = vsel %vm2678_vm6, %v3137_v54, %v3139_v21  ;;  %v4448_v5 = vld [vmem:[%s8673_s2 + $0x110] sm:$0xff] }
 0x23f   : > { %v2802_v28 = vpop.f32.mrf.mxu1  ;;  %4592 = vperm.xlu1 %5950, %v4442_v19  }
 0x240   : > { %4346 = vst.msk [vmem:[%s6130_s18 + $0x20] sm:$0xff] %vm337_vm1, %v4310_v12  ;;  %v2880_v58 = vadd.f32 %v2802_v28, %v2518_v62  ;;  %v7850_v55 = vpop.f32.mrf.mxu0 }
 0x241   : > { %v2951_v56 = vld [vmem:[%s6130_s18 + $0x38] sm:$0xff] }
 0x242   : > { %v3312_v18 = vadd.f32 %v3232_v39, %v2951_v56  ;;  %2916 = vst.msk [vmem:[%s6130_s18 + $0x40] sm:$0xff] %vm337_vm1, %v2880_v58  ;;  %5492 = vmatmul.msk.bf16.gmra.mxu1 %vm337_vm1, %v2705_v8  ;;  %v7875_v24 = vpop.f32.mrf.mxu3  ;;  %v5915_v39 = vld [vmem:[%s6016_s28 + $0x90] sm:$0xff] }
 0x243   : > { %5583 = vmatmul.msk.bf16.gmra.mxu2 %vm337_vm1, %v3138_v48  ;;  %v3383_v23 = vld [vmem:[%s6130_s18 + $0x30] sm:$0xff]  ;;  %5765 = vmatmul.msk.bf16.gmra.mxu0 %vm337_vm1, %v4139_v10  ;;  %v3690_v12 = vshrl.u32 %v5915_v39, 16  ;;  %v3693_v62 = vshll.u32 %v5915_v39, 16  ;;  %v8055_v39 = vld [vmem:[%s6016_s28 + $0x88] sm:$0xff] }
 0x244   : > { %v3878_v40 = vadd.f32 %v7665_v0, %v3383_v23  ;;  %3348 = vst.msk [vmem:[%s6130_s18 + $0x38] sm:$0xff] %vm337_vm1, %v3312_v18  ;;  %v7979_v23 = vld [vmem:[%s6016_s28 + $0x88] sm:$0xff] }
 0x245   : > { %v3949_v30 = vld [vmem:[%s6130_s18 + $0x28] sm:$0xff]  ;;  %v3692_v8 = vrot.slane %v3690_v12, 2  ;;  %v3695_v56 = vrot.slane %v3693_v62, 3  ;;  %4582 = vperm.xlu2 %5951, %v4440_v29  }
 0x246   : > { %v3235_v38 = vpop.f32.mrf.mxu2  ;;  %3914 = vst.msk [vmem:[%s6130_s18 + $0x30] sm:$0xff] %vm337_vm1, %v3878_v40  ;;  %v4311_v0 = vadd.f32 %v7724_v41, %v3949_v30 }
 0x247   : > { %v2804_v32 = vpop.f32.mrf.mxu1  ;;  %5676 = vmatmul.msk.bf16.gmra.mxu3 %vm337_vm1, %v3688_v1  ;;  %4607 = vperm.xlu1 %5950, %v4445_v13   ;;  %v7981_v19 = vor.u32 %v3695_v56, %v3692_v8  ;;  %v4443_v1 = vld [vmem:[%s8673_s2 + $0xe8] sm:$0xff]  ;;  %v2710_v8 = vrot.slane %v8055_v39, 2 }
 0x248   : > { %4347 = vst.msk [vmem:[%s6130_s18 + $0x28] sm:$0xff] %vm337_vm1, %v4311_v0  ;;  %v2881_v59 = vadd.f32 %v2804_v32, %v2519_v57  ;;  %v7894_v46 = vpop.f32.mrf.mxu0  ;;  %v3141_v0 = vrot.slane %v7979_v23, 2  ;;  %v4142_v32 = vrot.slane %v7988_v26, 3 }
 0x249   : > { %v2952_v41 = vld [vmem:[%s6130_s18 + $0x40] sm:$0xff]  ;;  %v3697_v30 = vsel %vm3545_vm5, %v7890_v42, %v7981_v19 }
 0x24a   : > { %v3313_v43 = vadd.f32 %v3235_v38, %v2952_v41  ;;  %2917 = vst.msk [vmem:[%s6130_s18 + $0x48] sm:$0xff] %vm337_vm1, %v2881_v59  ;;  %v7920_v33 = vpop.f32.mrf.mxu3  ;;  %v3142_v13 = vsel %vm2678_vm6, %v3139_v21, %v3141_v0  ;;  %v4143_v60 = vsel %vm4112_vm7, %v4140_v53, %v4142_v32 }
 0x24b   : > { %v3384_v45 = vld [vmem:[%s6130_s18 + $0x38] sm:$0xff] }
 0x24c   : > { %v3879_v15 = vadd.f32 %v7705_v3, %v3384_v45  ;;  %3349 = vst.msk [vmem:[%s6130_s18 + $0x40] sm:$0xff] %vm337_vm1, %v3313_v43  ;;  %v2709_v45 = vsel %vm2678_vm6, %v2706_v2, %v2708_v61  ;;  %v5916_v2 = vld [vmem:[%s6016_s28 + $0x98] sm:$0xff] }
 0x24d   : > { %v3950_v44 = vld [vmem:[%s6130_s18 + $0x30] sm:$0xff]  ;;  %4597 = vperm.xlu2 %5951, %v4443_v1   ;;  %v3699_v31 = vshrl.u32 %v5916_v2, 16  ;;  %v3702_v36 = vshll.u32 %v5916_v2, 16  ;;  %v8134_v2 = vld [vmem:[%s6016_s28 + $0x98] sm:$0xff] }
 0x24e   : > { %v3237_v25 = vpop.f32.mrf.mxu2  ;;  %3915 = vst.msk [vmem:[%s6130_s18 + $0x38] sm:$0xff] %vm337_vm1, %v3879_v15  ;;  %v4312_v3 = vadd.f32 %v7762_v17, %v3950_v44 }
 0x24f   : > { %v2807_v34 = vpop.f32.mrf.mxu1  ;;  %4622 = vperm.xlu1 %5950, %v4448_v5   ;;  %v3701_v51 = vrot.slane %v3699_v31, 2 }
 0x250   : > { %4348 = vst.msk [vmem:[%s6130_s18 + $0x30] sm:$0xff] %vm337_vm1, %v4312_v3  ;;  %v2882_v27 = vadd.f32 %v2807_v34, %v2520_v14  ;;  %v7941_v17 = vpop.f32.mrf.mxu0 }
 0x251   : > { %v2953_v7 = vld [vmem:[%s6130_s18 + $0x48] sm:$0xff] }
 0x252   : > { %v3314_v54 = vadd.f32 %v3237_v25, %v2953_v7  ;;  %2918 = vst.msk [vmem:[%s6130_s18 + $0x50] sm:$0xff] %vm337_vm1, %v2882_v27  ;;  %5493 = vmatmul.msk.bf16.gmra.mxu1 %vm337_vm1, %v2707_v6  ;;  %v7966_v10 = vpop.f32.mrf.mxu3  ;;  %v4446_v6 = vld [vmem:[%s8673_s2 + $0x100] sm:$0xff]  ;;  %v2523_v27 = vld [vmem:[%s6130_s18 + $0x68] sm:$0xff]  ;;  %v8058_v7 = vld [vmem:[%s6016_s28 + $0x90] sm:$0xff] }
 0x253   : > { %5584 = vmatmul.msk.bf16.gmra.mxu2 %vm337_vm1, %v3140_v37  ;;  %v3385_v50 = vld [vmem:[%s6130_s18 + $0x40] sm:$0xff]  ;;  %5766 = vmatmul.msk.bf16.gmra.mxu0 %vm337_vm1, %v4141_v9  ;;  %v3704_v37 = vrot.slane %v3702_v36, 3 }
 0x254   : > { %v3880_v28 = vadd.f32 %v7744_v22, %v3385_v50  ;;  %3350 = vst.msk [vmem:[%s6130_s18 + $0x48] sm:$0xff] %vm337_vm1, %v3314_v54  ;;  %v8067_v50 = vld [vmem:[%s6016_s28 + $0x90] sm:$0xff] }
 0x255   : > { %v3951_v48 = vld [vmem:[%s6130_s18 + $0x38] sm:$0xff]  ;;  %4612 = vperm.xlu2 %5951, %v4446_v6   ;;  %v8060_v49 = vor.u32 %v3704_v37, %v3701_v51  ;;  %v4144_v29 = vrot.slane %v8067_v50, 3 }
 0x256   : > { %v3240_v58 = vpop.f32.mrf.mxu2  ;;  %3916 = vst.msk [vmem:[%s6130_s18 + $0x40] sm:$0xff] %vm337_vm1, %v3880_v28  ;;  %v4313_v22 = vadd.f32 %v7806_v20, %v3951_v48  ;;  %v3143_v48 = vrot.slane %v8058_v7, 2 }
 0x257   : > { %v2809_v18 = vpop.f32.mrf.mxu1  ;;  %5677 = vmatmul.msk.bf16.gmra.mxu3 %vm337_vm1, %v3697_v30  ;;  %v3706_v5 = vsel %vm3545_vm5, %v7981_v19, %v8060_v49  ;;  %v3449_v19 = vld [vmem:[%s6016_s28 + $0xa0] sm:$0x7]  ;;  %v4145_v35 = vsel %vm4112_vm7, %v4142_v32, %v4144_v29 }
 0x258   : > { %4349 = vst.msk [vmem:[%s6130_s18 + $0x38] sm:$0xff] %vm337_vm1, %v4313_v22  ;;  %v2883_v11 = vadd.f32 %v2809_v18, %v2521_v4  ;;  %v7985_v40 = vpop.f32.mrf.mxu0  ;;  %v4449_v18 = vld [vmem:[%s8673_s2 + $0x118] sm:$0xff] }
 0x259   : > { %v2954_v20 = vld [vmem:[%s6130_s18 + $0x50] sm:$0xff] }
 0x25a   : > { %v3315_v38 = vadd.f32 %v3240_v58, %v2954_v20  ;;  %2919 = vst.msk [vmem:[%s6130_s18 + $0x58] sm:$0xff] %vm337_vm1, %v2883_v11  ;;  %v8005_v41 = vpop.f32.mrf.mxu3  ;;  %v3525_v11 = vunpack.c.l.b16 %v3449_v19  ;;  %v2524_v20 = vld [vmem:[%s6130_s18 + $0x70] sm:$0xff] }
 0x25b   : > { %v3386_v63 = vld [vmem:[%s6130_s18 + $0x48] sm:$0xff] }
 0x25c   : > { %v3881_v57 = vadd.f32 %v7790_v47, %v3386_v63  ;;  %3351 = vst.msk [vmem:[%s6130_s18 + $0x50] sm:$0xff] %vm337_vm1, %v3315_v38  ;;  %v2522_v47 = vld [vmem:[%s6130_s18 + $0x60] sm:$0xff]  ;;  %v2711_v38 = vsel %vm2678_vm6, %v2708_v61, %v2710_v8  ;;  %v3144_v63 = vsel %vm2678_vm6, %v3141_v0, %v3143_v48 }
 0x25d   : > { %v3952_v42 = vld [vmem:[%s6130_s18 + $0x40] sm:$0xff]  ;;  %4627 = vperm.xlu2 %5951, %v4449_v18  }
 0x25e   : > { %v3242_v59 = vpop.f32.mrf.mxu2  ;;  %3917 = vst.msk [vmem:[%s6130_s18 + $0x48] sm:$0xff] %vm337_vm1, %v3881_v57  ;;  %v4314_v52 = vadd.f32 %v7850_v55, %v3952_v42  ;;  %v3544_v42 = vpack.c.b16 %v3525_v11, %v3525_v11 }
 0x25f   : > { %v2812_v43 = vpop.f32.mrf.mxu1 }
 0x260   : > { %4350 = vst.msk [vmem:[%s6130_s18 + $0x40] sm:$0xff] %vm337_vm1, %v4314_v52  ;;  %v2884_v55 = vadd.f32 %v2812_v43, %v2522_v47  ;;  %v8026_v15 = vpop.f32.mrf.mxu0  ;;  %v3708_v26 = vshrl.u32 %v3544_v42, 16  ;;  %v3711_v32 = vshll.u32 %v3544_v42, 16 }
 0x261   : > { %v2955_v44 = vld [vmem:[%s6130_s18 + $0x58] sm:$0xff] }
 0x262   : > { %v3316_v25 = vadd.f32 %v3242_v59, %v2955_v44  ;;  %2920 = vst.msk [vmem:[%s6130_s18 + $0x60] sm:$0xff] %vm337_vm1, %v2884_v55  ;;  %5494 = vmatmul.msk.bf16.gmra.mxu1 %vm337_vm1, %v2709_v45  ;;  %v8045_v34 = vpop.f32.mrf.mxu3  ;;  %v3710_v47 = vrot.slane %v3708_v26, 2  ;;  %v2525_v55 = vld [vmem:[%s6130_s18 + $0x78] sm:$0xff] }
 0x263   : > { %5585 = vmatmul.msk.bf16.gmra.mxu2 %vm337_vm1, %v3142_v13  ;;  %v3387_v21 = vld [vmem:[%s6130_s18 + $0x50] sm:$0xff]  ;;  %5767 = vmatmul.msk.bf16.gmra.mxu0 %vm337_vm1, %v4143_v60  ;;  %v3713_v13 = vrot.slane %v3711_v32, 3 }
 0x264   : > { %v3882_v53 = vadd.f32 %v7832_v16, %v3387_v21  ;;  %3352 = vst.msk [vmem:[%s6130_s18 + $0x58] sm:$0xff] %vm337_vm1, %v3316_v25 }
 0x265   : > { %v3953_v3 = vld [vmem:[%s6130_s18 + $0x48] sm:$0xff]  ;;  %v3714_v31 = vor.u32 %v3713_v13, %v3710_v47 }
 0x266   : > { %v3245_v14 = vpop.f32.mrf.mxu2  ;;  %3918 = vst.msk [vmem:[%s6130_s18 + $0x50] sm:$0xff] %vm337_vm1, %v3882_v53  ;;  %v4315_v16 = vadd.f32 %v7894_v46, %v3953_v3 }
 0x267   : > { %v2814_v9 = vpop.f32.mrf.mxu1  ;;  %5678 = vmatmul.msk.bf16.gmra.mxu3 %vm337_vm1, %v3706_v5  ;;  %v3715_v53 = vsel %vm3545_vm5, %v8060_v49, %v3714_v31  ;;  %v2526_v49 = vld [vmem:[%s6130_s18 + $0x80] sm:$0xff] }
 0x268   : > { %4351 = vst.msk [vmem:[%s6130_s18 + $0x48] sm:$0xff] %vm337_vm1, %v4315_v16  ;;  %v2885_v54 = vadd.f32 %v2814_v9, %v2523_v27  ;;  %v8064_v12 = vpop.f32.mrf.mxu0 }
 0x269   : > { %v2956_v46 = vld [vmem:[%s6130_s18 + $0x60] sm:$0xff] }
 0x26a   : > { %v3317_v62 = vadd.f32 %v3245_v14, %v2956_v46  ;;  %2921 = vst.msk [vmem:[%s6130_s18 + $0x68] sm:$0xff] %vm337_vm1, %v2885_v54  ;;  %v8084_v4 = vpop.f32.mrf.mxu3  ;;  %v3145_v14 = vrot.slane %v8134_v2, 2 }
 0x26b   : > { %v3388_v28 = vld [vmem:[%s6130_s18 + $0x58] sm:$0xff] }
 0x26c   : > { %v3883_v58 = vadd.f32 %v7875_v24, %v3388_v28  ;;  %3353 = vst.msk [vmem:[%s6130_s18 + $0x60] sm:$0xff] %vm337_vm1, %v3317_v62  ;;  %v3146_v46 = vsel %vm2678_vm6, %v3143_v48, %v3145_v14  ;;  %v2582_v62 = vld [vmem:[%s6016_s28 + $0x98] sm:$0x3]  ;;  %v4016_v48 = vld [vmem:[%s6016_s28 + $0xa0] sm:$0x7] }
 0x26d   : > { %v3954_v56 = vld [vmem:[%s6130_s18 + $0x50] sm:$0xff]  ;;  %v4092_v18 = vunpack.c.l.b16 %v4016_v48 }
 0x26e   : > { %v3247_v22 = vpop.f32.mrf.mxu2  ;;  %3919 = vst.msk [vmem:[%s6130_s18 + $0x58] sm:$0xff] %vm337_vm1, %v3883_v58  ;;  %v4316_v24 = vadd.f32 %v7941_v17, %v3954_v56 }
 0x26f   : > { %v2817_v30 = vpop.f32.mrf.mxu1 }
 0x270   : > { %4352 = vst.msk [vmem:[%s6130_s18 + $0x50] sm:$0xff] %vm337_vm1, %v4316_v24  ;;  %v2886_v17 = vadd.f32 %v2817_v30, %v2524_v20  ;;  %v8106_v57 = vpop.f32.mrf.mxu0  ;;  %v2527_v20 = vld [vmem:[%s6130_s18 + $0x88] sm:$0xff] }
 0x271   : > { %v2957_v61 = vld [vmem:[%s6130_s18 + $0x68] sm:$0xff] }
 0x272   : > { %v3318_v59 = vadd.f32 %v3247_v22, %v2957_v61  ;;  %2922 = vst.msk [vmem:[%s6130_s18 + $0x70] sm:$0xff] %vm337_vm1, %v2886_v17  ;;  %5495 = vmatmul.msk.bf16.gmra.mxu1 %vm337_vm1, %v2711_v38  ;;  %v8127_v45 = vpop.f32.mrf.mxu3  ;;  %v2658_v22 = vunpack.c.l.b16 %v2582_v62 }
 0x273   : > { %5586 = vmatmul.msk.bf16.gmra.mxu2 %vm337_vm1, %v3144_v63  ;;  %v3389_v23 = vld [vmem:[%s6130_s18 + $0x60] sm:$0xff]  ;;  %5768 = vmatmul.msk.bf16.gmra.mxu0 %vm337_vm1, %v4145_v35  ;;  %v4111_v35 = vpack.c.b16 %v4092_v18, %v4092_v18 }
 0x274   : > { %v3884_v0 = vadd.f32 %v7920_v33, %v3389_v23  ;;  %3354 = vst.msk [vmem:[%s6130_s18 + $0x68] sm:$0xff] %vm337_vm1, %v3318_v59  ;;  %v8131_v33 = vld [vmem:[%s6016_s28 + $0x90] sm:$0xff]  ;;  %v2677_v38 = vpack.c.b16 %v2658_v22, %v2658_v22  ;;  %v2531_v22 = vld [vmem:[%s6130_s18 + $0xa8] sm:$0xff] }
 0x275   : > { %v3955_v1 = vld [vmem:[%s6130_s18 + $0x58] sm:$0xff]  ;;  %v2712_v3 = vrot.slane %v8131_v33, 2  ;;  %v4148_v32 = vrot.slane %v4111_v35, 3 }
 0x276   : > { %v3250_v52 = vpop.f32.mrf.mxu2  ;;  %3920 = vst.msk [vmem:[%s6130_s18 + $0x60] sm:$0xff] %vm337_vm1, %v3884_v0  ;;  %v4317_v43 = vadd.f32 %v7985_v40, %v3955_v1  ;;  %v8141_v40 = vld [vmem:[%s6016_s28 + $0x98] sm:$0xff]  ;;  %v2714_v23 = vrot.slane %v2677_v38, 2 }
 0x277   : > { %v2819_v60 = vpop.f32.mrf.mxu1  ;;  %5679 = vmatmul.msk.bf16.gmra.mxu3 %vm337_vm1, %v3715_v53  ;;  %v4146_v37 = vrot.slane %v8141_v40, 3 }
 0x278   : > { %4353 = vst.msk [vmem:[%s6130_s18 + $0x58] sm:$0xff] %vm337_vm1, %v4317_v43  ;;  %v2887_v44 = vadd.f32 %v2819_v60, %v2525_v55  ;;  %v8138_v25 = vpop.f32.mrf.mxu0  ;;  %v2528_v43 = vld [vmem:[%s6130_s18 + $0x90] sm:$0xff]  ;;  %v2715_v55 = vsel %vm2678_vm6, %v2712_v3, %v2714_v23 }
 0x279   : > { %v2958_v21 = vld [vmem:[%s6130_s18 + $0x70] sm:$0xff]  ;;  %v4147_v39 = vsel %vm4112_vm7, %v4144_v29, %v4146_v37 }
 0x27a   : > { %v3319_v36 = vadd.f32 %v3250_v52, %v2958_v21  ;;  %2923 = vst.msk [vmem:[%s6130_s18 + $0x78] sm:$0xff] %vm337_vm1, %v2887_v44 }
 0x27b   : > { %v3390_v51 = vld [vmem:[%s6130_s18 + $0x68] sm:$0xff] }
 0x27c   : > { %v3885_v6 = vadd.f32 %v7966_v10, %v3390_v51  ;;  %3355 = vst.msk [vmem:[%s6130_s18 + $0x70] sm:$0xff] %vm337_vm1, %v3319_v36  ;;  %v2713_v10 = vsel %vm2678_vm6, %v2710_v8, %v2712_v3  ;;  %v8182_v8 = vpop.f32.mrf.mxu3  ;;  %v2529_v3 = vld [vmem:[%s6130_s18 + $0x98] sm:$0xff] }
 0x27d   : > { %v3956_v16 = vld [vmem:[%s6130_s18 + $0x60] sm:$0xff] }
 0x27e   : > { %v3252_v27 = vpop.f32.mrf.mxu2  ;;  %3921 = vst.msk [vmem:[%s6130_s18 + $0x68] sm:$0xff] %vm337_vm1, %v3885_v6  ;;  %v4318_v9 = vadd.f32 %v8026_v15, %v3956_v16  ;;  %v3016_v15 = vld [vmem:[%s6016_s28 + $0xa0] sm:$0x3]  ;;  %s4952_s28 = sshll.u32 %s8677_s16, 1 }
 0x27f   : > { %v2822_v54 = vpop.f32.mrf.mxu1  ;;  %v3092_v50 = vunpack.c.l.b16 %v3016_v15  ;;  %s208_s26 = scalar_lea.vmem %s8675_s4, %s4952_s28 }
 0x280   : > { %4354 = vst.msk [vmem:[%s6130_s18 + $0x60] sm:$0xff] %vm337_vm1, %v4318_v9  ;;  %v2888_v5 = vadd.f32 %v2822_v54, %v2526_v49  ;;  %v8175_v28 = vpop.f32.mrf.mxu0 }
 0x281   : > { %v2959_v7 = vld [vmem:[%s6130_s18 + $0x78] sm:$0xff]  ;;  %v3111_v63 = vpack.c.b16 %v3092_v50, %v3092_v50 }
 0x282   : > { %v3320_v58 = vadd.f32 %v3252_v27, %v2959_v7  ;;  %2924 = vst.msk [vmem:[%s6130_s18 + $0x80] sm:$0xff] %vm337_vm1, %v2888_v5  ;;  %5496 = vmatmul.msk.bf16.gmra.mxu1 %vm337_vm1, %v2713_v10 }
 0x283   : > { %5587 = vmatmul.msk.bf16.gmra.mxu2 %vm337_vm1, %v3146_v46  ;;  %v3391_v56 = vld [vmem:[%s6130_s18 + $0x70] sm:$0xff]  ;;  %5769 = vmatmul.msk.bf16.gmra.mxu0 %vm337_vm1, %v4147_v39  ;;  %v3147_v26 = vrot.slane %v3111_v63, 2  ;;  %v2530_v46 = vld [vmem:[%s6130_s18 + $0xa0] sm:$0xff] }
 0x284   : > { %v3886_v29 = vadd.f32 %v8005_v41, %v3391_v56  ;;  %3356 = vst.msk [vmem:[%s6130_s18 + $0x78] sm:$0xff] %vm337_vm1, %v3320_v58 }
 0x285   : > { %v3957_v19 = vld [vmem:[%s6130_s18 + $0x68] sm:$0xff] }
 0x286   : > { %v3255_v24 = vpop.f32.mrf.mxu2  ;;  %3922 = vst.msk [vmem:[%s6130_s18 + $0x70] sm:$0xff] %vm337_vm1, %v3886_v29  ;;  %v4319_v11 = vadd.f32 %v8064_v12, %v3957_v19  ;;  %v8207_v12 = vpop.f32.mrf.mxu3 }
 0x287   : > { %v2824_v30 = vpop.f32.mrf.mxu1 }
 0x288   : > { %4355 = vst.msk [vmem:[%s6130_s18 + $0x68] sm:$0xff] %vm337_vm1, %v4319_v11  ;;  %v2889_v41 = vadd.f32 %v2824_v30, %v2527_v20  ;;  %v8202_v17 = vpop.f32.mrf.mxu0 }
 0x289   : > { %v2960_v61 = vld [vmem:[%s6130_s18 + $0x80] sm:$0xff] }
 0x28a   : > { %v3321_v42 = vadd.f32 %v3255_v24, %v2960_v61  ;;  %2925 = vst.msk [vmem:[%s6130_s18 + $0x88] sm:$0xff] %vm337_vm1, %v2889_v41  ;;  %v2532_v41 = vld [vmem:[%s6130_s18 + $0xb0] sm:$0xff] }
 0x28b   : > { %v3392_v59 = vld [vmem:[%s6130_s18 + $0x78] sm:$0xff] }
 0x28c   : > { %v3887_v0 = vadd.f32 %v8045_v34, %v3392_v59  ;;  %3357 = vst.msk [vmem:[%s6130_s18 + $0x80] sm:$0xff] %vm337_vm1, %v3321_v42  ;;  %v3148_v34 = vsel %vm2678_vm6, %v3145_v14, %v3147_v26 }
 0x28d   : > { %v3958_v1 = vld [vmem:[%s6130_s18 + $0x70] sm:$0xff] }
 0x28e   : > { %v3257_v52 = vpop.f32.mrf.mxu2  ;;  %3923 = vst.msk [vmem:[%s6130_s18 + $0x78] sm:$0xff] %vm337_vm1, %v3887_v0  ;;  %v4320_v47 = vadd.f32 %v8106_v57, %v3958_v1  ;;  %v4149_v57 = vsel %vm4112_vm7, %v4146_v37, %v4148_v32  ;;  %v3832_v21 = vpop.f32.mrf.mxu3 }
 0x28f   : > { %v2827_v13 = vpop.f32.mrf.mxu1 }
 0x290   : > { %4356 = vst.msk [vmem:[%s6130_s18 + $0x70] sm:$0xff] %vm337_vm1, %v4320_v47  ;;  %v2890_v60 = vadd.f32 %v2827_v13, %v2528_v43  ;;  %v4261_v44 = vpop.f32.mrf.mxu0 }
 0x291   : > { %v2961_v31 = vld [vmem:[%s6130_s18 + $0x88] sm:$0xff] }
 0x292   : > { %v3322_v33 = vadd.f32 %v3257_v52, %v2961_v31  ;;  %2926 = vst.msk [vmem:[%s6130_s18 + $0x90] sm:$0xff] %vm337_vm1, %v2890_v60  ;;  %5497 = vmatmul.msk.bf16.gmra.mxu1 %vm337_vm1, %v2715_v55  ;;  %v2533_v52 = vld [vmem:[%s6130_s18 + $0xb8] sm:$0xff] }
 0x293   : > { %5588 = vmatmul.msk.bf16.gmra.mxu2 %vm337_vm1, %v3148_v34  ;;  %v3393_v2 = vld [vmem:[%s6130_s18 + $0x80] sm:$0xff]  ;;  %5770 = vmatmul.msk.bf16.gmra.mxu0 %vm337_vm1, %v4149_v57 }
 0x294   : > { %v3888_v40 = vadd.f32 %v8084_v4, %v3393_v2  ;;  %3358 = vst.msk [vmem:[%s6130_s18 + $0x88] sm:$0xff] %vm337_vm1, %v3322_v33 }
 0x295   : > { %v3959_v36 = vld [vmem:[%s6130_s18 + $0x78] sm:$0xff] }
 0x296   : > { %v3260_v53 = vpop.f32.mrf.mxu2  ;;  %3924 = vst.msk [vmem:[%s6130_s18 + $0x80] sm:$0xff] %vm337_vm1, %v3888_v40  ;;  %v4321_v51 = vadd.f32 %v8138_v25, %v3959_v36  ;;  %v3834_v10 = vpop.f32.mrf.mxu3  ;;  %v2534_v40 = vld [vmem:[%s6130_s18 + $0xc0] sm:$0xff] }
 0x297   : > { %v2829_v14 = vpop.f32.mrf.mxu1 }
 0x298   : > { %4357 = vst.msk [vmem:[%s6130_s18 + $0x78] sm:$0xff] %vm337_vm1, %v4321_v51  ;;  %v2891_v6 = vadd.f32 %v2829_v14, %v2529_v3  ;;  %v4263_v4 = vpop.f32.mrf.mxu0 }
 0x299   : > { %v2962_v37 = vld [vmem:[%s6130_s18 + $0x90] sm:$0xff] }
 0x29a   : > { %v3323_v16 = vadd.f32 %v3260_v53, %v2962_v37  ;;  %2927 = vst.msk [vmem:[%s6130_s18 + $0x98] sm:$0xff] %vm337_vm1, %v2891_v6 }
 0x29b   : > { %v3394_v27 = vld [vmem:[%s6130_s18 + $0x88] sm:$0xff] }
 0x29c   : > { %v3889_v9 = vadd.f32 %v8127_v45, %v3394_v27  ;;  %3359 = vst.msk [vmem:[%s6130_s18 + $0x90] sm:$0xff] %vm337_vm1, %v3323_v16 }
 0x29d   : > { %v3960_v25 = vld [vmem:[%s6130_s18 + $0x80] sm:$0xff] }
 0x29e   : > { %v3262_v49 = vpop.f32.mrf.mxu2  ;;  %3925 = vst.msk [vmem:[%s6130_s18 + $0x88] sm:$0xff] %vm337_vm1, %v3889_v9  ;;  %v4322_v54 = vadd.f32 %v8175_v28, %v3960_v25  ;;  %v3837_v18 = vpop.f32.mrf.mxu3  ;;  %v2535_v9 = vld [vmem:[%s6130_s18 + $0xc8] sm:$0xff] }
 0x29f   : > { %v2832_v5 = vpop.f32.mrf.mxu1 }
 0x2a0   : > { %4358 = vst.msk [vmem:[%s6130_s18 + $0x80] sm:$0xff] %vm337_vm1, %v4322_v54  ;;  %v2892_v62 = vadd.f32 %v2832_v5, %v2530_v46  ;;  %v4266_v45 = vpop.f32.mrf.mxu0 }
 0x2a1   : > { %v2963_v15 = vld [vmem:[%s6130_s18 + $0x98] sm:$0xff] }
 0x2a2   : > { %v3324_v39 = vadd.f32 %v3262_v49, %v2963_v15  ;;  %2928 = vst.msk [vmem:[%s6130_s18 + $0xa0] sm:$0xff] %vm337_vm1, %v2892_v62 }
 0x2a3   : > { %v3395_v7 = vld [vmem:[%s6130_s18 + $0x90] sm:$0xff] }
 0x2a4   : > { %v3890_v48 = vadd.f32 %v8182_v8, %v3395_v7  ;;  %3360 = vst.msk [vmem:[%s6130_s18 + $0x98] sm:$0xff] %vm337_vm1, %v3324_v39  ;;  %v2536_v39 = vld [vmem:[%s6130_s18 + $0xd0] sm:$0xff] }
 0x2a5   : > { %v3961_v28 = vld [vmem:[%s6130_s18 + $0x88] sm:$0xff] }
 0x2a6   : > { %v3265_v58 = vpop.f32.mrf.mxu2  ;;  %3926 = vst.msk [vmem:[%s6130_s18 + $0x90] sm:$0xff] %vm337_vm1, %v3890_v48  ;;  %v4323_v56 = vadd.f32 %v8202_v17, %v3961_v28 }
 0x2a7   : > { %v2834_v50 = vpop.f32.mrf.mxu1 }
 0x2a8   : > { %4359 = vst.msk [vmem:[%s6130_s18 + $0x88] sm:$0xff] %vm337_vm1, %v4323_v56  ;;  %v2893_v29 = vadd.f32 %v2834_v50, %v2531_v22  ;;  %v4268_v8 = vpop.f32.mrf.mxu0  ;;  %v8335_v56 = vpop.permute.xlu0 %4452 }
 0x2a9   : > { %v2964_v19 = vld [vmem:[%s6130_s18 + $0xa0] sm:$0xff] }
 0x2aa   : > { %v3325_v24 = vadd.f32 %v3265_v58, %v2964_v19  ;;  %2929 = vst.msk [vmem:[%s6130_s18 + $0xa8] sm:$0xff] %vm337_vm1, %v2893_v29  ;;  %v8340_v29 = vpop.permute.xlu1 %4462 }
 0x2ab   : > { %v3396_v11 = vld [vmem:[%s6130_s18 + $0x98] sm:$0xff] }
 0x2ac   : > { %v3891_v20 = vadd.f32 %v8207_v12, %v3396_v11  ;;  %3361 = vst.msk [vmem:[%s6130_s18 + $0xa0] sm:$0xff] %vm337_vm1, %v3325_v24  ;;  %v3839_v12 = vpop.f32.mrf.mxu3 }
 0x2ad   : > { %v3962_v30 = vld [vmem:[%s6130_s18 + $0x90] sm:$0xff] }
 0x2ae   : > { %v3267_v38 = vpop.f32.mrf.mxu2  ;;  %3927 = vst.msk [vmem:[%s6130_s18 + $0x98] sm:$0xff] %vm337_vm1, %v3891_v20  ;;  %v4324_v63 = vadd.f32 %v4261_v44, %v3962_v30  ;;  %v2537_v20 = vld [vmem:[%s6130_s18 + $0xd8] sm:$0xff] }
 0x2af   : > { %v2837_v17 = vpop.f32.mrf.mxu1 }
 0x2b0   : > { %4360 = vst.msk [vmem:[%s6130_s18 + $0x90] sm:$0xff] %vm337_vm1, %v4324_v63  ;;  %v2894_v35 = vadd.f32 %v2837_v17, %v2532_v41  ;;  %v4271_v59 = vpop.f32.mrf.mxu0  ;;  %v8351_v63 = vpop.permute.xlu2 %4472 }
 0x2b1   : > { %v2965_v61 = vld [vmem:[%s6130_s18 + $0xa8] sm:$0xff] }
 0x2b2   : > { %v3326_v42 = vadd.f32 %v3267_v38, %v2965_v61  ;;  %2930 = vst.msk [vmem:[%s6130_s18 + $0xb0] sm:$0xff] %vm337_vm1, %v2894_v35 }
 0x2b3   : > { %v3397_v23 = vld [vmem:[%s6130_s18 + $0xa0] sm:$0xff] }
 0x2b4   : > { %v3892_v26 = vadd.f32 %v3832_v21, %v3397_v23  ;;  %3362 = vst.msk [vmem:[%s6130_s18 + $0xa8] sm:$0xff] %vm337_vm1, %v3326_v42  ;;  %v3842_v44 = vpop.f32.mrf.mxu3  ;;  %v8356_v42 = vpop.permute.xlu0 %4457 }
 0x2b5   : > { %v3963_v0 = vld [vmem:[%s6130_s18 + $0x98] sm:$0xff]  ;;  %v8361_v23 = vpop.permute.xlu1 %4467 }
 0x2b6   : > { %v3270_v32 = vpop.f32.mrf.mxu2  ;;  %3928 = vst.msk [vmem:[%s6130_s18 + $0xa0] sm:$0xff] %vm337_vm1, %v3892_v26  ;;  %v4325_v1 = vadd.f32 %v4263_v4, %v3963_v0 }
 0x2b7   : > { %v2839_v47 = vpop.f32.mrf.mxu1 }
 0x2b8   : > { %4361 = vst.msk [vmem:[%s6130_s18 + $0x98] sm:$0xff] %vm337_vm1, %v4325_v1  ;;  %v2895_v43 = vadd.f32 %v2839_v47, %v2533_v52  ;;  %v4273_v57 = vpop.f32.mrf.mxu0  ;;  %v2538_v1 = vld [vmem:[%s6130_s18 + $0xe0] sm:$0xff] }
 0x2b9   : > { %v2966_v13 = vld [vmem:[%s6130_s18 + $0xb0] sm:$0xff] }
 0x2ba   : > { %v3327_v55 = vadd.f32 %v3270_v32, %v2966_v13  ;;  %2931 = vst.msk [vmem:[%s6130_s18 + $0xb8] sm:$0xff] %vm337_vm1, %v2895_v43 }
 0x2bb   : > { %v3398_v34 = vld [vmem:[%s6130_s18 + $0xa8] sm:$0xff] }
 0x2bc   : > { %v3893_v60 = vadd.f32 %v3834_v10, %v3398_v34  ;;  %3363 = vst.msk [vmem:[%s6130_s18 + $0xb0] sm:$0xff] %vm337_vm1, %v3327_v55  ;;  %v3844_v16 = vpop.f32.mrf.mxu3  ;;  %v8372_v55 = vpop.permute.xlu2 %4477 }
 0x2bd   : > { %v3964_v31 = vld [vmem:[%s6130_s18 + $0xa0] sm:$0xff]  ;;  %v8374_v34 = vpop.permute.xlu0 %4482 }
 0x2be   : > { %v3272_v33 = vpop.f32.mrf.mxu2  ;;  %3929 = vst.msk [vmem:[%s6130_s18 + $0xa8] sm:$0xff] %vm337_vm1, %v3893_v60  ;;  %v4326_v2 = vadd.f32 %v4266_v45, %v3964_v31 }
 0x2bf   : > { %v2842_v21 = vpop.f32.mrf.mxu1 }
 0x2c0   : > { %4362 = vst.msk [vmem:[%s6130_s18 + $0xa0] sm:$0xff] %vm337_vm1, %v4326_v2  ;;  %v2896_v36 = vadd.f32 %v2842_v21, %v2534_v40  ;;  %v4276_v27 = vpop.f32.mrf.mxu0 }
 0x2c1   : > { %v2967_v53 = vld [vmem:[%s6130_s18 + $0xb8] sm:$0xff] }
 0x2c2   : > { %v3328_v51 = vadd.f32 %v3272_v33, %v2967_v53  ;;  %2932 = vst.msk [vmem:[%s6130_s18 + $0xc0] sm:$0xff] %vm337_vm1, %v2896_v36  ;;  %v8379_v33 = vpop.permute.xlu1 %4487  ;;  %v2539_v36 = vld [vmem:[%s6130_s18 + $0xe8] sm:$0xff] }
 0x2c3   : > { %v3399_v3 = vld [vmem:[%s6130_s18 + $0xb0] sm:$0xff] }
 0x2c4   : > { %v3894_v14 = vadd.f32 %v3837_v18, %v3399_v3  ;;  %3364 = vst.msk [vmem:[%s6130_s18 + $0xb8] sm:$0xff] %vm337_vm1, %v3328_v51  ;;  %v3847_v28 = vpop.f32.mrf.mxu3 }
 0x2c5   : > { %v3965_v6 = vld [vmem:[%s6130_s18 + $0xa8] sm:$0xff] }
 0x2c6   : > { %v3275_v4 = vpop.f32.mrf.mxu2  ;;  %3930 = vst.msk [vmem:[%s6130_s18 + $0xb0] sm:$0xff] %vm337_vm1, %v3894_v14  ;;  %v4327_v37 = vadd.f32 %v4268_v8, %v3965_v6  ;;  %v8390_v6 = vpop.permute.xlu2 %4492 }
 0x2c7   : > { %v2844_v25 = vpop.f32.mrf.mxu1 }
 0x2c8   : > { %4363 = vst.msk [vmem:[%s6130_s18 + $0xa8] sm:$0xff] %vm337_vm1, %v4327_v37  ;;  %v2897_v49 = vadd.f32 %v2844_v25, %v2535_v9  ;;  %v4278_v58 = vpop.f32.mrf.mxu0 }
 0x2c9   : > { %v2968_v54 = vld [vmem:[%s6130_s18 + $0xc0] sm:$0xff] }
 0x2ca   : > { %v3329_v10 = vadd.f32 %v3275_v4, %v2968_v54  ;;  %2933 = vst.msk [vmem:[%s6130_s18 + $0xc8] sm:$0xff] %vm337_vm1, %v2897_v49  ;;  %v8392_v4 = vpop.permute.xlu0 %4497 }
 0x2cb   : > { %v3400_v46 = vld [vmem:[%s6130_s18 + $0xb8] sm:$0xff] }
 0x2cc   : > { %v3895_v5 = vadd.f32 %v3839_v12, %v3400_v46  ;;  %3365 = vst.msk [vmem:[%s6130_s18 + $0xc0] sm:$0xff] %vm337_vm1, %v3329_v10  ;;  %v3849_v35 = vpop.f32.mrf.mxu3  ;;  %v2540_v46 = vld [vmem:[%s6130_s18 + $0xf0] sm:$0xff] }
 0x2cd   : > { %v3966_v62 = vld [vmem:[%s6130_s18 + $0xb0] sm:$0xff] }
 0x2ce   : > { %v3277_v45 = vpop.f32.mrf.mxu2  ;;  %3931 = vst.msk [vmem:[%s6130_s18 + $0xb8] sm:$0xff] %vm337_vm1, %v3895_v5  ;;  %v4328_v15 = vadd.f32 %v4271_v59, %v3966_v62 }
 0x2cf   : > { %v2847_v7 = vpop.f32.mrf.mxu1 }
 0x2d0   : > { %4364 = vst.msk [vmem:[%s6130_s18 + $0xb0] sm:$0xff] %vm337_vm1, %v4328_v15  ;;  %v2898_v48 = vadd.f32 %v2847_v7, %v2536_v39  ;;  %v4281_v61 = vpop.f32.mrf.mxu0  ;;  %v4379_v39 = vld [vmem:[%s6130_s18 + $0x8] sm:$0xff]  ;;  %v8409_v7 = vpop.permute.xlu2 %4507 }
 0x2d1   : > { %v2969_v22 = vld [vmem:[%s6130_s18 + $0xc8] sm:$0xff] }
 0x2d2   : > { %v3330_v50 = vadd.f32 %v3277_v45, %v2969_v22  ;;  %2934 = vst.msk [vmem:[%s6130_s18 + $0xd0] sm:$0xff] %vm337_vm1, %v2898_v48  ;;  %v8411_v48 = vpop.permute.xlu0 %4512 }
 0x2d3   : > { %v3401_v18 = vld [vmem:[%s6130_s18 + $0xc0] sm:$0xff] }
 0x2d4   : > { %v3896_v8 = vadd.f32 %v3842_v44, %v3401_v18  ;;  %3366 = vst.msk [vmem:[%s6130_s18 + $0xc8] sm:$0xff] %vm337_vm1, %v3330_v50  ;;  %v4380_v50 = vld [vmem:[%s6130_s18 + $0x10] sm:$0xff] }
 0x2d5   : > { %v3967_v19 = vld [vmem:[%s6130_s18 + $0xb8] sm:$0xff] }
 0x2d6   : > { %v3280_v24 = vpop.f32.mrf.mxu2  ;;  %3932 = vst.msk [vmem:[%s6130_s18 + $0xc0] sm:$0xff] %vm337_vm1, %v3896_v8  ;;  %v4329_v11 = vadd.f32 %v4273_v57, %v3967_v19  ;;  %v3852_v57 = vpop.f32.mrf.mxu3 }
 0x2d7   : > { %v2849_v30 = vpop.f32.mrf.mxu1 }
 0x2d8   : > { %4365 = vst.msk [vmem:[%s6130_s18 + $0xb8] sm:$0xff] %vm337_vm1, %v4329_v11  ;;  %v2899_v38 = vadd.f32 %v2849_v30, %v2537_v20  ;;  %v4283_v31 = vpop.f32.mrf.mxu0  ;;  %v4381_v11 = vld [vmem:[%s6130_s18 + $0x18] sm:$0xff] }
 0x2d9   : > { %v2970_v41 = vld [vmem:[%s6130_s18 + $0xd0] sm:$0xff] }
 0x2da   : > { %v3331_v17 = vadd.f32 %v3280_v24, %v2970_v41  ;;  %2935 = vst.msk [vmem:[%s6130_s18 + $0xd8] sm:$0xff] %vm337_vm1, %v2899_v38  ;;  %v4631_v24 = vmul.f32 %v8356_v42, %v4379_v39  ;;  %v2541_v38 = vld [vmem:[%s6130_s18 + $0xf8] sm:$0xff] }
 0x2db   : > { %v3402_v12 = vld [vmem:[%s6130_s18 + $0xc8] sm:$0xff] }
 0x2dc   : > { %v3897_v59 = vadd.f32 %v3844_v16, %v3402_v12  ;;  %3367 = vst.msk [vmem:[%s6130_s18 + $0xd0] sm:$0xff] %vm337_vm1, %v3331_v17  ;;  %v4632_v17 = vmul.f32 %v8340_v29, %v4380_v50 }
 0x2dd   : > { %v3968_v26 = vld [vmem:[%s6130_s18 + $0xc0] sm:$0xff] }
 0x2de   : > { %v3282_v0 = vpop.f32.mrf.mxu2  ;;  %3933 = vst.msk [vmem:[%s6130_s18 + $0xc8] sm:$0xff] %vm337_vm1, %v3897_v59  ;;  %v4330_v32 = vadd.f32 %v4276_v27, %v3968_v26  ;;  %v8397_v27 = vpop.permute.xlu1 %4502  ;;  %v4633_v59 = vmul.f32 %v8361_v23, %v4381_v11  ;;  %v4747_v23 = vmul.f32 %v4632_v17, %v4632_v17 }
 0x2df   : > { %v2852_v52 = vpop.f32.mrf.mxu1  ;;  %v3854_v54 = vpop.f32.mrf.mxu3 }
 0x2e0   : > { %4366 = vst.msk [vmem:[%s6130_s18 + $0xc0] sm:$0xff] %vm337_vm1, %v4330_v32  ;;  %v2900_v47 = vadd.f32 %v2852_v52, %v2538_v1  ;;  %v4286_v10 = vpop.f32.mrf.mxu0  ;;  %v4383_v1 = vld [vmem:[%s6130_s18 + $0x28] sm:$0xff]  ;;  %v8439_v52 = vpop.permute.xlu2 %4522 }
 0x2e1   : > { %v2971_v43 = vld [vmem:[%s6130_s18 + $0xd8] sm:$0xff] }
 0x2e2   : > { %v3332_v13 = vadd.f32 %v3282_v0, %v2971_v43  ;;  %2936 = vst.msk [vmem:[%s6130_s18 + $0xe0] sm:$0xff] %vm337_vm1, %v2900_v47  ;;  %v4746_v0 = vmul.f32 %v4631_v24, %v4631_v24  ;;  %v8441_v47 = vpop.permute.xlu0 %4527 }
 0x2e3   : > { %v3403_v60 = vld [vmem:[%s6130_s18 + $0xd0] sm:$0xff] }
 0x2e4   : > { %v3898_v44 = vadd.f32 %v3847_v28, %v3403_v60  ;;  %3368 = vst.msk [vmem:[%s6130_s18 + $0xd8] sm:$0xff] %vm337_vm1, %v3332_v13  ;;  %v4667_v13 = vsel %vm337_vm1, %v4631_v24, 0.0 }
 0x2e5   : > { %v3969_v2 = vld [vmem:[%s6130_s18 + $0xc8] sm:$0xff] }
 0x2e6   : > { %v3285_v40 = vpop.f32.mrf.mxu2  ;;  %3934 = vst.msk [vmem:[%s6130_s18 + $0xd0] sm:$0xff] %vm337_vm1, %v3898_v44  ;;  %v4331_v21 = vadd.f32 %v4278_v58, %v3969_v2  ;;  %v4378_v58 = vld [vmem:[%s6130_s18] sm:$0xff]  ;;  %v8418_v18 = vpop.permute.xlu1 %4517 }
 0x2e7   : > { %v2854_v53 = vpop.f32.mrf.mxu1  ;;  %v4630_v30 = vmul.f32 %v8335_v56, %v4378_v58  ;;  %v3857_v12 = vpop.f32.mrf.mxu3 }
 0x2e8   : > { %4367 = vst.msk [vmem:[%s6130_s18 + $0xc8] sm:$0xff] %vm337_vm1, %v4331_v21  ;;  %v2901_v51 = vadd.f32 %v2854_v53, %v2539_v36  ;;  %v8431_v42 = vpop.f32.mrf.mxu0  ;;  %v4782_v21 = vsel %vm337_vm1, %v4746_v0, 0.0  ;;  %v4669_v36 = vsel %vm337_vm1, %v4632_v17, 0.0  ;;  %v4635_v53 = vmul.f32 %v8372_v55, %v4383_v1 }
 0x2e9   : > { %v2972_v3 = vld [vmem:[%s6130_s18 + $0xe0] sm:$0xff]  ;;  %v4745_v32 = vmul.f32 %v4630_v30, %v4630_v30  ;;  %v4666_v44 = vsel %vm337_vm1, %v4630_v30, 0.0 }
 0x2ea   : > { %v3333_v14 = vadd.f32 %v3285_v40, %v2972_v3  ;;  %2937 = vst.msk [vmem:[%s6130_s18 + $0xe8] sm:$0xff] %vm337_vm1, %v2901_v51  ;;  %v8478_v30 = vpop.permute.xlu0 %4542 }
 0x2eb   : > { %v3404_v37 = vld [vmem:[%s6130_s18 + $0xd8] sm:$0xff]  ;;  %v4781_v3 = vsel %vm337_vm1, %v4745_v32, 0.0 }
 0x2ec   : > { %v3899_v16 = vadd.f32 %v3849_v35, %v3404_v37  ;;  %3369 = vst.msk [vmem:[%s6130_s18 + $0xe0] sm:$0xff] %vm337_vm1, %v3333_v14  ;;  %v4382_v35 = vld [vmem:[%s6130_s18 + $0x20] sm:$0xff]  ;;  %v4668_v14 = vadd.f32 %v4667_v13, %v4666_v44  ;;  %v2543_v44 = vld [vmem:[%s6130_s18 + $0x108] sm:$0xff] }
 0x2ed   : > { %v3970_v9 = vld [vmem:[%s6130_s18 + $0xd0] sm:$0xff]  ;;  %v4634_v29 = vmul.f32 %v8351_v63, %v4382_v35 }
 0x2ee   : > { %v3287_v25 = vpop.f32.mrf.mxu2  ;;  %3935 = vst.msk [vmem:[%s6130_s18 + $0xd8] sm:$0xff] %vm337_vm1, %v3899_v16  ;;  %v4332_v49 = vadd.f32 %v4281_v61, %v3970_v9  ;;  %v8449_v63 = vpop.permute.xlu1 %4532  ;;  %v4385_v16 = vld [vmem:[%s6130_s18 + $0x38] sm:$0xff]  ;;  %v2542_v9 = vld [vmem:[%s6130_s18 + $0x100] sm:$0xff]  ;;  %v4388_v35 = vld [vmem:[%s6130_s18 + $0x50] sm:$0xff] }
 0x2ef   : > { %v2857_v5 = vpop.f32.mrf.mxu1  ;;  %v4749_v37 = vmul.f32 %v4634_v29, %v4634_v29  ;;  %v4673_v39 = vsel %vm337_vm1, %v4634_v29, 0.0  ;;  %v4637_v58 = vmul.f32 %v8379_v33, %v4385_v16  ;;  %v4675_v33 = vsel %vm337_vm1, %v4635_v53, 0.0 }
 0x2f0   : > { %4368 = vst.msk [vmem:[%s6130_s18 + $0xd0] sm:$0xff] %vm337_vm1, %v4332_v49  ;;  %v2902_v62 = vadd.f32 %v2857_v5, %v2540_v46  ;;  %v4784_v49 = vsel %vm337_vm1, %v4747_v23, 0.0  ;;  %v4670_v5 = vadd.f32 %v4669_v36, %v4668_v14 }
 0x2f1   : > { %v2973_v45 = vld [vmem:[%s6130_s18 + $0xe8] sm:$0xff]  ;;  %v4788_v11 = vsel %vm337_vm1, %v4749_v37, 0.0 }
 0x2f2   : > { %v3334_v15 = vadd.f32 %v3287_v25, %v2973_v45  ;;  %2938 = vst.msk [vmem:[%s6130_s18 + $0xf0] sm:$0xff] %vm337_vm1, %v2902_v62  ;;  %v4386_v45 = vld [vmem:[%s6130_s18 + $0x40] sm:$0xff] }
 0x2f3   : > { %v3405_v28 = vld [vmem:[%s6130_s18 + $0xe0] sm:$0xff]  ;;  %v4638_v17 = vmul.f32 %v8390_v6, %v4386_v45  ;;  %v4752_v6 = vmul.f32 %v4637_v58, %v4637_v58 }
 0x2f4   : > { %v3900_v22 = vadd.f32 %v3852_v57, %v3405_v28  ;;  %3370 = vst.msk [vmem:[%s6130_s18 + $0xe8] sm:$0xff] %vm337_vm1, %v3334_v15  ;;  %v4748_v57 = vmul.f32 %v4633_v59, %v4633_v59  ;;  %v4750_v28 = vmul.f32 %v4635_v53, %v4635_v53 }
 0x2f5   : > { %v3971_v8 = vld [vmem:[%s6130_s18 + $0xd8] sm:$0xff]  ;;  %v4681_v14 = vsel %vm337_vm1, %v4638_v17, 0.0 }
 0x2f6   : > { %v3290_v19 = vpop.f32.mrf.mxu2  ;;  %3936 = vst.msk [vmem:[%s6130_s18 + $0xe0] sm:$0xff] %vm337_vm1, %v3900_v22  ;;  %v4333_v20 = vadd.f32 %v4283_v31, %v3971_v8  ;;  %v4384_v31 = vld [vmem:[%s6130_s18 + $0x30] sm:$0xff]  ;;  %v4786_v62 = vsel %vm337_vm1, %v4748_v57, 0.0  ;;  %v4387_v22 = vld [vmem:[%s6130_s18 + $0x48] sm:$0xff]  ;;  %v8473_v8 = vpop.f32.mrf.mxu0  ;;  %v4790_v1 = vsel %vm337_vm1, %v4750_v28, 0.0 }
 0x2f7   : > { %v2859_v41 = vpop.f32.mrf.mxu1  ;;  %v4636_v55 = vmul.f32 %v8374_v34, %v4384_v31  ;;  %v3859_v34 = vpop.f32.mrf.mxu3  ;;  %v4639_v0 = vmul.f32 %v8392_v4, %v4387_v22  ;;  %v4640_v4 = vmul.f32 %v8397_v27, %v4388_v35  ;;  %v4794_v27 = vsel %vm337_vm1, %v4752_v6, 0.0 }
 0x2f8   : > { %4369 = vst.msk [vmem:[%s6130_s18 + $0xd8] sm:$0xff] %vm337_vm1, %v4333_v20  ;;  %v2903_v61 = vadd.f32 %v2859_v41, %v2541_v38  ;;  %v8476_v20 = vpop.permute.xlu2 %4537 }
 0x2f9   : > { %v2974_v26 = vld [vmem:[%s6130_s18 + $0xf0] sm:$0xff]  ;;  %v4751_v41 = vmul.f32 %v4636_v55, %v4636_v55  ;;  %v4754_v53 = vmul.f32 %v4639_v0, %v4639_v0 }
 0x2fa   : > { %v3335_v56 = vadd.f32 %v3290_v19, %v2974_v26  ;;  %2939 = vst.msk [vmem:[%s6130_s18 + $0xf8] sm:$0xff] %vm337_vm1, %v2903_v61 }
 0x2fb   : > { %v3406_v43 = vld [vmem:[%s6130_s18 + $0xe8] sm:$0xff]  ;;  %v4792_v31 = vsel %vm337_vm1, %v4751_v41, 0.0  ;;  %v4798_v22 = vsel %vm337_vm1, %v4754_v53, 0.0 }
 0x2fc   : > { %v3901_v60 = vadd.f32 %v3854_v54, %v3406_v43  ;;  %3371 = vst.msk [vmem:[%s6130_s18 + $0xf0] sm:$0xff] %vm337_vm1, %v3335_v56  ;;  %v4671_v54 = vsel %vm337_vm1, %v4633_v59, 0.0  ;;  %v8487_v56 = vpop.permute.xlu1 %4547  ;;  %v4677_v43 = vsel %vm337_vm1, %v4636_v55, 0.0 }
 0x2fd   : > { %v3972_v2 = vld [vmem:[%s6130_s18 + $0xe0] sm:$0xff]  ;;  %v4672_v24 = vadd.f32 %v4671_v54, %v4670_v5  ;;  %v4391_v54 = vld [vmem:[%s6130_s18 + $0x68] sm:$0xff] }
 0x2fe   : > { %v3292_v40 = vpop.f32.mrf.mxu2  ;;  %3937 = vst.msk [vmem:[%s6130_s18 + $0xe8] sm:$0xff] %vm337_vm1, %v3901_v60  ;;  %v4334_v51 = vadd.f32 %v4286_v10, %v3972_v2  ;;  %v4783_v10 = vadd.f32 %v4782_v21, %v4781_v3  ;;  %v4389_v60 = vld [vmem:[%s6130_s18 + $0x58] sm:$0xff]  ;;  %v4679_v2 = vsel %vm337_vm1, %v4637_v58, 0.0 }
 0x2ff   : > { %v2862_v25 = vpop.f32.mrf.mxu1  ;;  %v4674_v26 = vadd.f32 %v4673_v39, %v4672_v24  ;;  %v4641_v37 = vmul.f32 %v8409_v7, %v4389_v60  ;;  %v4293_v39 = vpop.f32.mrf.mxu0 }
 0x300   : > { %4370 = vst.msk [vmem:[%s6130_s18 + $0xe0] sm:$0xff] %vm337_vm1, %v4334_v51  ;;  %v2904_v46 = vadd.f32 %v2862_v25, %v2542_v9  ;;  %v4785_v19 = vadd.f32 %v4784_v49, %v4783_v10  ;;  %v4390_v51 = vld [vmem:[%s6130_s18 + $0x60] sm:$0xff]  ;;  %v4755_v49 = vmul.f32 %v4640_v4, %v4640_v4  ;;  %v8510_v55 = vpop.permute.xlu2 %4552 }
 0x301   : > { %v2975_v15 = vld [vmem:[%s6130_s18 + $0xf8] sm:$0xff]  ;;  %v4676_v23 = vadd.f32 %v4675_v33, %v4674_v26  ;;  %v4642_v7 = vmul.f32 %v8411_v48, %v4390_v51  ;;  %v4643_v48 = vmul.f32 %v8418_v18, %v4391_v54 }
 0x302   : > { %v3336_v50 = vadd.f32 %v3292_v40, %v2975_v15  ;;  %2940 = vst.msk [vmem:[%s6130_s18 + $0x100] sm:$0xff] %vm337_vm1, %v2904_v46  ;;  %v4787_v59 = vadd.f32 %v4786_v62, %v4785_v19  ;;  %v4753_v40 = vmul.f32 %v4638_v17, %v4638_v17  ;;  %v8512_v46 = vpop.permute.xlu0 %4557  ;;  %v4683_v62 = vsel %vm337_vm1, %v4639_v0, 0.0  ;;  %v3862_v15 = vpop.f32.mrf.mxu3 }
 0x303   : > { %v3407_v38 = vld [vmem:[%s6130_s18 + $0xf0] sm:$0xff]  ;;  %v4800_v35 = vsel %vm337_vm1, %v4755_v49, 0.0  ;;  %v4687_v0 = vsel %vm337_vm1, %v4641_v37, 0.0 }
 0x304   : > { %v3902_v61 = vadd.f32 %v3857_v12, %v3407_v38  ;;  %3372 = vst.msk [vmem:[%s6130_s18 + $0xf8] sm:$0xff] %vm337_vm1, %v3336_v50  ;;  %v4789_v13 = vadd.f32 %v4788_v11, %v4787_v59  ;;  %v4796_v5 = vsel %vm337_vm1, %v4753_v40, 0.0  ;;  %v4392_v50 = vld [vmem:[%s6130_s18 + $0x70] sm:$0xff]  ;;  %v4685_v11 = vsel %vm337_vm1, %v4640_v4, 0.0 }
 0x305   : > { %v3973_v32 = vld [vmem:[%s6130_s18 + $0xe8] sm:$0xff]  ;;  %v4756_v38 = vmul.f32 %v4641_v37, %v4641_v37  ;;  %v2544_v59 = vld [vmem:[%s6130_s18 + $0x110] sm:$0xff]  ;;  %v4644_v18 = vmul.f32 %v8439_v52, %v4392_v50  ;;  %v4758_v4 = vmul.f32 %v4643_v48, %v4643_v48  ;;  %v4691_v40 = vsel %vm337_vm1, %v4643_v48, 0.0 }
 0x306   : > { %v3295_v29 = vpop.f32.mrf.mxu2  ;;  %3938 = vst.msk [vmem:[%s6130_s18 + $0xf0] sm:$0xff] %vm337_vm1, %v3902_v61  ;;  %v4335_v12 = vadd.f32 %v8431_v42, %v3973_v32  ;;  %v4791_v36 = vadd.f32 %v4790_v1, %v4789_v13  ;;  %v4678_v42 = vadd.f32 %v4677_v43, %v4676_v23  ;;  %v8530_v61 = vpop.permute.xlu1 %4562  ;;  %v4757_v32 = vmul.f32 %v4642_v7, %v4642_v7 }
 0x307   : > { %v2864_v57 = vpop.f32.mrf.mxu1  ;;  %v4802_v13 = vsel %vm337_vm1, %v4756_v38, 0.0  ;;  %v4689_v23 = vsel %vm337_vm1, %v4642_v7, 0.0  ;;  %v4806_v37 = vsel %vm337_vm1, %v4758_v4, 0.0  ;;  %v4296_v54 = vpop.f32.mrf.mxu0  ;;  %v4397_v7 = vld [vmem:[%s6130_s18 + $0x98] sm:$0xff] }
 0x308   : > { %4371 = vst.msk [vmem:[%s6130_s18 + $0xe8] sm:$0xff] %vm337_vm1, %v4335_v12  ;;  %v2905_v21 = vadd.f32 %v2864_v57, %v2543_v44  ;;  %v4793_v9 = vadd.f32 %v4792_v31, %v4791_v36  ;;  %v4680_v25 = vadd.f32 %v4679_v2, %v4678_v42  ;;  %v4395_v31 = vld [vmem:[%s6130_s18 + $0x88] sm:$0xff] }
 0x309   : > { %v2976_v3 = vld [vmem:[%s6130_s18 + $0x100] sm:$0xff] }
 0x30a   : > { %v3337_v16 = vadd.f32 %v3295_v29, %v2976_v3  ;;  %2941 = vst.msk [vmem:[%s6130_s18 + $0x108] sm:$0xff] %vm337_vm1, %v2905_v21  ;;  %v4795_v28 = vadd.f32 %v4794_v27, %v4793_v9  ;;  %v4682_v58 = vadd.f32 %v4681_v14, %v4680_v25  ;;  %v4394_v29 = vld [vmem:[%s6130_s18 + $0x80] sm:$0xff]  ;;  %v4759_v21 = vmul.f32 %v4644_v18, %v4644_v18  ;;  %v4396_v3 = vld [vmem:[%s6130_s18 + $0x90] sm:$0xff]  ;;  %v8552_v27 = vpop.permute.xlu2 %4567  ;;  %v3864_v49 = vpop.f32.mrf.mxu3 }
 0x30b   : > { %v3408_v10 = vld [vmem:[%s6130_s18 + $0xf8] sm:$0xff]  ;;  %v4646_v57 = vmul.f32 %v8449_v63, %v4394_v29  ;;  %v8554_v63 = vpop.permute.xlu0 %4572  ;;  %v4647_v9 = vmul.f32 %v8476_v20, %v4395_v31 }
 0x30c   : > { %v3903_v45 = vadd.f32 %v3859_v34, %v3408_v10  ;;  %3373 = vst.msk [vmem:[%s6130_s18 + $0x100] sm:$0xff] %vm337_vm1, %v3337_v16  ;;  %v4393_v34 = vld [vmem:[%s6130_s18 + $0x78] sm:$0xff]  ;;  %v4797_v41 = vadd.f32 %v4796_v5, %v4795_v28  ;;  %v4684_v17 = vadd.f32 %v4683_v62, %v4682_v58  ;;  %v4693_v16 = vsel %vm337_vm1, %v4644_v18, 0.0 }
 0x30d   : > { %v3974_v19 = vld [vmem:[%s6130_s18 + $0xf0] sm:$0xff]  ;;  %v4645_v6 = vmul.f32 %v8441_v47, %v4393_v34  ;;  %v4804_v47 = vsel %vm337_vm1, %v4757_v32, 0.0  ;;  %v4761_v62 = vmul.f32 %v4646_v57, %v4646_v57  ;;  %v4808_v58 = vsel %vm337_vm1, %v4759_v21, 0.0  ;;  %v4402_v21 = vld [vmem:[%s6130_s18 + $0xc0] sm:$0xff] }
 0x30e   : > { %v3297_v24 = vpop.f32.mrf.mxu2  ;;  %3939 = vst.msk [vmem:[%s6130_s18 + $0xf8] sm:$0xff] %vm337_vm1, %v3903_v45  ;;  %v4336_v33 = vadd.f32 %v8473_v8, %v3974_v19  ;;  %v4799_v1 = vadd.f32 %v4798_v22, %v4797_v41  ;;  %v4686_v43 = vadd.f32 %v4685_v11, %v4684_v17  ;;  %v4648_v22 = vmul.f32 %v8478_v30, %v4396_v3  ;;  %v4398_v11 = vld [vmem:[%s6130_s18 + $0xa0] sm:$0xff]  ;;  %v8571_v38 = vpop.permute.xlu1 %4577  ;;  %v4399_v30 = vld [vmem:[%s6130_s18 + $0xa8] sm:$0xff] }
 0x30f   : > { %v2867_v26 = vpop.f32.mrf.mxu1  ;;  %v4760_v51 = vmul.f32 %v4645_v6, %v4645_v6  ;;  %v4695_v20 = vsel %vm337_vm1, %v4645_v6, 0.0  ;;  %v4697_v34 = vsel %vm337_vm1, %v4646_v57, 0.0  ;;  %v4649_v41 = vmul.f32 %v8487_v56, %v4397_v7  ;;  %v4400_v6 = vld [vmem:[%s6130_s18 + $0xb0] sm:$0xff] }
 0x310   : > { %4372 = vst.msk [vmem:[%s6130_s18 + $0xf0] sm:$0xff] %vm337_vm1, %v4336_v33  ;;  %v2906_v8 = vadd.f32 %v2867_v26, %v2544_v59  ;;  %v4801_v52 = vadd.f32 %v4800_v35, %v4799_v1  ;;  %v4688_v44 = vadd.f32 %v4687_v0, %v4686_v43  ;;  %v4762_v33 = vmul.f32 %v4647_v9, %v4647_v9 }
 0x311   : > { %v2977_v12 = vld [vmem:[%s6130_s18 + $0x108] sm:$0xff]  ;;  %v4812_v26 = vsel %vm337_vm1, %v4761_v62, 0.0  ;;  %v4699_v32 = vsel %vm337_vm1, %v4647_v9, 0.0  ;;  %v4763_v18 = vmul.f32 %v4648_v22, %v4648_v22  ;;  %v4650_v29 = vmul.f32 %v8510_v55, %v4398_v11 }
 0x312   : > { %v3338_v60 = vadd.f32 %v3297_v24, %v2977_v12  ;;  %2942 = vst.msk [vmem:[%s6130_s18 + $0x110] sm:$0xff] %vm337_vm1, %v2906_v8  ;;  %v4803_v42 = vadd.f32 %v4802_v13, %v4801_v52  ;;  %v4690_v53 = vadd.f32 %v4689_v23, %v4688_v44  ;;  %v4810_v24 = vsel %vm337_vm1, %v4760_v51, 0.0  ;;  %v4401_v44 = vld [vmem:[%s6130_s18 + $0xb8] sm:$0xff]  ;;  %v4583_v57 = vpop.permute.xlu2 %4582  ;;  %v4403_v62 = vld [vmem:[%s6130_s18 + $0xc8] sm:$0xff] }
 0x313   : > { %v3409_v2 = vld [vmem:[%s6130_s18 + $0x100] sm:$0xff]  ;;  %v4651_v43 = vmul.f32 %v8512_v46, %v4399_v30  ;;  %v4814_v13 = vsel %vm337_vm1, %v4762_v33, 0.0  ;;  %v4701_v23 = vsel %vm337_vm1, %v4648_v22, 0.0  ;;  %v4764_v4 = vmul.f32 %v4649_v41, %v4649_v41 }
 0x314   : > { %v3904_v36 = vadd.f32 %v3862_v15, %v3409_v2  ;;  %3374 = vst.msk [vmem:[%s6130_s18 + $0x108] sm:$0xff] %vm337_vm1, %v3338_v60  ;;  %v4805_v10 = vadd.f32 %v4804_v47, %v4803_v42  ;;  %v4692_v5 = vadd.f32 %v4691_v40, %v4690_v53  ;;  %v2545_v15 = vld [vmem:[%s6130_s18 + $0x118] sm:$0xff]  ;;  %v4816_v31 = vsel %vm337_vm1, %v4763_v18, 0.0  ;;  %v4588_v40 = vpop.permute.xlu0 %4587 }
 0x315   : > { %v3975_v14 = vld [vmem:[%s6130_s18 + $0xf8] sm:$0xff]  ;;  %v4703_v46 = vsel %vm337_vm1, %v4649_v41, 0.0  ;;  %v4765_v2 = vmul.f32 %v4650_v29, %v4650_v29  ;;  %v4652_v47 = vmul.f32 %v8530_v61, %v4400_v6  ;;  %v4766_v51 = vmul.f32 %v4651_v43, %v4651_v43 }
 0x316   : > { %3940 = vst.msk [vmem:[%s6130_s18 + $0x100] sm:$0xff] %vm337_vm1, %v3904_v36  ;;  %v4337_v25 = vadd.f32 %v4293_v39, %v3975_v14  ;;  %v3300_v45 = vpop.f32.mrf.mxu2  ;;  %v4807_v50 = vadd.f32 %v4806_v37, %v4805_v10  ;;  %v4694_v19 = vadd.f32 %v4693_v16, %v4692_v5  ;;  %v3867_v36 = vpop.f32.mrf.mxu3  ;;  %v4818_v16 = vsel %vm337_vm1, %v4764_v4, 0.0  ;;  %v4405_v41 = vld [vmem:[%s6130_s18 + $0xd8] sm:$0xff] }
 0x317   : > { %v2869_v28 = vpop.f32.mrf.mxu1  ;;  %v4298_v37 = vpop.f32.mrf.mxu0  ;;  %v4705_v9 = vsel %vm337_vm1, %v4650_v29, 0.0  ;;  %v4653_v61 = vmul.f32 %v8552_v27, %v4401_v44  ;;  %v4654_v5 = vmul.f32 %v8554_v63, %v4402_v21  ;;  %v4822_v22 = vsel %vm337_vm1, %v4766_v51, 0.0 }
 0x318   : > { %4373 = vst.msk [vmem:[%s6130_s18 + $0xf8] sm:$0xff] %vm337_vm1, %v4337_v25  ;;  %v2907_v39 = vadd.f32 %v2869_v28, %v2545_v15  ;;  %v4809_v35 = vadd.f32 %v4808_v58, %v4807_v50  ;;  %v4696_v59 = vadd.f32 %v4695_v20, %v4694_v19  ;;  %v4593_v10 = vpop.permute.xlu1 %4592  ;;  %v4707_v15 = vsel %vm337_vm1, %v4651_v43, 0.0 }
 0x319   : > { %v2978_v48 = vld [vmem:[%s6130_s18 + $0x110] sm:$0xff]  ;;  %v4767_v28 = vmul.f32 %v4652_v47, %v4652_v47  ;;  %v4709_v63 = vsel %vm337_vm1, %v4652_v47, 0.0  ;;  %v4768_v19 = vmul.f32 %v4653_v61, %v4653_v61  ;;  %v4769_v33 = vmul.f32 %v4654_v5, %v4654_v5 }
 0x31a   : > { %v3339_v17 = vadd.f32 %v3300_v45, %v2978_v48  ;;  %2943 = vst.msk [vmem:[%s6130_s18 + $0x118] sm:$0xff] %vm337_vm1, %v2907_v39  ;;  %v4811_v56 = vadd.f32 %v4810_v24, %v4809_v35  ;;  %v4698_v1 = vadd.f32 %v4697_v34, %v4696_v59  ;;  %v4820_v45 = vsel %vm337_vm1, %v4765_v2, 0.0  ;;  %v4404_v39 = vld [vmem:[%s6130_s18 + $0xd0] sm:$0xff] }
 0x31b   : > { %v3410_v0 = vld [vmem:[%s6130_s18 + $0x108] sm:$0xff]  ;;  %v4655_v24 = vmul.f32 %v8571_v38, %v4403_v62  ;;  %v4824_v30 = vsel %vm337_vm1, %v4767_v28, 0.0  ;;  %v4656_v35 = vmul.f32 %v4583_v57, %v4404_v39  ;;  %v4406_v38 = vld [vmem:[%s6130_s18 + $0xe0] sm:$0xff]  ;;  %v4713_v18 = vsel %vm337_vm1, %v4654_v5, 0.0  ;;  %v4408_v47 = vld [vmem:[%s6130_s18 + $0xf0] sm:$0xff] }
 0x31c   : > { %v3905_v8 = vadd.f32 %v3864_v49, %v3410_v0  ;;  %3375 = vst.msk [vmem:[%s6130_s18 + $0x110] sm:$0xff] %vm337_vm1, %v3339_v17  ;;  %v4813_v55 = vadd.f32 %v4812_v26, %v4811_v56  ;;  %v4700_v52 = vadd.f32 %v4699_v32, %v4698_v1  ;;  %v4711_v17 = vsel %vm337_vm1, %v4653_v61, 0.0  ;;  %v4598_v0 = vpop.permute.xlu2 %4597  ;;  %v4603_v29 = vpop.permute.xlu0 %4602  ;;  %v4407_v1 = vld [vmem:[%s6130_s18 + $0xe8] sm:$0xff] }
 0x31d   : > { %v3976_v12 = vld [vmem:[%s6130_s18 + $0x100] sm:$0xff]  ;;  %v4826_v32 = vsel %vm337_vm1, %v4768_v19, 0.0  ;;  %v4657_v56 = vmul.f32 %v4588_v40, %v4405_v41  ;;  %v4659_v2 = vmul.f32 %v4598_v0, %v4407_v1  ;;  %v4660_v61 = vmul.f32 %v4603_v29, %v4408_v47 }
 0x31e   : > { %3941 = vst.msk [vmem:[%s6130_s18 + $0x108] sm:$0xff] %vm337_vm1, %v3905_v8  ;;  %v4338_v60 = vadd.f32 %v4296_v54, %v3976_v12  ;;  %v4815_v42 = vadd.f32 %v4814_v13, %v4813_v55  ;;  %v4702_v53 = vadd.f32 %v4701_v23, %v4700_v52  ;;  %v3302_v14 = vpop.f32.mrf.mxu2  ;;  %v4770_v8 = vmul.f32 %v4655_v24, %v4655_v24  ;;  %v3869_v23 = vpop.f32.mrf.mxu3 }
 0x31f   : > { %v4828_v12 = vsel %vm337_vm1, %v4769_v33, 0.0  ;;  %v4301_v4 = vpop.f32.mrf.mxu0  ;;  %v4771_v55 = vmul.f32 %v4656_v35, %v4656_v35  ;;  %v4658_v52 = vmul.f32 %v4593_v10, %v4406_v38 }
 0x320   : > { %4374 = vst.msk [vmem:[%s6130_s18 + $0x100] sm:$0xff] %vm337_vm1, %v4338_v60  ;;  %v4817_v49 = vadd.f32 %v4816_v31, %v4815_v42  ;;  %v4704_v54 = vadd.f32 %v4703_v46, %v4702_v53  ;;  %v4715_v60 = vsel %vm337_vm1, %v4655_v24, 0.0  ;;  %v4608_v46 = vpop.permute.xlu1 %4607  ;;  %v4830_v21 = vsel %vm337_vm1, %v4770_v8, 0.0 }
 0x321   : > { %v2979_v3 = vld [vmem:[%s6130_s18 + $0x118] sm:$0xff]  ;;  %v4772_v42 = vmul.f32 %v4657_v56, %v4657_v56  ;;  %v4721_v62 = vsel %vm337_vm1, %v4658_v52, 0.0 }
 0x322   : > { %v3340_v25 = vadd.f32 %v3302_v14, %v2979_v3  ;;  %v4819_v27 = vadd.f32 %v4818_v16, %v4817_v49  ;;  %v4706_v20 = vadd.f32 %v4705_v9, %v4704_v54  ;;  %v4409_v14 = vld [vmem:[%s6130_s18 + $0xf8] sm:$0xff]  ;;  %v4719_v16 = vsel %vm337_vm1, %v4657_v56, 0.0 }
 0x323   : > { %v3411_v7 = vld [vmem:[%s6130_s18 + $0x110] sm:$0xff]  ;;  %v4773_v9 = vmul.f32 %v4658_v52, %v4658_v52  ;;  %v4774_v54 = vmul.f32 %v4659_v2, %v4659_v2  ;;  %v4834_v5 = vsel %vm337_vm1, %v4772_v42, 0.0 }
 0x324   : > { %v3906_v58 = vadd.f32 %v3867_v36, %v3411_v7  ;;  %3376 = vst.msk [vmem:[%s6130_s18 + $0x118] sm:$0xff] %vm337_vm1, %v3340_v25  ;;  %v4821_v48 = vadd.f32 %v4820_v45, %v4819_v27  ;;  %v4708_v34 = vadd.f32 %v4707_v15, %v4706_v20  ;;  %v4717_v36 = vsel %vm337_vm1, %v4656_v35, 0.0  ;;  %v4613_v45 = vpop.permute.xlu2 %4612 }
 0x325   : > { %v3977_v50 = vld [vmem:[%s6130_s18 + $0x108] sm:$0xff]  ;;  %v4661_v7 = vmul.f32 %v4608_v46, %v4409_v14  ;;  %v4836_v27 = vsel %vm337_vm1, %v4773_v9, 0.0  ;;  %v4723_v20 = vsel %vm337_vm1, %v4659_v2, 0.0  ;;  %v4838_v24 = vsel %vm337_vm1, %v4774_v54, 0.0 }
 0x326   : > { %3942 = vst.msk [vmem:[%s6130_s18 + $0x110] sm:$0xff] %vm337_vm1, %v3906_v58  ;;  %v4339_v11 = vadd.f32 %v4298_v37, %v3977_v50  ;;  %v4823_v59 = vadd.f32 %v4822_v22, %v4821_v48  ;;  %v4710_v26 = vadd.f32 %v4709_v63, %v4708_v34  ;;  %v4832_v37 = vsel %vm337_vm1, %v4771_v55, 0.0  ;;  %v4618_v50 = vpop.permute.xlu0 %4617 }
 0x327   : > { %v4410_v10 = vld [vmem:[%s6130_s18 + $0x100] sm:$0xff]  ;;  %v4775_v22 = vmul.f32 %v4660_v61, %v4660_v61  ;;  %v4303_v48 = vpop.f32.mrf.mxu0  ;;  %v4725_v34 = vsel %vm337_vm1, %v4660_v61, 0.0  ;;  %v4776_v33 = vmul.f32 %v4661_v7, %v4661_v7  ;;  %v4727_v38 = vsel %vm337_vm1, %v4661_v7, 0.0 }
 0x328   : > { %4375 = vst.msk [vmem:[%s6130_s18 + $0x108] sm:$0xff] %vm337_vm1, %v4339_v11  ;;  %v4825_v43 = vadd.f32 %v4824_v30, %v4823_v59  ;;  %v4712_v6 = vadd.f32 %v4711_v17, %v4710_v26  ;;  %v4662_v39 = vmul.f32 %v4613_v45, %v4410_v10  ;;  %v4623_v17 = vpop.permute.xlu1 %4622 }
 0x329   : > { %v4840_v0 = vsel %vm337_vm1, %v4775_v22, 0.0  ;;  %v4842_v56 = vsel %vm337_vm1, %v4776_v33, 0.0 }
 0x32a   : > { %v4827_v57 = vadd.f32 %v4826_v32, %v4825_v43  ;;  %v4714_v31 = vadd.f32 %v4713_v18, %v4712_v6  ;;  %v4777_v32 = vmul.f32 %v4662_v39, %v4662_v39  ;;  %v4729_v1 = vsel %vm337_vm1, %v4662_v39, 0.0 }
 0x32b   : > { %v3412_v13 = vld [vmem:[%s6130_s18 + $0x118] sm:$0xff] }
 0x32c   : > { %v3907_v44 = vadd.f32 %v3869_v23, %v3412_v13  ;;  %v4829_v51 = vadd.f32 %v4828_v12, %v4827_v57  ;;  %v4716_v3 = vadd.f32 %v4715_v60, %v4714_v31  ;;  %v4844_v13 = vsel %vm337_vm1, %v4777_v32, 0.0  ;;  %v4628_v57 = vpop.permute.xlu2 %4627 }
 0x32d   : > { %v3978_v40 = vld [vmem:[%s6130_s18 + $0x110] sm:$0xff] }
 0x32e   : > { %3943 = vst.msk [vmem:[%s6130_s18 + $0x118] sm:$0xff] %vm337_vm1, %v3907_v44  ;;  %v4340_v53 = vadd.f32 %v4301_v4, %v3978_v40  ;;  %v4831_v25 = vadd.f32 %v4830_v21, %v4829_v51  ;;  %v4718_v49 = vadd.f32 %v4717_v36, %v4716_v3 }
 0x32f   : > { %v4411_v58 = vld [vmem:[%s6130_s18 + $0x108] sm:$0xff] }
 0x330   : > { %4376 = vst.msk [vmem:[%s6130_s18 + $0x110] sm:$0xff] %vm337_vm1, %v4340_v53  ;;  %v4833_v15 = vadd.f32 %v4832_v37, %v4831_v25  ;;  %v4720_v28 = vadd.f32 %v4719_v16, %v4718_v49  ;;  %v4663_v41 = vmul.f32 %v4618_v50, %v4411_v58 }
 0x332   : > { %v4835_v63 = vadd.f32 %v4834_v5, %v4833_v15  ;;  %v4722_v19 = vadd.f32 %v4721_v62, %v4720_v28  ;;  %v4778_v43 = vmul.f32 %v4663_v41, %v4663_v41  ;;  %v4731_v23 = vsel %vm337_vm1, %v4663_v41, 0.0 }
 0x334   : > { %v4837_v35 = vadd.f32 %v4836_v27, %v4835_v63  ;;  %v4724_v59 = vadd.f32 %v4723_v20, %v4722_v19  ;;  %v4846_v52 = vsel %vm337_vm1, %v4778_v43, 0.0 }
 0x335   : > { %v3979_v11 = vld [vmem:[%s6130_s18 + $0x118] sm:$0xff] }
 0x336   : > { %v4341_v30 = vadd.f32 %v4303_v48, %v3979_v11  ;;  %v4839_v29 = vadd.f32 %v4838_v24, %v4837_v35  ;;  %v4726_v8 = vadd.f32 %v4725_v34, %v4724_v59 }
 0x337   : > { %v4412_v26 = vld [vmem:[%s6130_s18 + $0x110] sm:$0xff] }
 0x338   : > { %v4664_v18 = vmul.f32 %v4623_v17, %v4412_v26  ;;  %4377 = vst.msk [vmem:[%s6130_s18 + $0x118] sm:$0xff] %vm337_vm1, %v4341_v30  ;;  %v4841_v6 = vadd.f32 %v4840_v0, %v4839_v29  ;;  %v4728_v12 = vadd.f32 %v4727_v38, %v4726_v8 }
 0x33a   : > { %v4779_v4 = vmul.f32 %v4664_v18, %v4664_v18  ;;  %v4843_v60 = vadd.f32 %v4842_v56, %v4841_v6  ;;  %v4730_v55 = vadd.f32 %v4729_v1, %v4728_v12  ;;  %v4733_v44 = vsel %vm337_vm1, %v4664_v18, 0.0 }
 0x33c   : > { %v4845_v31 = vadd.f32 %v4844_v13, %v4843_v60  ;;  %v4732_v46 = vadd.f32 %v4731_v23, %v4730_v55  ;;  %v4848_v47 = vsel %vm337_vm1, %v4779_v4, 0.0 }
 0x33e   : > { %v4847_v21 = vadd.f32 %v4846_v52, %v4845_v31  ;;  %v4734_v36 = vadd.f32 %v4733_v44, %v4732_v46 }
 0x33f   : > { %v4413_v2 = vld [vmem:[%s6130_s18 + $0x118] sm:$0xff] }
 0x340   : > { %v4665_v40 = vmul.f32 %v4628_v57, %v4413_v2  ;;  %v4849_v51 = vadd.f32 %v4848_v47, %v4847_v21 }
 0x342   : > { %v4735_v42 = vsel %vm337_vm1, %v4665_v40, 0.0  ;;  %v4780_v53 = vmul.f32 %v4665_v40, %v4665_v40 }
 0x343   : > { %v4736_v3 = vadd.f32 %v4735_v42, %v4734_v36 }
 0x344   : > { %v4850_v14 = vsel %vm337_vm1, %v4780_v53, 0.0 }
 0x345   : > { %v4737_v37 = vrot.slane %v4736_v3, 4  ;;  %v4851_v16 = vadd.f32 %v4850_v14, %v4849_v51 }
 0x347   : > { %v4738_v9 = vadd.f32 %v4737_v37, %v4736_v3  ;;  %v4852_v61 = vrot.slane %v4851_v16, 4 }
 0x349   : > { %v4739_v25 = vrot.slane %v4738_v9, 2  ;;  %v4853_v49 = vadd.f32 %v4852_v61, %v4851_v16 }
 0x34b   : > { %v4740_v54 = vadd.f32 %v4739_v25, %v4738_v9  ;;  %v4854_v10 = vrot.slane %v4853_v49, 2 }
 0x34d   : > { %v4741_v5 = vrot.slane %v4740_v54, 1  ;;  %v4855_v62 = vadd.f32 %v4854_v10, %v4853_v49 }
 0x34f   : > { %v4742_v7 = vadd.f32 %v4741_v5, %v4740_v54  ;;  %v4856_v45 = vrot.slane %v4855_v62, 1 }
 0x351   : > { %4744 = vst.msk [vmem:[%s208_s26] sm:$0x1] %vm4743_vm8, %v4742_v7  ;;  %v4857_v15 = vadd.f32 %v4856_v45, %v4855_v62 }
 0x353   : > { %4858 = vst.msk [vmem:[%s208_s26 + $0x1] sm:$0x1] %vm4743_vm8, %v4857_v15 }
 0x354 PF: > { %s15_s15 = sadd.s32 1, %s5958_s15  }
 0x355   : > { %p12_p4 = scmp.ge.s32.totalorder %s15_s15, 4  }
 0x357   :  { %14 = sbr.rel (!%p12_p4) target bundleno = 1 (0x1), region = 82 }

</bundles_post_ra>
